<compile_context>
chip_gen: v7x
topology: tpu7x:2x2x1
jax: 0.10.0
libtpu: 0.0.40
codegen_flags: <defaults>
</compile_context>

<pallas_src>
import functools

import jax
import jax.numpy as jnp
from jax.experimental import pallas as pl
from jax.experimental.pallas import tpu as pltpu

EXPANSION = 4
BN_EPS = 1e-5


# ---------------------------------------------------------------------------
# In-kernel helpers
# ---------------------------------------------------------------------------
def _avg_pool_flat(x_flat, H, W, s, C):
    """AvgPool2d(s) on a channels-last (H*W, C) map -> (H//s * W//s, C).

    Uses only lane-preserving reshapes (last dim stays C) and static slices,
    so it lowers to cheap VPU adds instead of an MXU matmul.
    """
    if s == 1:
        return x_flat
    Ho, Wo = H // s, W // s
    # Pool along W: rows regroup as ((h * Wo + wo), i).
    t = x_flat.reshape(H * Wo, s, C)
    a = t[:, 0, :]
    for i in range(1, s):
        a = a + t[:, i, :]
    # Pool along H: rows regroup as (ho, j * Wo + wo).
    a = a.reshape(Ho, s * Wo, C)
    b = a[:, 0:Wo, :]
    for j in range(1, s):
        b = b + a[:, j * Wo:(j + 1) * Wo, :]
    return (b * (1.0 / (s * s))).reshape(Ho * Wo, C)


# ---------------------------------------------------------------------------
# Pallas kernel: one batch element per grid step, everything fused in VMEM.
# ---------------------------------------------------------------------------
def _bottleneck_kernel(x_ref, w1_ref, b1_ref, w2_ref, b2_ref, w3_ref, b3_ref,
                       *rest, stride, has_downsample):
    if has_downsample:
        wd_ref, bd_ref, o_ref, pad_ref, col_ref = rest
    else:
        wd_ref = bd_ref = None
        o_ref, pad_ref, col_ref = rest

    _, H, W, Cin = x_ref.shape
    P = w1_ref.shape[1]
    _, Ho, Wo, Cout = o_ref.shape
    HW = H * W
    s = stride

    x = x_ref[0].reshape(HW, Cin)                                   # f32 (HW, Cin)

    # conv1 (1x1, BN scale folded into weights) + bias + relu
    h1 = jnp.dot(x.astype(jnp.bfloat16), w1_ref[...],
                 preferred_element_type=jnp.float32)
    h1 = jnp.maximum(h1 + b1_ref[...], 0.0)                         # f32 (HW, P)

    # 3x3 conv (padding=1) via zero-padded scratch + im2col + single matmul.
    # Only the 1-pixel border needs zeroing; the interior is overwritten.
    zrow = jnp.zeros((1, W + 2, P), jnp.float32)
    pad_ref[0:1, :, :] = zrow
    pad_ref[H + 1:H + 2, :, :] = zrow
    zcol = jnp.zeros((H + 2, 1, P), jnp.float32)
    pad_ref[:, 0:1, :] = zcol
    pad_ref[:, W + 1:W + 2, :] = zcol
    pad_ref[1:H + 1, 1:W + 1, :] = h1.reshape(H, W, P)

    for dh in range(3):
        for dw in range(3):
            j = dh * 3 + dw
            tap = pad_ref[dh:dh + H, dw:dw + W, :].reshape(HW, P)
            col_ref[:, j * P:(j + 1) * P] = tap.astype(jnp.bfloat16)

    h2 = jnp.dot(col_ref[...], w2_ref[...],                         # K = 9*P
                 preferred_element_type=jnp.float32)
    h2 = jnp.maximum(h2 + b2_ref[...], 0.0)                         # f32 (HW, P)

    # avgpool(stride) (identity when stride == 1)
    h2p = _avg_pool_flat(h2, H, W, s, P)                            # (HoWo, P)

    # conv3 (1x1) + bias
    h3 = jnp.dot(h2p.astype(jnp.bfloat16), w3_ref[...],
                 preferred_element_type=jnp.float32)
    h3 = h3 + b3_ref[...]                                           # (HoWo, Cout)

    # identity / downsample path
    if has_downsample:
        xp = _avg_pool_flat(x, H, W, s, Cin)                        # (HoWo, Cin)
        ident = jnp.dot(xp.astype(jnp.bfloat16), wd_ref[...],
                        preferred_element_type=jnp.float32) + bd_ref[...]
    else:
        ident = x                                                   # Cin == Cout, s == 1

    out = jnp.maximum(h3 + ident, 0.0)
    o_ref[0] = out.reshape(Ho, Wo, Cout)


# ---------------------------------------------------------------------------
# Host-side wrapper
# ---------------------------------------------------------------------------
def _fuse_bn(bn):
    gamma, beta, mean, var = bn
    scale = gamma / jnp.sqrt(var + BN_EPS)
    bias = beta - mean * scale
    return scale, bias


def bottleneck_forward(x_nchw, params, stride):
    """Runs the Bottleneck block. x_nchw: (N, Cin, H, W) f32 -> (N, 4*planes, Ho, Wo)."""
    N, Cin, H, W = x_nchw.shape
    planes = params["conv1"].shape[0]
    Cout = planes * EXPANSION
    Ho, Wo = H // stride, W // stride
    has_downsample = params.get("conv_d") is not None

    # NCHW -> NHWC for the kernel (activations stay f32; cast at matmul inputs)
    x = jnp.transpose(x_nchw, (0, 2, 3, 1)).astype(jnp.float32)

    s1, b1 = _fuse_bn(params["bn1"])
    s2, b2 = _fuse_bn(params["bn2"])
    s3, b3 = _fuse_bn(params["bn3"])

    # Fold BN scales into the conv weights (host side), weights to bf16.
    w1 = (params["conv1"][:, :, 0, 0].T * s1[None, :]).astype(jnp.bfloat16)
    w2 = jnp.transpose(params["conv2"], (2, 3, 1, 0)) * s2[None, None, None, :]
    w2 = w2.reshape(9 * planes, planes).astype(jnp.bfloat16)        # (dh,dw,cin)-major
    w3 = (params["conv3"][:, :, 0, 0].T * s3[None, :]).astype(jnp.bfloat16)

    args = [x, w1, b1.reshape(1, -1).astype(jnp.float32),
            w2, b2.reshape(1, -1).astype(jnp.float32),
            w3, b3.reshape(1, -1).astype(jnp.float32)]
    in_specs = [
        pl.BlockSpec((1, H, W, Cin), lambda n: (n, 0, 0, 0)),
        pl.BlockSpec((Cin, planes), lambda n: (0, 0)),
        pl.BlockSpec((1, planes), lambda n: (0, 0)),
        pl.BlockSpec((9 * planes, planes), lambda n: (0, 0)),
        pl.BlockSpec((1, planes), lambda n: (0, 0)),
        pl.BlockSpec((planes, Cout), lambda n: (0, 0)),
        pl.BlockSpec((1, Cout), lambda n: (0, 0)),
    ]
    if has_downsample:
        sd, bd = _fuse_bn(params["bn_d"])
        wd = (params["conv_d"][:, :, 0, 0].T * sd[None, :]).astype(jnp.bfloat16)
        args += [wd, bd.reshape(1, -1).astype(jnp.float32)]
        in_specs += [
            pl.BlockSpec((Cin, Cout), lambda n: (0, 0)),
            pl.BlockSpec((1, Cout), lambda n: (0, 0)),
        ]

    kernel = functools.partial(_bottleneck_kernel, stride=stride,
                               has_downsample=has_downsample)

    out_nhwc = pl.pallas_call(
        kernel,
        out_shape=jax.ShapeDtypeStruct((N, Ho, Wo, Cout), jnp.float32),
        grid_spec=pltpu.PrefetchScalarGridSpec(
            num_scalar_prefetch=0,
            grid=(N,),
            in_specs=in_specs,
            out_specs=pl.BlockSpec((1, Ho, Wo, Cout), lambda n: (n, 0, 0, 0)),
            scratch_shapes=[
                pltpu.VMEM((H + 2, W + 2, planes), jnp.float32),     # padded h1
                pltpu.VMEM((H * W, 9 * planes), jnp.bfloat16),       # im2col
            ]),
        compiler_params=pltpu.CompilerParams(
            dimension_semantics=("parallel",),
            vmem_limit_bytes=64 * 1024 * 1024),
    )(*args)

    # NHWC -> NCHW
    return jnp.transpose(out_nhwc, (0, 3, 1, 2))


# ---------------------------------------------------------------------------
# Pure-JAX reference (NCHW, lax.conv), mirroring the PyTorch forward exactly.
# ---------------------------------------------------------------------------
def bottleneck_reference(x, params, stride):
    hp = jax.lax.Precision.HIGHEST

    def bn(y, p):
        g, b, m, v = (t[None, :, None, None] for t in p)
        return (y - m) / jnp.sqrt(v + BN_EPS) * g + b

    def conv(y, w, pad):
        return jax.lax.conv_general_dilated(
            y, w, (1, 1), pad,
            dimension_numbers=("NCHW", "OIHW", "NCHW"), precision=hp)

    def avgpool(y, s):
        if s == 1:
            return y
        N, C, H, W = y.shape
        return y.reshape(N, C, H // s, s, W // s, s).mean(axis=(3, 5))

    out = jax.nn.relu(bn(conv(x, params["conv1"], "VALID"), params["bn1"]))
    out = jax.nn.relu(bn(conv(out, params["conv2"], ((1, 1), (1, 1))), params["bn2"]))
    out = avgpool(out, stride)
    out = bn(conv(out, params["conv3"], "VALID"), params["bn3"])
    if params.get("conv_d") is not None:
        identity = bn(conv(avgpool(x, stride), params["conv_d"], "VALID"), params["bn_d"])
    else:
        identity = x
    return jax.nn.relu(out + identity)


# ---------------------------------------------------------------------------
def _init_params(key, inplanes, planes, stride):
    cout = planes * EXPANSION
    ks = list(jax.random.split(key, 20))
    k = iter(ks)

    def bn_params(c):
        gamma = 1.0 + 0.1 * jax.random.normal(next(k), (c,), jnp.float32)
        beta = 0.1 * jax.random.normal(next(k), (c,), jnp.float32)
        mean = 0.1 * jax.random.normal(next(k), (c,), jnp.float32)
        var = jax.random.uniform(next(k), (c,), jnp.float32, 0.5, 1.5)
        return (gamma, beta, mean, var)

    p = {
        "conv1": 0.1 * jax.random.normal(next(k), (planes, inplanes, 1, 1), jnp.float32),
        "conv2": 0.1 * jax.random.normal(next(k), (planes, planes, 3, 3), jnp.float32),
        "conv3": 0.1 * jax.random.normal(next(k), (cout, planes, 1, 1), jnp.float32),
    }
    p["bn1"] = bn_params(planes)
    p["bn2"] = bn_params(planes)
    p["bn3"] = bn_params(cout)
    if stride > 1 or inplanes != cout:
        p["conv_d"] = 0.1 * jax.random.normal(next(k), (cout, inplanes, 1, 1), jnp.float32)
        p["bn_d"] = bn_params(cout)
    else:
        p["conv_d"] = None
        p["bn_d"] = None
    return p


if __name__ == "__main__":
    configs = [
        # (N, inplanes, H,  W,  planes, stride)
        (2, 64, 16, 16, 32, 2),    # downsample path (stride 2, conv_d + bn_d)
        (2, 128, 16, 16, 32, 1),   # pure identity path (no downsample)
    ]
    key = jax.random.PRNGKey(0)
    for idx, (N, inplanes, H, W, planes, stride) in enumerate(configs):
        kx, kp, key = jax.random.split(key, 3)
        x = jax.random.normal(kx, (N, inplanes, H, W), jnp.float32)
        params = _init_params(kp, inplanes, planes, stride)

        out = jax.block_until_ready(bottleneck_forward(x, params, stride))
        ref = jax.block_until_ready(bottleneck_reference(x, params, stride))

        expected = (N, planes * EXPANSION, H // stride, W // stride)
        assert out.shape == ref.shape == expected, (out.shape, ref.shape, expected)
        max_err = float(jnp.max(jnp.abs(out - ref)))
        assert jnp.allclose(out, ref, atol=5e-2, rtol=5e-2), \
            f"config {idx}: mismatch, max_err={max_err}"

    print("KERNEL_OK")
</pallas_src>

<mosaic_0001>
module attributes {stable_mosaic.version = 11 : i64} {
  func.func @_bottleneck_kernel(%arg0: i32, %arg1: memref<1x16x16x64xf32, #tpu.memory_space<vmem>>, %arg2: memref<64x32xbf16, #tpu.memory_space<vmem>>, %arg3: memref<1x32xf32, #tpu.memory_space<vmem>>, %arg4: memref<288x32xbf16, #tpu.memory_space<vmem>>, %arg5: memref<1x32xf32, #tpu.memory_space<vmem>>, %arg6: memref<32x128xbf16, #tpu.memory_space<vmem>>, %arg7: memref<1x128xf32, #tpu.memory_space<vmem>>, %arg8: memref<64x128xbf16, #tpu.memory_space<vmem>>, %arg9: memref<1x128xf32, #tpu.memory_space<vmem>>, %arg10: memref<1x8x8x128xf32, #tpu.memory_space<vmem>>, %arg11: memref<18x18x32xf32, #tpu.memory_space<vmem>>, %arg12: memref<256x288xbf16, #tpu.memory_space<vmem>>) attributes {dimension_semantics = [#tpu.dimension_semantics<parallel>], iteration_bounds = array<i64: 2>, scalar_prefetch = 0 : i64, scratch_operands = 2 : i64, tpu.core_type = #tpu.core_type<tc>, window_params = [{transform_indices = @transform_0, window_bounds = array<i64: 1, 16, 16, 64>}, {pipeline_mode = #tpu.pipeline_mode<synchronous>, transform_indices = @transform_1, window_bounds = array<i64: 64, 32>}, {pipeline_mode = #tpu.pipeline_mode<synchronous>, transform_indices = @transform_2, window_bounds = array<i64: 1, 32>}, {pipeline_mode = #tpu.pipeline_mode<synchronous>, transform_indices = @transform_3, window_bounds = array<i64: 288, 32>}, {pipeline_mode = #tpu.pipeline_mode<synchronous>, transform_indices = @transform_4, window_bounds = array<i64: 1, 32>}, {pipeline_mode = #tpu.pipeline_mode<synchronous>, transform_indices = @transform_5, window_bounds = array<i64: 32, 128>}, {pipeline_mode = #tpu.pipeline_mode<synchronous>, transform_indices = @transform_6, window_bounds = array<i64: 1, 128>}, {pipeline_mode = #tpu.pipeline_mode<synchronous>, transform_indices = @transform_7, window_bounds = array<i64: 64, 128>}, {pipeline_mode = #tpu.pipeline_mode<synchronous>, transform_indices = @transform_8, window_bounds = array<i64: 1, 128>}, {transform_indices = @transform_9, window_bounds = array<i64: 1, 8, 8, 128>}]} {
    %c0 = arith.constant 0 : index
    %c0_0 = arith.constant 0 : index
    %c0_1 = arith.constant 0 : index
    %c0_2 = arith.constant 0 : index
    %0 = vector.load %arg1[%c0, %c0_0, %c0_1, %c0_2] : memref<1x16x16x64xf32, #tpu.memory_space<vmem>>, vector<1x16x16x64xf32>
    %1 = vector.shape_cast %0 : vector<1x16x16x64xf32> to vector<16x16x64xf32>
    %2 = vector.shape_cast %1 : vector<16x16x64xf32> to vector<256x64xf32>
    %3 = arith.truncf %2 : vector<256x64xf32> to vector<256x64xbf16>
    %c0_3 = arith.constant 0 : index
    %c0_4 = arith.constant 0 : index
    %4 = vector.load %arg2[%c0_3, %c0_4] : memref<64x32xbf16, #tpu.memory_space<vmem>>, vector<64x32xbf16>
    %cst = arith.constant dense<0.000000e+00> : vector<256x32xf32>
    %5 = tpu.matmul %3, %4, %cst {dimension_numbers = #tpu.dot_dimension_numbers<[1], [0], [0], [1], [0, 0, 1, 1], [], []>} : vector<256x64xbf16>, vector<64x32xbf16>, vector<256x32xf32> -> vector<256x32xf32>
    %c0_5 = arith.constant 0 : index
    %c0_6 = arith.constant 0 : index
    %6 = vector.load %arg3[%c0_5, %c0_6] : memref<1x32xf32, #tpu.memory_space<vmem>>, vector<1x32xf32>
    %7 = vector.broadcast %6 : vector<1x32xf32> to vector<256x32xf32>
    %8 = arith.addf %5, %7 : vector<256x32xf32>
    %cst_7 = arith.constant 0.000000e+00 : f32
    %9 = vector.broadcast %cst_7 : f32 to vector<256x32xf32>
    %10 = arith.maximumf %8, %9 : vector<256x32xf32>
    %cst_8 = arith.constant 0.000000e+00 : f32
    %11 = vector.broadcast %cst_8 : f32 to vector<1x18x32xf32>
    %c0_9 = arith.constant 0 : index
    %c0_10 = arith.constant 0 : index
    %c0_11 = arith.constant 0 : index
    %12 = vector.load %arg11[%c0_9, %c0_10, %c0_11] : memref<18x18x32xf32, #tpu.memory_space<vmem>>, vector<1x18x32xf32>
    tpu.vector_store %arg11[%c0_9, %c0_10, %c0_11], %11 {strides = array<i32>} : memref<18x18x32xf32, #tpu.memory_space<vmem>>, vector<1x18x32xf32>,
    %c17 = arith.constant 17 : index
    %c0_12 = arith.constant 0 : index
    %c0_13 = arith.constant 0 : index
    %13 = vector.load %arg11[%c17, %c0_12, %c0_13] : memref<18x18x32xf32, #tpu.memory_space<vmem>>, vector<1x18x32xf32>
    tpu.vector_store %arg11[%c17, %c0_12, %c0_13], %11 {strides = array<i32>} : memref<18x18x32xf32, #tpu.memory_space<vmem>>, vector<1x18x32xf32>,
    %cst_14 = arith.constant 0.000000e+00 : f32
    %14 = vector.broadcast %cst_14 : f32 to vector<18x1x32xf32>
    %c0_15 = arith.constant 0 : index
    %c0_16 = arith.constant 0 : index
    %c0_17 = arith.constant 0 : index
    %15 = vector.load %arg11[%c0_15, %c0_16, %c0_17] : memref<18x18x32xf32, #tpu.memory_space<vmem>>, vector<18x1x32xf32>
    tpu.vector_store %arg11[%c0_15, %c0_16, %c0_17], %14 {strides = array<i32>} : memref<18x18x32xf32, #tpu.memory_space<vmem>>, vector<18x1x32xf32>,
    %c0_18 = arith.constant 0 : index
    %c17_19 = arith.constant 17 : index
    %c0_20 = arith.constant 0 : index
    %16 = vector.load %arg11[%c0_18, %c17_19, %c0_20] : memref<18x18x32xf32, #tpu.memory_space<vmem>>, vector<18x1x32xf32>
    tpu.vector_store %arg11[%c0_18, %c17_19, %c0_20], %14 {strides = array<i32>} : memref<18x18x32xf32, #tpu.memory_space<vmem>>, vector<18x1x32xf32>,
    %17 = vector.shape_cast %10 : vector<256x32xf32> to vector<16x16x32xf32>
    %c1 = arith.constant 1 : index
    %c1_21 = arith.constant 1 : index
    %c0_22 = arith.constant 0 : index
    %18 = vector.load %arg11[%c1, %c1_21, %c0_22] : memref<18x18x32xf32, #tpu.memory_space<vmem>>, vector<16x16x32xf32>
    tpu.vector_store %arg11[%c1, %c1_21, %c0_22], %17 {strides = array<i32>} : memref<18x18x32xf32, #tpu.memory_space<vmem>>, vector<16x16x32xf32>,
    %c0_23 = arith.constant 0 : index
    %c0_24 = arith.constant 0 : index
    %c0_25 = arith.constant 0 : index
    %19 = vector.load %arg11[%c0_23, %c0_24, %c0_25] : memref<18x18x32xf32, #tpu.memory_space<vmem>>, vector<16x16x32xf32>
    %20 = vector.shape_cast %19 : vector<16x16x32xf32> to vector<256x32xf32>
    %21 = arith.truncf %20 : vector<256x32xf32> to vector<256x32xbf16>
    %c0_26 = arith.constant 0 : index
    %c0_27 = arith.constant 0 : index
    %22 = vector.load %arg12[%c0_26, %c0_27] : memref<256x288xbf16, #tpu.memory_space<vmem>>, vector<256x32xbf16>
    tpu.vector_store %arg12[%c0_26, %c0_27], %21 {strides = array<i32>} : memref<256x288xbf16, #tpu.memory_space<vmem>>, vector<256x32xbf16>,
    %c0_28 = arith.constant 0 : index
    %c1_29 = arith.constant 1 : index
    %c0_30 = arith.constant 0 : index
    %23 = vector.load %arg11[%c0_28, %c1_29, %c0_30] : memref<18x18x32xf32, #tpu.memory_space<vmem>>, vector<16x16x32xf32>
    %24 = vector.shape_cast %23 : vector<16x16x32xf32> to vector<256x32xf32>
    %25 = arith.truncf %24 : vector<256x32xf32> to vector<256x32xbf16>
    %c0_31 = arith.constant 0 : index
    %c32 = arith.constant 32 : index
    %26 = vector.load %arg12[%c0_31, %c32] : memref<256x288xbf16, #tpu.memory_space<vmem>>, vector<256x32xbf16>
    tpu.vector_store %arg12[%c0_31, %c32], %25 {strides = array<i32>} : memref<256x288xbf16, #tpu.memory_space<vmem>>, vector<256x32xbf16>,
    %c0_32 = arith.constant 0 : index
    %c2 = arith.constant 2 : index
    %c0_33 = arith.constant 0 : index
    %27 = vector.load %arg11[%c0_32, %c2, %c0_33] : memref<18x18x32xf32, #tpu.memory_space<vmem>>, vector<16x16x32xf32>
    %28 = vector.shape_cast %27 : vector<16x16x32xf32> to vector<256x32xf32>
    %29 = arith.truncf %28 : vector<256x32xf32> to vector<256x32xbf16>
    %c0_34 = arith.constant 0 : index
    %c64 = arith.constant 64 : index
    %30 = vector.load %arg12[%c0_34, %c64] : memref<256x288xbf16, #tpu.memory_space<vmem>>, vector<256x32xbf16>
    tpu.vector_store %arg12[%c0_34, %c64], %29 {strides = array<i32>} : memref<256x288xbf16, #tpu.memory_space<vmem>>, vector<256x32xbf16>,
    %c1_35 = arith.constant 1 : index
    %c0_36 = arith.constant 0 : index
    %c0_37 = arith.constant 0 : index
    %31 = vector.load %arg11[%c1_35, %c0_36, %c0_37] : memref<18x18x32xf32, #tpu.memory_space<vmem>>, vector<16x16x32xf32>
    %32 = vector.shape_cast %31 : vector<16x16x32xf32> to vector<256x32xf32>
    %33 = arith.truncf %32 : vector<256x32xf32> to vector<256x32xbf16>
    %c0_38 = arith.constant 0 : index
    %c96 = arith.constant 96 : index
    %34 = vector.load %arg12[%c0_38, %c96] : memref<256x288xbf16, #tpu.memory_space<vmem>>, vector<256x32xbf16>
    tpu.vector_store %arg12[%c0_38, %c96], %33 {strides = array<i32>} : memref<256x288xbf16, #tpu.memory_space<vmem>>, vector<256x32xbf16>,
    %c1_39 = arith.constant 1 : index
    %c1_40 = arith.constant 1 : index
    %c0_41 = arith.constant 0 : index
    %35 = vector.load %arg11[%c1_39, %c1_40, %c0_41] : memref<18x18x32xf32, #tpu.memory_space<vmem>>, vector<16x16x32xf32>
    %36 = vector.shape_cast %35 : vector<16x16x32xf32> to vector<256x32xf32>
    %37 = arith.truncf %36 : vector<256x32xf32> to vector<256x32xbf16>
    %c0_42 = arith.constant 0 : index
    %c128 = arith.constant 128 : index
    %38 = vector.load %arg12[%c0_42, %c128] : memref<256x288xbf16, #tpu.memory_space<vmem>>, vector<256x32xbf16>
    tpu.vector_store %arg12[%c0_42, %c128], %37 {strides = array<i32>} : memref<256x288xbf16, #tpu.memory_space<vmem>>, vector<256x32xbf16>,
    %c1_43 = arith.constant 1 : index
    %c2_44 = arith.constant 2 : index
    %c0_45 = arith.constant 0 : index
    %39 = vector.load %arg11[%c1_43, %c2_44, %c0_45] : memref<18x18x32xf32, #tpu.memory_space<vmem>>, vector<16x16x32xf32>
    %40 = vector.shape_cast %39 : vector<16x16x32xf32> to vector<256x32xf32>
    %41 = arith.truncf %40 : vector<256x32xf32> to vector<256x32xbf16>
    %c0_46 = arith.constant 0 : index
    %c160 = arith.constant 160 : index
    %42 = vector.load %arg12[%c0_46, %c160] : memref<256x288xbf16, #tpu.memory_space<vmem>>, vector<256x32xbf16>
    tpu.vector_store %arg12[%c0_46, %c160], %41 {strides = array<i32>} : memref<256x288xbf16, #tpu.memory_space<vmem>>, vector<256x32xbf16>,
    %c2_47 = arith.constant 2 : index
    %c0_48 = arith.constant 0 : index
    %c0_49 = arith.constant 0 : index
    %43 = vector.load %arg11[%c2_47, %c0_48, %c0_49] : memref<18x18x32xf32, #tpu.memory_space<vmem>>, vector<16x16x32xf32>
    %44 = vector.shape_cast %43 : vector<16x16x32xf32> to vector<256x32xf32>
    %45 = arith.truncf %44 : vector<256x32xf32> to vector<256x32xbf16>
    %c0_50 = arith.constant 0 : index
    %c192 = arith.constant 192 : index
    %46 = vector.load %arg12[%c0_50, %c192] : memref<256x288xbf16, #tpu.memory_space<vmem>>, vector<256x32xbf16>
    tpu.vector_store %arg12[%c0_50, %c192], %45 {strides = array<i32>} : memref<256x288xbf16, #tpu.memory_space<vmem>>, vector<256x32xbf16>,
    %c2_51 = arith.constant 2 : index
    %c1_52 = arith.constant 1 : index
    %c0_53 = arith.constant 0 : index
    %47 = vector.load %arg11[%c2_51, %c1_52, %c0_53] : memref<18x18x32xf32, #tpu.memory_space<vmem>>, vector<16x16x32xf32>
    %48 = vector.shape_cast %47 : vector<16x16x32xf32> to vector<256x32xf32>
    %49 = arith.truncf %48 : vector<256x32xf32> to vector<256x32xbf16>
    %c0_54 = arith.constant 0 : index
    %c224 = arith.constant 224 : index
    %50 = vector.load %arg12[%c0_54, %c224] : memref<256x288xbf16, #tpu.memory_space<vmem>>, vector<256x32xbf16>
    tpu.vector_store %arg12[%c0_54, %c224], %49 {strides = array<i32>} : memref<256x288xbf16, #tpu.memory_space<vmem>>, vector<256x32xbf16>,
    %c2_55 = arith.constant 2 : index
    %c2_56 = arith.constant 2 : index
    %c0_57 = arith.constant 0 : index
    %51 = vector.load %arg11[%c2_55, %c2_56, %c0_57] : memref<18x18x32xf32, #tpu.memory_space<vmem>>, vector<16x16x32xf32>
    %52 = vector.shape_cast %51 : vector<16x16x32xf32> to vector<256x32xf32>
    %53 = arith.truncf %52 : vector<256x32xf32> to vector<256x32xbf16>
    %c0_58 = arith.constant 0 : index
    %c256 = arith.constant 256 : index
    %54 = vector.load %arg12[%c0_58, %c256] : memref<256x288xbf16, #tpu.memory_space<vmem>>, vector<256x32xbf16>
    tpu.vector_store %arg12[%c0_58, %c256], %53 {strides = array<i32>} : memref<256x288xbf16, #tpu.memory_space<vmem>>, vector<256x32xbf16>,
    %c0_59 = arith.constant 0 : index
    %c0_60 = arith.constant 0 : index
    %55 = vector.load %arg12[%c0_59, %c0_60] : memref<256x288xbf16, #tpu.memory_space<vmem>>, vector<256x288xbf16>
    %c0_61 = arith.constant 0 : index
    %c0_62 = arith.constant 0 : index
    %56 = vector.load %arg4[%c0_61, %c0_62] : memref<288x32xbf16, #tpu.memory_space<vmem>>, vector<288x32xbf16>
    %cst_63 = arith.constant dense<0.000000e+00> : vector<256x32xf32>
    %57 = tpu.matmul %55, %56, %cst_63 {dimension_numbers = #tpu.dot_dimension_numbers<[1], [0], [0], [1], [0, 0, 1, 1], [], []>} : vector<256x288xbf16>, vector<288x32xbf16>, vector<256x32xf32> -> vector<256x32xf32>
    %c0_64 = arith.constant 0 : index
    %c0_65 = arith.constant 0 : index
    %58 = vector.load %arg5[%c0_64, %c0_65] : memref<1x32xf32, #tpu.memory_space<vmem>>, vector<1x32xf32>
    %59 = vector.broadcast %58 : vector<1x32xf32> to vector<256x32xf32>
    %60 = arith.addf %57, %59 : vector<256x32xf32>
    %cst_66 = arith.constant 0.000000e+00 : f32
    %61 = vector.broadcast %cst_66 : f32 to vector<256x32xf32>
    %62 = arith.maximumf %60, %61 : vector<256x32xf32>
    %63 = vector.shape_cast %62 : vector<256x32xf32> to vector<128x2x32xf32>
    %64 = vector.extract_strided_slice %63 {offsets = [0, 0, 0], sizes = [128, 1, 32], strides = [1, 1, 1]} : vector<128x2x32xf32> to vector<128x1x32xf32>
    %65 = vector.shape_cast %64 : vector<128x1x32xf32> to vector<128x32xf32>
    %66 = vector.extract_strided_slice %63 {offsets = [0, 1, 0], sizes = [128, 1, 32], strides = [1, 1, 1]} : vector<128x2x32xf32> to vector<128x1x32xf32>
    %67 = vector.shape_cast %66 : vector<128x1x32xf32> to vector<128x32xf32>
    %68 = arith.addf %65, %67 : vector<128x32xf32>
    %69 = vector.shape_cast %68 : vector<128x32xf32> to vector<8x16x32xf32>
    %70 = vector.extract_strided_slice %69 {offsets = [0, 0, 0], sizes = [8, 8, 32], strides = [1, 1, 1]} : vector<8x16x32xf32> to vector<8x8x32xf32>
    %71 = vector.extract_strided_slice %69 {offsets = [0, 8, 0], sizes = [8, 8, 32], strides = [1, 1, 1]} : vector<8x16x32xf32> to vector<8x8x32xf32>
    %72 = arith.addf %70, %71 : vector<8x8x32xf32>
    %cst_67 = arith.constant 2.500000e-01 : f32
    %73 = vector.broadcast %cst_67 : f32 to vector<8x8x32xf32>
    %74 = arith.mulf %72, %73 : vector<8x8x32xf32>
    %75 = vector.shape_cast %74 : vector<8x8x32xf32> to vector<64x32xf32>
    %76 = arith.truncf %75 : vector<64x32xf32> to vector<64x32xbf16>
    %c0_68 = arith.constant 0 : index
    %c0_69 = arith.constant 0 : index
    %77 = vector.load %arg6[%c0_68, %c0_69] : memref<32x128xbf16, #tpu.memory_space<vmem>>, vector<32x128xbf16>
    %cst_70 = arith.constant dense<0.000000e+00> : vector<64x128xf32>
    %78 = tpu.matmul %76, %77, %cst_70 {dimension_numbers = #tpu.dot_dimension_numbers<[1], [0], [0], [1], [0, 0, 1, 1], [], []>} : vector<64x32xbf16>, vector<32x128xbf16>, vector<64x128xf32> -> vector<64x128xf32>
    %c0_71 = arith.constant 0 : index
    %c0_72 = arith.constant 0 : index
    %79 = vector.load %arg7[%c0_71, %c0_72] : memref<1x128xf32, #tpu.memory_space<vmem>>, vector<1x128xf32>
    %80 = vector.broadcast %79 : vector<1x128xf32> to vector<64x128xf32>
    %81 = arith.addf %78, %80 : vector<64x128xf32>
    %82 = vector.shape_cast %2 : vector<256x64xf32> to vector<128x2x64xf32>
    %83 = vector.extract_strided_slice %82 {offsets = [0, 0, 0], sizes = [128, 1, 64], strides = [1, 1, 1]} : vector<128x2x64xf32> to vector<128x1x64xf32>
    %84 = vector.shape_cast %83 : vector<128x1x64xf32> to vector<128x64xf32>
    %85 = vector.extract_strided_slice %82 {offsets = [0, 1, 0], sizes = [128, 1, 64], strides = [1, 1, 1]} : vector<128x2x64xf32> to vector<128x1x64xf32>
    %86 = vector.shape_cast %85 : vector<128x1x64xf32> to vector<128x64xf32>
    %87 = arith.addf %84, %86 : vector<128x64xf32>
    %88 = vector.shape_cast %87 : vector<128x64xf32> to vector<8x16x64xf32>
    %89 = vector.extract_strided_slice %88 {offsets = [0, 0, 0], sizes = [8, 8, 64], strides = [1, 1, 1]} : vector<8x16x64xf32> to vector<8x8x64xf32>
    %90 = vector.extract_strided_slice %88 {offsets = [0, 8, 0], sizes = [8, 8, 64], strides = [1, 1, 1]} : vector<8x16x64xf32> to vector<8x8x64xf32>
    %91 = arith.addf %89, %90 : vector<8x8x64xf32>
    %cst_73 = arith.constant 2.500000e-01 : f32
    %92 = vector.broadcast %cst_73 : f32 to vector<8x8x64xf32>
    %93 = arith.mulf %91, %92 : vector<8x8x64xf32>
    %94 = vector.shape_cast %93 : vector<8x8x64xf32> to vector<64x64xf32>
    %95 = arith.truncf %94 : vector<64x64xf32> to vector<64x64xbf16>
    %c0_74 = arith.constant 0 : index
    %c0_75 = arith.constant 0 : index
    %96 = vector.load %arg8[%c0_74, %c0_75] : memref<64x128xbf16, #tpu.memory_space<vmem>>, vector<64x128xbf16>
    %cst_76 = arith.constant dense<0.000000e+00> : vector<64x128xf32>
    %97 = tpu.matmul %95, %96, %cst_76 {dimension_numbers = #tpu.dot_dimension_numbers<[1], [0], [0], [1], [0, 0, 1, 1], [], []>} : vector<64x64xbf16>, vector<64x128xbf16>, vector<64x128xf32> -> vector<64x128xf32>
    %c0_77 = arith.constant 0 : index
    %c0_78 = arith.constant 0 : index
    %98 = vector.load %arg9[%c0_77, %c0_78] : memref<1x128xf32, #tpu.memory_space<vmem>>, vector<1x128xf32>
    %99 = vector.broadcast %98 : vector<1x128xf32> to vector<64x128xf32>
    %100 = arith.addf %97, %99 : vector<64x128xf32>
    %101 = arith.addf %81, %100 : vector<64x128xf32>
    %cst_79 = arith.constant 0.000000e+00 : f32
    %102 = vector.broadcast %cst_79 : f32 to vector<64x128xf32>
    %103 = arith.maximumf %101, %102 : vector<64x128xf32>
    %104 = vector.shape_cast %103 : vector<64x128xf32> to vector<8x8x128xf32>
    %c0_80 = arith.constant 0 : index
    %c0_81 = arith.constant 0 : index
    %c0_82 = arith.constant 0 : index
    %c0_83 = arith.constant 0 : index
    %105 = vector.load %arg10[%c0_80, %c0_81, %c0_82, %c0_83] : memref<1x8x8x128xf32, #tpu.memory_space<vmem>>, vector<1x8x8x128xf32>
    %106 = vector.shape_cast %105 : vector<1x8x8x128xf32> to vector<8x8x128xf32>
    %107 = vector.shape_cast %104 : vector<8x8x128xf32> to vector<1x8x8x128xf32>
    tpu.vector_store %arg10[%c0_80, %c0_81, %c0_82, %c0_83], %107 {strides = array<i32>} : memref<1x8x8x128xf32, #tpu.memory_space<vmem>>, vector<1x8x8x128xf32>,
    return
  }
  func.func @transform_0(%arg0: i32) -> (i32, i32, i32, i32) {
    %c0_i32 = arith.constant 0 : i32
    %c0_i32_0 = arith.constant 0 : i32
    %c0_i32_1 = arith.constant 0 : i32
    %c0_i32_2 = arith.constant 0 : i32
    return %arg0, %c0_i32, %c0_i32_0, %c0_i32_1 : i32, i32, i32, i32
  }
  func.func @transform_1(%arg0: i32) -> (i32, i32) {
    %c0_i32 = arith.constant 0 : i32
    %c0_i32_0 = arith.constant 0 : i32
    %c0_i32_1 = arith.constant 0 : i32
    return %c0_i32, %c0_i32_0 : i32, i32
  }
  func.func @transform_2(%arg0: i32) -> (i32, i32) {
    %c0_i32 = arith.constant 0 : i32
    %c0_i32_0 = arith.constant 0 : i32
    %c0_i32_1 = arith.constant 0 : i32
    return %c0_i32, %c0_i32_0 : i32, i32
  }
  func.func @transform_3(%arg0: i32) -> (i32, i32) {
    %c0_i32 = arith.constant 0 : i32
    %c0_i32_0 = arith.constant 0 : i32
    %c0_i32_1 = arith.constant 0 : i32
    return %c0_i32, %c0_i32_0 : i32, i32
  }
  func.func @transform_4(%arg0: i32) -> (i32, i32) {
    %c0_i32 = arith.constant 0 : i32
    %c0_i32_0 = arith.constant 0 : i32
    %c0_i32_1 = arith.constant 0 : i32
    return %c0_i32, %c0_i32_0 : i32, i32
  }
  func.func @transform_5(%arg0: i32) -> (i32, i32) {
    %c0_i32 = arith.constant 0 : i32
    %c0_i32_0 = arith.constant 0 : i32
    %c0_i32_1 = arith.constant 0 : i32
    return %c0_i32, %c0_i32_0 : i32, i32
  }
  func.func @transform_6(%arg0: i32) -> (i32, i32) {
    %c0_i32 = arith.constant 0 : i32
    %c0_i32_0 = arith.constant 0 : i32
    %c0_i32_1 = arith.constant 0 : i32
    return %c0_i32, %c0_i32_0 : i32, i32
  }
  func.func @transform_7(%arg0: i32) -> (i32, i32) {
    %c0_i32 = arith.constant 0 : i32
    %c0_i32_0 = arith.constant 0 : i32
    %c0_i32_1 = arith.constant 0 : i32
    return %c0_i32, %c0_i32_0 : i32, i32
  }
  func.func @transform_8(%arg0: i32) -> (i32, i32) {
    %c0_i32 = arith.constant 0 : i32
    %c0_i32_0 = arith.constant 0 : i32
    %c0_i32_1 = arith.constant 0 : i32
    return %c0_i32, %c0_i32_0 : i32, i32
  }
  func.func @transform_9(%arg0: i32) -> (i32, i32, i32, i32) {
    %c0_i32 = arith.constant 0 : i32
    %c0_i32_0 = arith.constant 0 : i32
    %c0_i32_1 = arith.constant 0 : i32
    %c0_i32_2 = arith.constant 0 : i32
    return %arg0, %c0_i32, %c0_i32_0, %c0_i32_1 : i32, i32, i32, i32
  }
}

</mosaic_0001>

<bundles_post_ra>
// kernel: tpu_custom_call.1
= control target key start
LH: loop header
LB: loop body
LE: loop exit
PB: predicated region body
PF: predicated region fallthrough
CT: control target
= control target key end

     0   :  { %s9593_s0 = inlined_call_operand.hbm [shape: f32[2,16,16,64], index: 0, kind: input, shape index: {}]   ;;  %s9594_s1 = inlined_call_operand.hbm [shape: bf16[64,32], index: 1, kind: input, shape index: {}]   ;;  %s9595_s2 = inlined_call_operand.hbm [shape: f32[1,32], index: 2, kind: input, shape index: {}]   ;;  %s9596_s3 = inlined_call_operand.hbm [shape: bf16[288,32], index: 3, kind: input, shape index: {}]   ;;  %s9597_s4 = inlined_call_operand.hbm [shape: f32[1,32], index: 4, kind: input, shape index: {}]   ;;  %s9598_s5 = inlined_call_operand.hbm [shape: bf16[32,128], index: 5, kind: input, shape index: {}]   ;;  %s9599_s6 = inlined_call_operand.hbm [shape: f32[1,128], index: 6, kind: input, shape index: {}]   ;;  %s9600_s7 = inlined_call_operand.hbm [shape: bf16[64,128], index: 7, kind: input, shape index: {}]   ;;  %s9601_s8 = inlined_call_operand.hbm [shape: f32[1,128], index: 8, kind: input, shape index: {}]   ;;  %s9602_s9 = inlined_call_operand.hbm [shape: f32[2,8,8,128], index: 9, kind: output, shape index: {}]  }
   0x1   :  { %9642 = sst [smem:[#allocation113_spill]] %s9594_s1 }
   0x2   :  { %9643 = sst [smem:[#allocation114_spill]] %s9602_s9 }
   0x3   :  { %14 = vsyncpa [#allocation5], 0 }
   0x4   :  { %16 = vsyncpa [#allocation5 + $0x1], 0 }
   0x5   :  { %17 = vsyncpa [#allocation8], 0 }
   0x6   :  { %18 = vsyncpa [#allocation11], 0 }
   0x7   :  { %19 = vsyncpa [#allocation14], 0 }
   0x8   :  { %20 = vsyncpa [#allocation17], 0 }
   0x9   :  { %21 = vsyncpa [#allocation6], 0 }
   0xa   :  { %23 = vsyncpa [#allocation6 + $0x1], 0  ;;  %s7425_s30 = smov 0   ;;  %s7427_s10 = smov 0  }
   0xb   :  { %s7429_s11 = smov 0   ;;  %s7431_s12 = smov 0  }
   0xc LB: > { %s7354_s13 = smov [#allocation7]   ;;  %s7446_s15 = sadd.s32 4294967295, %s7352_s12   ;;  %s7352_s12 = sphi %s7431_s12, %s9906_s12   ;;  %s7348_s11 = sphi %s7429_s11, %s9905_s11   ;;  %s7344_s10 = sphi %s7427_s10, %s9904_s10   ;;  %s7340_s30 = sphi %s7425_s30, %s9903_s30  }
   0xd   : > { %s266_s14 = sshll.u32 %s7354_s13, 4  ;;  %p6148_p0 = scmp.ge.s32.totalorder %s7352_s12, 1  ;;  %s7451_s14 = int_to_ptr.vmem [resolvable:$true] %s266_s14 }
   0xe   : > { %p9604_p1 = scmp.eq.s32.totalorder %s7446_s15, 0  ;;  %p254_p2 = scmp.lt.s32.totalorder %s7352_s12, 3 }
   0xf   : > { %s7355_s17 = smov [#allocation10]   ;;  %s7356_s20 = smov [#allocation13]  }
  0x10   : > { %p7453_p3 = pnand %p6148_p0, %p254_p2  ;;  %s290_s18 = sshll.u32 %s7355_s17, 4  ;;  %s7466_s18 = int_to_ptr.vmem [resolvable:$true] %s290_s18 }
  0x11   : > { %s314_s21 = sshll.u32 %s7356_s20, 4  ;;  %s9646_s1 = sld [smem:[#allocation113_spill]]  ;;  %s7468_s21 = int_to_ptr.vmem [resolvable:$true] %s314_s21 }
  0x12   : > { %s9644_s16 = scalar_select %p7453_p3, 1, 0 }
  0x13   : > { %p6839_p5 = pneg %p7453_p3 }
  0x15   : > { %p7462_p6 = pnand %p6839_p5, %p9604_p1 }
  0x17   : > { %s7016_s24 = scalar_lea.hbm %s9646_s1, 512  ;;  %p7478_p8 = pneg %p7462_p6 }
  0x18   : > { %p7017_p7 = scmp.ne.s32.totalorder %s9646_s1, %s7016_s24  ;;  %p7023_p11 = scmp.lt.u32.totalorder %s7016_s24, %s9646_s1 }
  0x1a   : > { %p7019_p9 = pnand %p7478_p8, %p7017_p7 }
  0x1c   : > { %p7020_p10 = pneg %p7019_p9 }
  0x1e   : > { %p7025_p12 = pnand %p7023_p11, %p7020_p10 }
  0x20   : > { %7028 = shalt.err (!%p7025_p12)
}
  0x21   : > { %s7029_s13 = scalar_lea.vmem %s7451_s14, 512  ;;  %p7037_p5 = scmp.lt.s32.totalorder %s7451_s14, %s7451_s14 }
  0x22   : > { %p7030_p13 = scmp.ne.s32.totalorder %s7451_s14, %s7029_s13  ;;  %p7038_p4 = scmp.lt.s32.totalorder %s7029_s13, %s7029_s13 }
  0x24   : > { %p7032_p0 = pnand %p7030_p13, %p7478_p8  ;;  %p7039_p7 = por %p7038_p4, %p7037_p5 }
  0x26   : > { %p7033_p2 = pneg %p7032_p0 }
  0x28   : > { %p7040_p9 = pnand %p7039_p7, %p7033_p2 }
  0x2a   : > { %7043 = shalt.err (!%p7040_p9)
}
  0x2b   : > { %s7357_s17 = smov 64   ;;  %s7358_s20 = smov 4  }
  0x2c   : > { %6842 = dma.hbm_to_vmem [thread:$0]  (!%p7462_p6), %s9646_s1, 512, %s7451_s14, [#allocation8], %s7357_s17, %s7357_s17, %s7358_s20  }
  0x2d   : > { %s7044_s26 = scalar_lea.hbm %s9596_s3, 2304 }
  0x2e   : > { %p7045_p4 = scmp.ne.s32.totalorder %s9596_s3, %s7044_s26  ;;  %p7051_p12 = scmp.lt.u32.totalorder %s7044_s26, %s9596_s3 }
  0x30   : > { %p7047_p10 = pnand %p7045_p4, %p7478_p8 }
  0x32   : > { %p7048_p11 = pneg %p7047_p10 }
  0x34   : > { %p7053_p13 = pnand %p7051_p12, %p7048_p11 }
  0x36   : > { %7056 = shalt.err (!%p7053_p13)
}
  0x37   : > { %s7057_s14 = scalar_lea.vmem %s7466_s18, 2304  ;;  %p7065_p7 = scmp.lt.s32.totalorder %s7466_s18, %s7466_s18 }
  0x38   : > { %p7058_p0 = scmp.ne.s32.totalorder %s7466_s18, %s7057_s14  ;;  %p7066_p9 = scmp.lt.s32.totalorder %s7057_s14, %s7057_s14 }
  0x3a   : > { %p7060_p2 = pnand %p7058_p0, %p7478_p8  ;;  %p7067_p4 = por %p7066_p9, %p7065_p7 }
  0x3c   : > { %p7061_p5 = pneg %p7060_p2 }
  0x3e   : > { %p7068_p10 = pnand %p7067_p4, %p7061_p5 }
  0x40   : > { %7071 = shalt.err (!%p7068_p10)
}
  0x41   : > { %6848 = dma.hbm_to_vmem [thread:$0]  (!%p7462_p6), %s9596_s3, 2304, %s7466_s18, [#allocation11], %s7357_s17, %s7357_s17, %s7358_s20  }
  0x42   : > { %s7072_s25 = scalar_lea.hbm %s9598_s5, 256 }
  0x43   : > { %p7073_p11 = scmp.ne.s32.totalorder %s9598_s5, %s7072_s25  ;;  %p7079_p0 = scmp.lt.u32.totalorder %s7072_s25, %s9598_s5 }
  0x45   : > { %p7075_p12 = pnand %p7073_p11, %p7478_p8 }
  0x47   : > { %p7076_p13 = pneg %p7075_p12 }
  0x49   : > { %p7081_p2 = pnand %p7079_p0, %p7076_p13 }
  0x4b   : > { %7084 = shalt.err (!%p7081_p2)
}
  0x4c   : > { %s7085_s18 = scalar_lea.vmem %s7468_s21, 256  ;;  %p7093_p4 = scmp.lt.s32.totalorder %s7468_s21, %s7468_s21 }
  0x4d   : > { %p7086_p5 = scmp.ne.s32.totalorder %s7468_s21, %s7085_s18  ;;  %p7094_p10 = scmp.lt.s32.totalorder %s7085_s18, %s7085_s18 }
  0x4f   : > { %p7088_p7 = pnand %p7086_p5, %p7478_p8  ;;  %p7095_p11 = por %p7094_p10, %p7093_p4 }
  0x51   : > { %p7089_p9 = pneg %p7088_p7 }
  0x53   : > { %p7096_p12 = pnand %p7095_p11, %p7089_p9 }
  0x55   : > { %7099 = shalt.err (!%p7096_p12)
}
  0x56   : > { %6854 = dma.hbm_to_vmem [thread:$0]  (!%p7462_p6), %s9598_s5, 256, %s7468_s21, [#allocation14], %s7357_s17, %s7357_s17, %s7358_s20  }
  0x57   : > { %s7359_s22 = smov [#allocation16]   ;;  %s7360_s24 = smov [#allocation9]  }
  0x58   : > { %s338_s23 = sshll.u32 %s7359_s22, 4  ;;  %s280_s25 = sshll.u32 %s7360_s24, 4  ;;  %s339_s23 = int_to_ptr.vmem [resolvable:$true] %s338_s23  ;;  %s281_s25 = int_to_ptr.vmem [resolvable:$true] %s280_s25 }
  0x59   : > { %s7100_s29 = scalar_lea.hbm %s9600_s7, 512 }
  0x5a   : > { %p7101_p13 = scmp.ne.s32.totalorder %s9600_s7, %s7100_s29  ;;  %p7107_p5 = scmp.lt.u32.totalorder %s7100_s29, %s9600_s7 }
  0x5c   : > { %p7103_p0 = pnand %p7101_p13, %p7478_p8 }
  0x5e   : > { %p7104_p2 = pneg %p7103_p0 }
  0x60   : > { %p7109_p7 = pnand %p7107_p5, %p7104_p2 }
  0x62   : > { %7112 = shalt.err (!%p7109_p7)
}
  0x63   : > { %s7113_s21 = scalar_lea.vmem %s339_s23, 512  ;;  %p7121_p11 = scmp.lt.s32.totalorder %s339_s23, %s339_s23 }
  0x64   : > { %p7114_p9 = scmp.ne.s32.totalorder %s339_s23, %s7113_s21  ;;  %p7122_p12 = scmp.lt.s32.totalorder %s7113_s21, %s7113_s21 }
  0x66   : > { %p7116_p4 = pnand %p7114_p9, %p7478_p8  ;;  %p7123_p1 = por %p7122_p12, %p7121_p11 }
  0x68   : > { %p7117_p10 = pneg %p7116_p4 }
  0x6a   : > { %p7124_p3 = pnand %p7123_p1, %p7117_p10 }
  0x6c   : > { %7127 = shalt.err (!%p7124_p3)
}
  0x6d   : > { %6860 = dma.hbm_to_vmem [thread:$0]  (!%p7462_p6), %s9600_s7, 512, %s339_s23, [#allocation17], %s7357_s17, %s7357_s17, %s7358_s20  }
  0x6e   : > { %s7128_s26 = scalar_lea.hbm %s9595_s2, 16 }
  0x6f   : > { %p7129_p1 = scmp.ne.s32.totalorder %s9595_s2, %s7128_s26  ;;  %p7135_p0 = scmp.lt.u32.totalorder %s7128_s26, %s9595_s2 }
  0x71   : > { %p7131_p3 = pnand %p7129_p1, %p7478_p8 }
  0x73   : > { %p7132_p13 = pneg %p7131_p3 }
  0x75   : > { %p7137_p2 = pnand %p7135_p0, %p7132_p13 }
  0x77   : > { %7140 = shalt.err (!%p7137_p2)
}
  0x78   : > { %s7141_s14 = scalar_lea.vmem %s281_s25, 16  ;;  %s7148_s17 = scalar_lea.vmem %s281_s25, 32 }
  0x79   : > { %p7142_p5 = scmp.ne.s32.totalorder %s281_s25, %s7141_s14  ;;  %p7149_p4 = scmp.lt.s32.totalorder %s281_s25, %s281_s25 }
  0x7a   : > { %p7150_p10 = scmp.lt.s32.totalorder %s7148_s17, %s7141_s14 }
  0x7b   : > { %p7144_p7 = pnand %p7142_p5, %p7478_p8 }
  0x7c   : > { %p7151_p11 = por %p7150_p10, %p7149_p4 }
  0x7d   : > { %p7145_p9 = pneg %p7144_p7 }
  0x7f   : > { %p7152_p12 = pnand %p7151_p11, %p7145_p9 }
  0x81   : > { %7155 = shalt.err (!%p7152_p12)
}
  0x82   : > { %6845 = dma.hbm_to_vmem [thread:$0]  (!%p7462_p6), %s9595_s2, 16, %s281_s25, [#allocation8]  }
  0x83   : > { %s7361_s21 = smov [#allocation12]   ;;  %s7362_s9 = smov [#allocation15]  }
  0x84   : > { %s304_s1 = sshll.u32 %s7361_s21, 4  ;;  %s328_s22 = sshll.u32 %s7362_s9, 4  ;;  %s305_s1 = int_to_ptr.vmem [resolvable:$true] %s304_s1  ;;  %s329_s22 = int_to_ptr.vmem [resolvable:$true] %s328_s22 }
  0x85   : > { %s7156_s28 = scalar_lea.hbm %s9597_s4, 16 }
  0x86   : > { %p7157_p1 = scmp.ne.s32.totalorder %s9597_s4, %s7156_s28  ;;  %p7163_p0 = scmp.lt.u32.totalorder %s7156_s28, %s9597_s4 }
  0x88   : > { %p7159_p3 = pnand %p7157_p1, %p7478_p8 }
  0x8a   : > { %p7160_p13 = pneg %p7159_p3 }
  0x8c   : > { %p7165_p2 = pnand %p7163_p0, %p7160_p13 }
  0x8e   : > { %7168 = shalt.err (!%p7165_p2)
}
  0x8f   : > { %s7169_s25 = scalar_lea.vmem %s305_s1, 16  ;;  %s7176_s17 = scalar_lea.vmem %s305_s1, 32 }
  0x90   : > { %p7170_p5 = scmp.ne.s32.totalorder %s305_s1, %s7169_s25  ;;  %p7177_p4 = scmp.lt.s32.totalorder %s305_s1, %s305_s1 }
  0x91   : > { %p7178_p10 = scmp.lt.s32.totalorder %s7176_s17, %s7169_s25 }
  0x92   : > { %p7172_p7 = pnand %p7170_p5, %p7478_p8 }
  0x93   : > { %p7179_p11 = por %p7178_p10, %p7177_p4 }
  0x94   : > { %p7173_p9 = pneg %p7172_p7 }
  0x96   : > { %p7180_p12 = pnand %p7179_p11, %p7173_p9 }
  0x98   : > { %7183 = shalt.err (!%p7180_p12)
}
  0x99   : > { %6851 = dma.hbm_to_vmem [thread:$0]  (!%p7462_p6), %s9597_s4, 16, %s305_s1, [#allocation11]  }
  0x9a   : > { %s7184_s24 = scalar_lea.hbm %s9599_s6, 16 }
  0x9b   : > { %p7185_p1 = scmp.ne.s32.totalorder %s9599_s6, %s7184_s24  ;;  %p7191_p0 = scmp.lt.u32.totalorder %s7184_s24, %s9599_s6 }
  0x9d   : > { %p7187_p3 = pnand %p7185_p1, %p7478_p8 }
  0x9f   : > { %p7188_p13 = pneg %p7187_p3 }
  0xa1   : > { %p7193_p2 = pnand %p7191_p0, %p7188_p13 }
  0xa3   : > { %7196 = shalt.err (!%p7193_p2)
}
  0xa4   : > { %s7197_s18 = scalar_lea.vmem %s329_s22, 16  ;;  %s7204_s1 = scalar_lea.vmem %s329_s22, 32 }
  0xa5   : > { %p7198_p5 = scmp.ne.s32.totalorder %s329_s22, %s7197_s18  ;;  %p7205_p4 = scmp.lt.s32.totalorder %s329_s22, %s329_s22 }
  0xa6   : > { %p7206_p10 = scmp.lt.s32.totalorder %s7204_s1, %s7197_s18 }
  0xa7   : > { %p7200_p7 = pnand %p7198_p5, %p7478_p8 }
  0xa8   : > { %p7207_p11 = por %p7206_p10, %p7205_p4 }
  0xa9   : > { %p7201_p9 = pneg %p7200_p7 }
  0xab   : > { %p7208_p12 = pnand %p7207_p11, %p7201_p9 }
  0xad   : > { %7211 = shalt.err (!%p7208_p12)
}
  0xae   : > { %6857 = dma.hbm_to_vmem [thread:$0]  (!%p7462_p6), %s9599_s6, 16, %s329_s22, [#allocation14]  }
  0xaf   : > { %s7363_s17 = smov [#allocation18]   ;;  %s7212_s9 = scalar_lea.hbm %s9601_s8, 16 }
  0xb0   : > { %s352_s20 = sshll.u32 %s7363_s17, 4  ;;  %p7213_p1 = scmp.ne.s32.totalorder %s9601_s8, %s7212_s9  ;;  %s353_s20 = int_to_ptr.vmem [resolvable:$true] %s352_s20 }
  0xb1   : > { %p7219_p0 = scmp.lt.u32.totalorder %s7212_s9, %s9601_s8 }
  0xb2   : > { %p7215_p3 = pnand %p7213_p1, %p7478_p8 }
  0xb4   : > { %p7216_p13 = pneg %p7215_p3 }
  0xb6   : > { %p7221_p2 = pnand %p7219_p0, %p7216_p13 }
  0xb8   : > { %7224 = shalt.err (!%p7221_p2)
}
  0xb9   : > { %s7225_s22 = scalar_lea.vmem %s353_s20, 16  ;;  %s7232_s13 = scalar_lea.vmem %s353_s20, 32 }
  0xba   : > { %p7226_p5 = scmp.ne.s32.totalorder %s353_s20, %s7225_s22  ;;  %p7233_p4 = scmp.lt.s32.totalorder %s353_s20, %s353_s20 }
  0xbb   : > { %p7234_p10 = scmp.lt.s32.totalorder %s7232_s13, %s7225_s22 }
  0xbc   : > { %p7228_p7 = pnand %p7226_p5, %p7478_p8 }
  0xbd   : > { %p7235_p11 = por %p7234_p10, %p7233_p4 }
  0xbe   : > { %p7229_p9 = pneg %p7228_p7 }
  0xc0   : > { %p7236_p12 = pnand %p7235_p11, %p7229_p9 }
  0xc2   : > { %7239 = shalt.err (!%p7236_p12)
}
  0xc3   : > { %6863 = dma.hbm_to_vmem [thread:$0]  (!%p7462_p6), %s9601_s8, 16, %s353_s20, [#allocation17]  }
  0xc4   : > { %s6147_s27 = sadd.s32 4294967294, %s7352_s12   ;;  %s7649_s19 = sadd.s32 1, %s7352_s12  }
  0xc5   : > { %s33_s14 = ssub.s32 %s7352_s12, %s7649_s19  ;;  %s36_s25 = sadd.s32 1, %s7348_s11 }
  0xc6   : > { %p34_p8 = scmp.eq.s32.totalorder %s33_s14, 0  ;;  %p43_p1 = scmp.ne.s32.totalorder %s7348_s11, %s7344_s10 }
  0xc7   : > { %p44_p3 = scmp.eq.s32.totalorder %s7352_s12, 0  ;;  %p49_p13 = scmp.ne.s32.totalorder %s7344_s10, %s7340_s30 }
  0xc8   : > { %s7660_s17 = scalar_select %p34_p8, %s7348_s11, %s36_s25  }
  0xc9   : > { %p7662_p0 = por %p44_p3, %p43_p1  ;;  %p9649_p2 = scmp.eq.s32.totalorder %s7446_s15, 0 }
  0xca   : > { %p241_p5 = scmp.eq.s32.totalorder %s7446_s15, 1  ;;  %p247_p7 = scmp.eq.s32.totalorder %s6147_s27, 1 }
  0xcb   : > { %p7668_p6 = por %p9649_p2, %p49_p13  ;;  %p6880_p9 = scmp.lt.s32.totalorder %s7352_s12, 2 }
  0xcc   : > { %s363_s21 = sand.u32 1, %s7348_s11   ;;  %p7675_p4 = por %p241_p5, %p43_p1 }
  0xcd   : > { %p7679_p10 = por %p247_p7, %p49_p13  ;;  %s6158_s26 = sshll.u32 %s363_s21, 8 }
  0xce   : > { %s9651_s9 = scalar_select %p7675_p4, 1, 0 }
  0xcf   : > { %s9652_s24 = scalar_select %p7679_p10, 1, 0 }
  0xd0   : > { %s6505_s28 = sshll.u32 %s7352_s12, 12  ;;  %s367_s18 = scalar_lea.vmem [#allocation4], %s6158_s26 }
  0xd1   : > { %s7687_s13 = scalar_lea.hbm %s9593_s0, %s6505_s28  ;;  %s374_s1 = sshll.u32 %s367_s18, 4  ;;  %s7689_s1 = int_to_ptr.vmem [resolvable:$true] %s374_s1 }
  0xd2   : > { %p7693_p11 = pnand %p6880_p9, %p7662_p0  ;;  %s7697_s14 = scalar_lea.sflag [#allocation5], %s363_s21 }
  0xd3   : > { %s7240_s25 = scalar_lea.hbm %s7687_s13, 4096  ;;  %s7245_s23 = scalar_lea.hbm %s9593_s0, 8192 }
  0xd4   : > { %p7241_p12 = scmp.ne.s32.totalorder %s7687_s13, %s7240_s25  ;;  %p7242_p8 = pneg %p7693_p11 }
  0xd5   : > { %p7246_p13 = scmp.lt.u32.totalorder %s7687_s13, %s9593_s0  ;;  %p7247_p0 = scmp.lt.u32.totalorder %s7245_s23, %s7240_s25 }
  0xd6   : > { %p7243_p1 = pnand %p7242_p8, %p7241_p12  ;;  %p7249_p5 = scmp.lt.u32.totalorder %s7240_s25, %s7687_s13 }
  0xd7   : > { %p7248_p2 = por %p7247_p0, %p7246_p13 }
  0xd8   : > { %p7244_p3 = pneg %p7243_p1 }
  0xd9   : > { %p7250_p7 = por %p7249_p5, %p7248_p2 }
  0xdb   : > { %p7251_p9 = pnand %p7250_p7, %p7244_p3 }
  0xdd   : > { %7254 = shalt.err (!%p7251_p9)
}
  0xde   : > { %s7255_s21 = scalar_lea.vmem %s7689_s1, 4096  ;;  %s7364_s18 = smov [#allocation4]  }
  0xdf   : > { %p7256_p12 = scmp.ne.s32.totalorder %s7689_s1, %s7255_s21  ;;  %s7260_s26 = sshll.u32 %s7364_s18, 4  ;;  %s7261_s26 = int_to_ptr.vmem [resolvable:$false] %s7260_s26 }
  0xe0   : > { %s7262_s28 = scalar_lea.vmem %s7261_s26, 8192  ;;  %p7263_p4 = scmp.lt.s32.totalorder %s7689_s1, %s7261_s26 }
  0xe1   : > { %p7258_p1 = pnand %p7256_p12, %p7242_p8  ;;  %p7264_p13 = scmp.lt.s32.totalorder %s7262_s28, %s7255_s21 }
  0xe3   : > { %p7259_p10 = pneg %p7258_p1  ;;  %p7265_p0 = por %p7264_p13, %p7263_p4 }
  0xe5   : > { %p7266_p2 = pnand %p7265_p0, %p7259_p10 }
  0xe7   : > { %7269 = shalt.err (!%p7266_p2)
}
  0xe8   : > { %s7365_s25 = smov 128   ;;  %s7366_s23 = smov 8  }
  0xe9   : > { %6867 = dma.hbm_to_vmem [thread:$0]  (!%p7693_p11), %s7687_s13, 4096, %s7689_s1, %s7697_s14, %s7365_s25, %s7365_s25, %s7366_s23  }
  0xea   : > { %p9654_p8 = scmp.ne.s32.totalorder %s9644_s16, 0 }
  0xec   : > { %386 = sbr.rel (%p9654_p8) target bundleno = 1394 (0x572), region = 56 }
  0xf3   : > { %s7728_s29 = sand.u32 1, %s7344_s10  }
  0xf4   : > { %s6162_s22 = sshll.u32 %s7728_s29, 8  ;;  %s389_s21 = scalar_lea.sflag [#allocation5], %s7728_s29 }
  0xf5   : > { %s7732_s18 = scalar_lea.vmem [#allocation4], %s6162_s22 }
  0xf6   : > { %7315 = dma.done.wait (%p7668_p6), %s389_s21, 4096  }
  0xf7   : > { %7317 = vsyncadd (%p7668_p6), %s389_s21, 4294963200  ;;  %p9655_p4 = scmp.eq.s32.totalorder %s7446_s15, 0 }
  0xf9   : > { %7319 = dma.done.wait (%p9655_p4), [#allocation8], 528   ;;  %p9656_p10 = pmov %p9655_p4 }
  0xfa   : > { %p9657_p11 = pmov %p9655_p4 }
  0xfb   : > { %7321 = vsyncadd (%p9656_p10), [#allocation8], 4294966768 }
  0xfc   : > { %7323 = dma.done.wait (%p9657_p11), [#allocation11], 2320   ;;  %p9658_p3 = pmov %p9655_p4 }
  0xfe   : > { %7325 = vsyncadd (%p9658_p3), [#allocation11], 4294964976  ;;  %p9659_p5 = pmov %p9658_p3 }
  0xff   : > { %p9660_p7 = pmov %p9658_p3 }
 0x100   : > { %7327 = dma.done.wait (%p9659_p5), [#allocation14], 272  }
 0x101   : > { %7329 = vsyncadd (%p9660_p7), [#allocation14], 4294967024  ;;  %p9661_p6 = pmov %p9658_p3 }
 0x102   : > { %p9662_p9 = pmov %p9658_p3 }
 0x103   : > { %7331 = dma.done.wait (%p9661_p6), [#allocation17], 528  }
 0x104   : > { %7333 = vsyncadd (%p9662_p9), [#allocation17], 4294966768  ;;  %v7367_v0 = vmov 1983009808   ;;  %v2469_v2 = vlaneseq  ;;  %v6941_v5 = vld [vmem:[#allocation7] sm:$0xff]   ;;  %v6942_v6 = vld [vmem:[#allocation7 + $0x8] sm:$0xff]  }
 0x105   : > { %v2467_v1 = vunpack.c.l.s4 %v7367_v0  ;;  %6671 = vmatprep.subr.bf16.mxu0 %v6941_v5  ;;  %v6943_v8 = vld [vmem:[#allocation7 + $0x10] sm:$0xff]   ;;  %v460_v9 = vld [vmem:[%s7732_s18] sm:$0xff]  ;;  %v461_v10 = vld [vmem:[%s7732_s18 + $0x8] sm:$0xff]  ;;  %vm547_vm0 = vcmask 523264   ;;  %vm3981_vm1 = vcmask 1041409   ;;  %vm3984_vm2 = vcmask 1042434  }
 0x106   : > { %v2470_v4 = vshrl.u32 %v2469_v2, 7  ;;  %6672 = vmatpush3.bf16.msra.mxu0 %v6941_v5  ;;  %v492_v11 = vpack.c.bf16 %v461_v10, %v460_v9  ;;  %v4224_v12 = vcombine.high %v460_v9, %v460_v9  ;;  %v462_v14 = vld [vmem:[%s7732_s18 + $0x10] sm:$0xff]  ;;  %v6944_v20 = vld [vmem:[#allocation7 + $0x18] sm:$0xff]   ;;  %v464_v33 = vld [vmem:[%s7732_s18 + $0x20] sm:$0xff]  ;;  %vm3987_vm3 = vcmask 1043459   ;;  %s7369_s16 = smov 32  }
 0x107   : > { %v2468_v3 = vunpack.c.0.s8 %v2467_v1  ;;  %6673 = vmatprep.subr.bf16.mxu0 %v6942_v6  ;;  %v4258_v16 = vcombine.high %v462_v14, %v462_v14  ;;  %v463_v26 = vld [vmem:[%s7732_s18 + $0x18] sm:$0xff]  ;;  %v465_v34 = vld [vmem:[%s7732_s18 + $0x28] sm:$0xff]  ;;  %v4292_v54 = vcombine.high %v464_v33, %v464_v33  ;;  %v466_v62 = vld [vmem:[%s7732_s18 + $0x30] sm:$0xff]  ;;  %vm3990_vm4 = vcmask 1044484   ;;  %s7370_s20 = smov 64   ;;  %s7371_s13 = smov 96  }
 0x108   : > { %6679 = vmatprep.mubr.msk.bf16.mxu0 %vm547_vm0, %v492_v11  ;;  %v493_v31 = vpack.c.bf16 %v463_v26, %v462_v14  ;;  %v494_v46 = vpack.c.bf16 %v465_v34, %v464_v33  ;;  %v467_v63 = vld [vmem:[%s7732_s18 + $0x38] sm:$0xff]  ;;  %v468_v0 = vld [vmem:[%s7732_s18 + $0x40] sm:$0xff]  ;;  %vm789_vm5 = vcmask 261120   ;;  %vm798_vm6 = vcmask 253952   ;;  %s6171_s1 = sshll.u32 %s7728_s29, 6  ;;  %s6506_s26 = sshll.u32 %s7446_s15, 10 }
 0x109   : > { %v7754_v7 = vsub.s32 %v2468_v3, %v2470_v4  ;;  %v469_v4 = vld [vmem:[%s7732_s18 + $0x48] sm:$0xff]  ;;  %vm792_vm7 = vcmask 254976   ;;  %vm1044_vm8 = vcmask 523520   ;;  %vm1173_vm9 = vcmask 785920   ;;  %s458_s27 = scalar_lea.vmem [#allocation19], %s6171_s1  ;;  %s9899_s23 = sld [smem:[#allocation114_spill]] }
 0x10a   : > { %6674 = vmatpush3.bf16.msra.mxu0 %v6942_v6  ;;  %vm1302_vm10 = vcmask 1048320   ;;  %vm3993_vm11 = vcmask 1045509   ;;  %vm3996_vm12 = vcmask 1046534   ;;  %vm3999_vm13 = vcmask 1047559   ;;  %s5998_s14 = sshll.u32 %s458_s27, 4  ;;  %s5985_s15 = scalar_lea.sflag [#allocation6], %s7728_s29  ;;  %s9544_s14 = int_to_ptr.vmem [resolvable:$true] %s5998_s14 }
 0x10b   : > { %v4231_v13 = vrot.slane %v460_v9, %v7754_v7  ;;  %v7761_v15 = vrot.slane %v461_v10, %v7754_v7  ;;  %v4265_v17 = vrot.slane %v462_v14, %v7754_v7  ;;  %v4238_v18 = vrot.slane %v4224_v12, %v7754_v7  ;;  %6675 = vmatprep.subr.bf16.mxu0 %v6943_v8  ;;  %s7270_s21 = scalar_lea.vmem %s9544_s14, 1024  ;;  %p9900_p1 = scmp.ne.s32.totalorder %s9651_s9, 0 }
 0x10c   : > { %v4272_v22 = vrot.slane %v4258_v16, %v7754_v7  ;;  %v7773_v37 = vrot.slane %v463_v26, %v7754_v7  ;;  %v4299_v57 = vrot.slane %v464_v33, %v7754_v7  ;;  %v4306_v58 = vrot.slane %v4292_v54, %v7754_v7  ;;  %p7271_p12 = scmp.ne.s32.totalorder %s9544_s14, %s7270_s21 }
 0x10d   : > { %v4239_v19 = vcombine.high %v4231_v13, %v4231_v13  ;;  %v6363_v21 = vrot.slane %v4231_v13, 9  ;;  %v4240_v23 = vcombine.high %v4238_v18, %v4238_v18  ;;  %v6367_v25 = vrot.slane %v7761_v15, 9 }
 0x10e   : > { %v6365_v27 = vrot.slane %v4238_v18, 9  ;;  %v4273_v28 = vcombine.high %v4265_v17, %v4265_v17  ;;  %6676 = vmatpush3.bf16.msra.mxu0 %v6943_v8  ;;  %v4274_v32 = vcombine.high %v4272_v22, %v4272_v22  ;;  %v6371_v38 = vrot.slane %v4265_v17, 9  ;;  %p7272_p13 = pnand %p7271_p12, %p9900_p1 }
 0x10f   : > { %v6364_v24 = vrot.slane %v4239_v19, 9  ;;  %v6366_v29 = vrot.slane %v4240_v23, 9  ;;  %6677 = vmatprep.subr.bf16.mxu0 %v6944_v20  ;;  %v5280_v30 = vadd.f32 %v6363_v21, %v4231_v13  ;;  %v5284_v36 = vadd.f32 %v6367_v25, %v7761_v15  ;;  %s9549_s22 = scalar_lea.hbm %s9899_s23, %s6506_s26 }
 0x110   : > { %v5282_v39 = vadd.f32 %v6365_v27, %v4238_v18  ;;  %v6372_v40 = vrot.slane %v4273_v28, 9  ;;  %v6373_v41 = vrot.slane %v4272_v22, 9  ;;  %v6374_v42 = vrot.slane %v4274_v32, 9  ;;  %p7273_p0 = pneg %p7272_p13 }
 0x111   : > { %v5281_v35 = vadd.f32 %v6364_v24, %v4239_v19  ;;  %v5283_v43 = vadd.f32 %v6366_v29, %v4240_v23  ;;  %v6375_v44 = vrot.slane %v7773_v37, 9  ;;  %v5288_v45 = vadd.f32 %v6371_v38, %v4265_v17 }
 0x112   : > { %6678 = vmatpush3.bf16.msra.mxu0 %v6944_v20  ;;  %v5289_v47 = vadd.f32 %v6372_v40, %v4273_v28  ;;  %v5290_v48 = vadd.f32 %v6373_v41, %v4272_v22  ;;  %v5291_v49 = vadd.f32 %v6374_v42, %v4274_v32  ;;  %v4307_v59 = vcombine.high %v4299_v57, %v4299_v57 }
 0x113   : > { %v5292_v50 = vadd.f32 %v6375_v44, %v7773_v37  ;;  %v7777_v51 = vadd.f32 %v5288_v45, %v5280_v30  ;;  %v4308_v60 = vcombine.high %v4306_v58, %v4306_v58  ;;  %v7792_v61 = vrot.slane %v465_v34, %v7754_v7 }
 0x114   : > { %v7780_v52 = vadd.f32 %v5289_v47, %v5281_v35  ;;  %v7782_v53 = vadd.f32 %v5290_v48, %v5282_v39  ;;  %v7784_v55 = vadd.f32 %v5291_v49, %v5283_v43  ;;  %v6379_v1 = vrot.slane %v4299_v57, 9 }
 0x115   : > { %6680 = vmatmul.mubr.msk.bf16.vlgmr.msra.gmra.mrb[0].mxu0 %vm547_vm0, %v493_v31  ;;  %v7786_v56 = vadd.f32 %v5292_v50, %v5284_v36  ;;  %v6380_v2 = vrot.slane %v4307_v59, 9  ;;  %v6381_v3 = vrot.slane %v4306_v58, 9  ;;  %v6382_v5 = vrot.slane %v4308_v60, 9 }
 0x116   : > { %6683 = vmatprep.mubr.msk.bf16.mxu0 %vm547_vm0, %v494_v46  ;;  %v6383_v6 = vrot.slane %v7792_v61, 9  ;;  %v495_v8 = vpack.c.bf16 %v467_v63, %v466_v62  ;;  %v4326_v9 = vcombine.high %v466_v62, %v466_v62  ;;  %v4333_v10 = vrot.slane %v466_v62, %v7754_v7  ;;  %v470_v62 = vld [vmem:[%s7732_s18 + $0x50] sm:$0xff] }
 0x117   : > { %v7802_v11 = vrot.slane %v467_v63, %v7754_v7  ;;  %v496_v12 = vpack.c.bf16 %v469_v4, %v468_v0  ;;  %v4360_v13 = vcombine.high %v468_v0, %v468_v0  ;;  %v5296_v14 = vadd.f32 %v6379_v1, %v4299_v57  ;;  %v471_v63 = vld [vmem:[%s7732_s18 + $0x58] sm:$0xff] }
 0x118   : > { %v4340_v16 = vrot.slane %v4326_v9, %v7754_v7  ;;  %v4341_v17 = vcombine.high %v4333_v10, %v4333_v10  ;;  %v6387_v18 = vrot.slane %v4333_v10, 9  ;;  %v5297_v19 = vadd.f32 %v6380_v2, %v4307_v59  ;;  %v472_v2 = vld [vmem:[%s7732_s18 + $0x60] sm:$0xff] }
 0x119   : > { %v5298_v20 = vadd.f32 %v6381_v3, %v4306_v58  ;;  %v5300_v21 = vadd.f32 %v6383_v6, %v7792_v61  ;;  %v6391_v22 = vrot.slane %v7802_v11, 9  ;;  %v5299_v27 = vadd.f32 %v6382_v5, %v4308_v60  ;;  %v7827_v3 = vld [vmem:[%s7732_s18 + $0x68] sm:$0xff] }
 0x11a   : > { %v4342_v23 = vcombine.high %v4340_v16, %v4340_v16  ;;  %v6388_v24 = vrot.slane %v4341_v17, 9  ;;  %v6389_v25 = vrot.slane %v4340_v16, 9  ;;  %v5304_v26 = vadd.f32 %v6387_v18, %v4333_v10 }
 0x11b   : > { %v5308_v28 = vadd.f32 %v6391_v22, %v7802_v11  ;;  %v4367_v29 = vrot.slane %v468_v0, %v7754_v7  ;;  %v4374_v30 = vrot.slane %v4360_v13, %v7754_v7  ;;  %v4377_v41 = vcombine.high %v469_v4, %v469_v4 }
 0x11c   : > { %v6390_v31 = vrot.slane %v4342_v23, 9  ;;  %v5305_v32 = vadd.f32 %v6388_v24, %v4341_v17  ;;  %v5306_v33 = vadd.f32 %v6389_v25, %v4340_v16  ;;  %v7811_v34 = vadd.f32 %v5304_v26, %v5296_v14 }
 0x11d   : > { %6684 = vmatmul.mubr.msk.bf16.gmra.mrb[4].mxu0 %vm547_vm0, %v495_v8  ;;  %v7813_v35 = vadd.f32 %v5308_v28, %v5300_v21  ;;  %v4375_v40 = vcombine.high %v4367_v29, %v4367_v29  ;;  %v4384_v42 = vrot.slane %v469_v4, %v7754_v7  ;;  %v4376_v44 = vcombine.high %v4374_v30, %v4374_v30 }
 0x11e   : > { %6687 = vmatprep.mubr.msk.bf16.mxu0 %vm547_vm0, %v496_v12  ;;  %v5307_v36 = vadd.f32 %v6390_v31, %v4342_v23  ;;  %v7815_v38 = vadd.f32 %v5305_v32, %v5297_v19  ;;  %v7817_v39 = vadd.f32 %v5306_v33, %v5298_v20  ;;  %v4391_v45 = vrot.slane %v4377_v41, %v7754_v7 }
 0x11f   : > { %v4392_v46 = vcombine.high %v4384_v42, %v4384_v42  ;;  %v6395_v47 = vrot.slane %v4367_v29, 9  ;;  %v6396_v49 = vrot.slane %v4375_v40, 9  ;;  %v6397_v50 = vrot.slane %v4374_v30, 9 }
 0x120   : > { %v7820_v43 = vadd.f32 %v5307_v36, %v5299_v27  ;;  %v4393_v48 = vcombine.high %v4391_v45, %v4391_v45  ;;  %v6398_v54 = vrot.slane %v4376_v44, 9  ;;  %v6399_v57 = vrot.slane %v4384_v42, 9 }
 0x121   : > { %v6400_v58 = vrot.slane %v4392_v46, 9  ;;  %v6401_v59 = vrot.slane %v4391_v45, 9  ;;  %v5312_v0 = vadd.f32 %v6395_v47, %v4367_v29  ;;  %v5313_v1 = vadd.f32 %v6396_v49, %v4375_v40 }
 0x122   : > { %v6402_v60 = vrot.slane %v4393_v48, 9  ;;  %v5314_v4 = vadd.f32 %v6397_v50, %v4374_v30  ;;  %v5315_v5 = vadd.f32 %v6398_v54, %v4376_v44  ;;  %v5316_v6 = vadd.f32 %v6399_v57, %v4384_v42 }
 0x123   : > { %v5317_v8 = vadd.f32 %v6400_v58, %v4392_v46  ;;  %v5318_v9 = vadd.f32 %v6401_v59, %v4391_v45  ;;  %v497_v10 = vpack.c.bf16 %v471_v63, %v470_v62  ;;  %v4394_v12 = vcombine.high %v470_v62, %v470_v62 }
 0x124   : > { %v4401_v13 = vrot.slane %v470_v62, %v7754_v7  ;;  %v5319_v14 = vadd.f32 %v6402_v60, %v4393_v48  ;;  %v4411_v16 = vcombine.high %v471_v63, %v471_v63  ;;  %v4418_v17 = vrot.slane %v471_v63, %v7754_v7 }
 0x125   : > { %v498_v18 = vpack.c.bf16 %v7827_v3, %v472_v2  ;;  %6688 = vmatmul.mubr.msk.bf16.gmra.mrb[8].mxu0 %vm547_vm0, %v497_v10  ;;  %v4408_v19 = vrot.slane %v4394_v12, %v7754_v7  ;;  %v4428_v22 = vcombine.high %v472_v2, %v472_v2  ;;  %v7837_v26 = vrot.slane %v472_v2, %v7754_v7 }
 0x126   : > { %v4409_v20 = vcombine.high %v4401_v13, %v4401_v13  ;;  %v6403_v21 = vrot.slane %v4401_v13, 9  ;;  %v4425_v23 = vrot.slane %v4411_v16, %v7754_v7  ;;  %v4426_v24 = vcombine.high %v4418_v17, %v4418_v17 }
 0x127   : > { %v6407_v25 = vrot.slane %v4418_v17, 9  ;;  %6691 = vmatprep.mubr.msk.bf16.mxu0 %vm547_vm0, %v498_v18  ;;  %v4410_v27 = vcombine.high %v4408_v19, %v4408_v19  ;;  %v6405_v29 = vrot.slane %v4408_v19, 9 }
 0x128   : > { %v6404_v28 = vrot.slane %v4409_v20, 9  ;;  %v5320_v30 = vadd.f32 %v6403_v21, %v4401_v13  ;;  %v4427_v31 = vcombine.high %v4425_v23, %v4425_v23  ;;  %v6408_v32 = vrot.slane %v4426_v24, 9 }
 0x129   : > { %v6409_v33 = vrot.slane %v4425_v23, 9  ;;  %v5324_v36 = vadd.f32 %v6407_v25, %v4418_v17  ;;  %v6406_v40 = vrot.slane %v4410_v27, 9  ;;  %v5322_v42 = vadd.f32 %v6405_v29, %v4408_v19 }
 0x12a   : > { %v5321_v41 = vadd.f32 %v6404_v28, %v4409_v20  ;;  %v5424_v44 = vadd.f32 %v5320_v30, %v5312_v0  ;;  %v6410_v45 = vrot.slane %v4427_v31, 9  ;;  %v5325_v46 = vadd.f32 %v6408_v32, %v4426_v24 }
 0x12b   : > { %v5326_v47 = vadd.f32 %v6409_v33, %v4425_v23  ;;  %v5428_v48 = vadd.f32 %v5324_v36, %v5316_v6  ;;  %v5323_v49 = vadd.f32 %v6406_v40, %v4410_v27  ;;  %v5426_v54 = vadd.f32 %v5322_v42, %v5314_v4  ;;  %v474_v42 = vld [vmem:[%s7732_s18 + $0x70] sm:$0xff] }
 0x12c   : > { %v5425_v50 = vadd.f32 %v5321_v41, %v5313_v1  ;;  %v5488_v57 = vmul.f32 0.25, %v5424_v44  ;;  %v5327_v58 = vadd.f32 %v6410_v45, %v4427_v31  ;;  %v7839_v59 = vadd.f32 %v5325_v46, %v5317_v8 }
 0x12d   : > { %v7841_v60 = vadd.f32 %v5326_v47, %v5318_v9  ;;  %v5492_v62 = vmul.f32 0.25, %v5428_v48  ;;  %v5427_v63 = vadd.f32 %v5323_v49, %v5315_v5  ;;  %v5490_v10 = vmul.f32 0.25, %v5426_v54  ;;  %v7867_v54 = vld [vmem:[%s7732_s18 + $0x88] sm:$0xff] }
 0x12e   : > { %v5489_v2 = vmul.f32 0.25, %v5425_v50  ;;  %v5552_v12 = vpack.c.bf16 %v5488_v57, %v5488_v57  ;;  %v7843_v13 = vadd.f32 %v5327_v58, %v5319_v14  ;;  %v4442_v1 = vrot.slane %v4428_v22, %v7754_v7  ;;  %v7864_v50 = vld [vmem:[%s7732_s18 + $0x80] sm:$0xff] }
 0x12f   : > { %v5556_v0 = vpack.c.bf16 %v5492_v62, %v5492_v62  ;;  %v5491_v16 = vmul.f32 0.25, %v5427_v63  ;;  %v5554_v6 = vpack.c.bf16 %v5490_v10, %v5490_v10  ;;  %v4443_v9 = vcombine.high %v7837_v26, %v7837_v26 }
 0x130   : > { %v5553_v17 = vpack.c.bf16 %v5489_v2, %v5489_v2  ;;  %v5695_v4 = vunpack.c.l.b16 %v5552_v12  ;;  %v4444_v23 = vcombine.high %v4442_v1, %v4442_v1  ;;  %v4445_v22 = vcombine.high %v7827_v3, %v7827_v3 }
 0x131   : > { %v5699_v18 = vunpack.c.l.b16 %v5556_v0  ;;  %v5555_v19 = vpack.c.bf16 %v5491_v16, %v5491_v16  ;;  %v5697_v20 = vunpack.c.l.b16 %v5554_v6  ;;  %v4452_v25 = vrot.slane %v7827_v3, %v7754_v7  ;;  %v475_v3 = vld [vmem:[%s7732_s18 + $0x78] sm:$0xff] }
 0x132   : > { %v5696_v8 = vunpack.c.l.b16 %v5553_v17  ;;  %v6411_v29 = vrot.slane %v7837_v26, 9  ;;  %v6412_v30 = vrot.slane %v4443_v9, 9  ;;  %v4459_v32 = vrot.slane %v4445_v22, %v7754_v7 }
 0x133   : > { %v5698_v5 = vunpack.c.l.b16 %v5555_v19  ;;  %v5773_v14 = vrot.slane %v5697_v20, 6  ;;  %v5777_v24 = vrot.slane %v5699_v18, 4  ;;  %v4460_v33 = vcombine.high %v4452_v25, %v4452_v25 }
 0x134   : > { %v5771_v21 = vrot.slane %v5696_v8, 7  ;;  %v6413_v36 = vrot.slane %v4442_v1, 9  ;;  %v6414_v41 = vrot.slane %v4444_v23, 9  ;;  %v4461_v45 = vcombine.high %v4459_v32, %v4459_v32 }
 0x135   : > { %v5775_v28 = vrot.slane %v5698_v5, 5  ;;  %v6415_v46 = vrot.slane %v4452_v25, 9  ;;  %v6416_v47 = vrot.slane %v4460_v33, 9  ;;  %v6417_v48 = vrot.slane %v4459_v32, 9 }
 0x136   : > { %v5772_v27 = vsel %vm3981_vm1, %v5771_v21, %v5695_v4  ;;  %v5328_v49 = vadd.f32 %v6411_v29, %v7837_v26  ;;  %v6418_v57 = vrot.slane %v4461_v45, 9  ;;  %v5329_v58 = vadd.f32 %v6412_v30, %v4443_v9 }
 0x137   : > { %v5774_v31 = vsel %vm3984_vm2, %v5773_v14, %v5772_v27  ;;  %v5330_v62 = vadd.f32 %v6413_v36, %v4442_v1  ;;  %v499_v63 = vpack.c.bf16 %v475_v3, %v474_v42  ;;  %v4462_v2 = vcombine.high %v474_v42, %v474_v42 }
 0x138   : > { %v5776_v40 = vsel %vm3987_vm3, %v5775_v28, %v5774_v31  ;;  %v4469_v10 = vrot.slane %v474_v42, %v7754_v7  ;;  %v4479_v12 = vcombine.high %v475_v3, %v475_v3  ;;  %v4486_v0 = vrot.slane %v475_v3, %v7754_v7 }
 0x139   : > { %v7860_v44 = vsel %vm3990_vm4, %v5777_v24, %v5776_v40  ;;  %v5331_v16 = vadd.f32 %v6414_v41, %v4444_v23  ;;  %v5332_v17 = vadd.f32 %v6415_v46, %v4452_v25  ;;  %v5333_v6 = vadd.f32 %v6416_v47, %v4460_v33  ;;  %6692 = vmatmul.mubr.msk.bf16.gmra.mrb[12].mxu0 %vm547_vm0, %v499_v63 }
 0x13a   : > { %9663 = vst [vmem:[#allocation26_spill] sm:$0xff] %v7860_v44  ;;  %v500_v26 = vpack.c.bf16 %v7867_v54, %v7864_v50  ;;  %v4476_v4 = vrot.slane %v4462_v2, %v7754_v7  ;;  %v4477_v18 = vcombine.high %v4469_v10, %v4469_v10  ;;  %v4493_v1 = vrot.slane %v4479_v12, %v7754_v7 }
 0x13b   : > { %v4494_v19 = vcombine.high %v4486_v0, %v4486_v0  ;;  %v5334_v8 = vadd.f32 %v6417_v48, %v4459_v32  ;;  %v5335_v20 = vadd.f32 %v6418_v57, %v4461_v45  ;;  %v6419_v9 = vrot.slane %v4469_v10, 9 }
 0x13c   : > { %v6423_v5 = vrot.slane %v4486_v0, 9  ;;  %6695 = vmatprep.mubr.msk.bf16.mxu0 %vm547_vm0, %v500_v26  ;;  %v4478_v21 = vcombine.high %v4476_v4, %v4476_v4  ;;  %v4495_v14 = vcombine.high %v4493_v1, %v4493_v1  ;;  %v6420_v23 = vrot.slane %v4477_v18, 9 }
 0x13d   : > { %v6421_v24 = vrot.slane %v4476_v4, 9  ;;  %v6424_v22 = vrot.slane %v4494_v19, 9  ;;  %v6425_v25 = vrot.slane %v4493_v1, 9  ;;  %v5336_v27 = vadd.f32 %v6419_v9, %v4469_v10 }
 0x13e   : > { %v5340_v28 = vadd.f32 %v6423_v5, %v4486_v0  ;;  %v6422_v29 = vrot.slane %v4478_v21, 9  ;;  %v6426_v30 = vrot.slane %v4495_v14, 9  ;;  %v5337_v31 = vadd.f32 %v6420_v23, %v4477_v18 }
 0x13f   : > { %v5338_v33 = vadd.f32 %v6421_v24, %v4476_v4  ;;  %v5341_v36 = vadd.f32 %v6424_v22, %v4494_v19  ;;  %v5342_v40 = vadd.f32 %v6425_v25, %v4493_v1  ;;  %v5432_v32 = vadd.f32 %v5336_v27, %v5328_v49 }
 0x140   : > { %v5436_v41 = vadd.f32 %v5340_v28, %v5332_v17  ;;  %v5339_v42 = vadd.f32 %v6422_v29, %v4478_v21  ;;  %v5343_v3 = vadd.f32 %v6426_v30, %v4495_v14  ;;  %v5433_v45 = vadd.f32 %v5337_v31, %v5329_v58  ;;  %v478_v29 = vld [vmem:[%s7732_s18 + $0x90] sm:$0xff]  ;;  %v479_v30 = vld [vmem:[%s7732_s18 + $0x98] sm:$0xff] }
 0x141   : > { %v5434_v46 = vadd.f32 %v5338_v33, %v5330_v62  ;;  %v7877_v47 = vadd.f32 %v5341_v36, %v5333_v6  ;;  %v7879_v48 = vadd.f32 %v5342_v40, %v5334_v8  ;;  %v5496_v57 = vmul.f32 0.25, %v5432_v32  ;;  %v480_v36 = vld [vmem:[%s7732_s18 + $0xa0] sm:$0xff]  ;;  %v481_v40 = vld [vmem:[%s7732_s18 + $0xa8] sm:$0xff] }
 0x142   : > { %v5500_v63 = vmul.f32 0.25, %v5436_v41  ;;  %v5435_v2 = vadd.f32 %v5339_v42, %v5331_v16  ;;  %v7881_v10 = vadd.f32 %v5343_v3, %v5335_v20  ;;  %v5497_v12 = vmul.f32 0.25, %v5433_v45 }
 0x143   : > { %v5498_v0 = vmul.f32 0.25, %v5434_v46  ;;  %v5560_v26 = vpack.c.bf16 %v5496_v57, %v5496_v57  ;;  %v4496_v58 = vcombine.high %v7864_v50, %v7864_v50  ;;  %v4503_v6 = vrot.slane %v7864_v50, %v7754_v7 }
 0x144   : > { %v5564_v4 = vpack.c.bf16 %v5500_v63, %v5500_v63  ;;  %v5499_v18 = vmul.f32 0.25, %v5435_v2  ;;  %v5561_v49 = vpack.c.bf16 %v5497_v12, %v5497_v12  ;;  %v7891_v50 = vrot.slane %v7867_v54, %v7754_v7 }
 0x145   : > { %v5562_v17 = vpack.c.bf16 %v5498_v0, %v5498_v0  ;;  %v5703_v19 = vunpack.c.l.b16 %v5560_v26  ;;  %v4510_v21 = vrot.slane %v4496_v58, %v7754_v7  ;;  %v4511_v22 = vcombine.high %v4503_v6, %v4503_v6 }
 0x146   : > { %v5707_v62 = vunpack.c.l.b16 %v5564_v4  ;;  %v5563_v1 = vpack.c.bf16 %v5499_v18, %v5499_v18  ;;  %v5704_v16 = vunpack.c.l.b16 %v5561_v49  ;;  %v6427_v33 = vrot.slane %v4503_v6, 9 }
 0x147   : > { %v5705_v8 = vunpack.c.l.b16 %v5562_v17  ;;  %v4512_v28 = vcombine.high %v4510_v21, %v4510_v21  ;;  %v6428_v32 = vrot.slane %v4511_v22, 9  ;;  %v6429_v41 = vrot.slane %v4510_v21, 9 }
 0x148   : > { %v5706_v20 = vunpack.c.l.b16 %v5563_v1  ;;  %v5785_v9 = vrot.slane %v5704_v16, 7  ;;  %v5791_v14 = vrot.slane %v5707_v62, 4  ;;  %v6431_v42 = vrot.slane %v7891_v50, 9 }
 0x149   : > { %v5787_v5 = vrot.slane %v5705_v8, 6  ;;  %v501_v3 = vpack.c.bf16 %v479_v30, %v478_v29  ;;  %v4530_v54 = vcombine.high %v478_v29, %v478_v29  ;;  %v4537_v45 = vrot.slane %v478_v29, %v7754_v7 }
 0x14a   : > { %v5786_v23 = vsel %vm3981_vm1, %v5785_v9, %v5703_v19  ;;  %v5789_v24 = vrot.slane %v5706_v20, 5  ;;  %v6430_v46 = vrot.slane %v4512_v28, 9  ;;  %v7905_v57 = vrot.slane %v479_v30, %v7754_v7 }
 0x14b   : > { %v5788_v25 = vsel %vm3984_vm2, %v5787_v5, %v5786_v23  ;;  %v502_v63 = vpack.c.bf16 %v481_v40, %v480_v36  ;;  %v5344_v2 = vadd.f32 %v6427_v33, %v4503_v6  ;;  %6696 = vmatmul.mubr.msk.bf16.gmra.mrb[16].mxu0 %vm547_vm0, %v501_v3  ;;  %v4544_v12 = vrot.slane %v4530_v54, %v7754_v7  ;;  %v482_v33 = vld [vmem:[%s7732_s18 + $0xb0] sm:$0xff]  ;;  %v484_v3 = vld [vmem:[%s7732_s18 + $0xc0] sm:$0xff]  ;;  %v485_v54 = vld [vmem:[%s7732_s18 + $0xc8] sm:$0xff] }
 0x14c   : > { %v5790_v27 = vsel %vm3987_vm3, %v5789_v24, %v5788_v25  ;;  %v4545_v0 = vcombine.high %v4537_v45, %v4537_v45  ;;  %v6435_v26 = vrot.slane %v4537_v45, 9  ;;  %v5345_v4 = vadd.f32 %v6428_v32, %v4511_v22  ;;  %v483_v32 = vld [vmem:[%s7732_s18 + $0xb8] sm:$0xff] }
 0x14d   : > { %v7898_v31 = vsel %vm3990_vm4, %v5791_v14, %v5790_v27  ;;  %v5346_v18 = vadd.f32 %v6429_v41, %v4510_v21  ;;  %v5348_v49 = vadd.f32 %v6431_v42, %v7891_v50  ;;  %v6439_v17 = vrot.slane %v7905_v57, 9  ;;  %6699 = vmatprep.mubr.msk.bf16.mxu0 %vm547_vm0, %v502_v63 }
 0x14e   : > { %9664 = vst [vmem:[#allocation27_spill] sm:$0xff] %v7898_v31  ;;  %v4546_v58 = vcombine.high %v4544_v12, %v4544_v12  ;;  %v6436_v62 = vrot.slane %v4545_v0, 9  ;;  %v6437_v1 = vrot.slane %v4544_v12, 9  ;;  %v5352_v19 = vadd.f32 %v6435_v26, %v4537_v45  ;;  %v6978_v31 = vld [vmem:[#allocation10 + $0x88] sm:$0xff]  }
 0x14f   : > { %v5347_v16 = vadd.f32 %v6430_v46, %v4512_v28  ;;  %v5356_v6 = vadd.f32 %v6439_v17, %v7905_v57  ;;  %v4564_v14 = vcombine.high %v480_v36, %v480_v36  ;;  %v4571_v25 = vrot.slane %v480_v36, %v7754_v7 }
 0x150   : > { %v6438_v8 = vrot.slane %v4546_v58, 9  ;;  %v5353_v20 = vadd.f32 %v6436_v62, %v4545_v0  ;;  %v5354_v9 = vadd.f32 %v6437_v1, %v4544_v12  ;;  %v7913_v5 = vadd.f32 %v5352_v19, %v5344_v2 }
 0x151   : > { %v7915_v21 = vadd.f32 %v5356_v6, %v5348_v49  ;;  %v4578_v28 = vrot.slane %v4564_v14, %v7754_v7  ;;  %v4579_v29 = vcombine.high %v4571_v25, %v4571_v25  ;;  %v7926_v30 = vrot.slane %v481_v40, %v7754_v7 }
 0x152   : > { %v5355_v23 = vadd.f32 %v6438_v8, %v4546_v58  ;;  %v7917_v24 = vadd.f32 %v5353_v20, %v5345_v4  ;;  %v7919_v22 = vadd.f32 %v5354_v9, %v5346_v18  ;;  %v6443_v42 = vrot.slane %v4571_v25, 9 }
 0x153   : > { %v4580_v41 = vcombine.high %v4578_v28, %v4578_v28  ;;  %v6444_v45 = vrot.slane %v4579_v29, 9  ;;  %v6447_v46 = vrot.slane %v7926_v30, 9  ;;  %v503_v63 = vpack.c.bf16 %v483_v32, %v482_v33 }
 0x154   : > { %v7922_v27 = vadd.f32 %v5355_v23, %v5347_v16  ;;  %v6445_v2 = vrot.slane %v4578_v28, 9  ;;  %v4598_v36 = vcombine.high %v482_v33, %v482_v33  ;;  %v4605_v12 = vrot.slane %v482_v33, %v7754_v7 }
 0x155   : > { %v7935_v0 = vrot.slane %v483_v32, %v7754_v7  ;;  %v6446_v26 = vrot.slane %v4580_v41, 9  ;;  %6700 = vmatmul.mubr.msk.bf16.gmra.mrb[20].mxu0 %vm547_vm0, %v503_v63  ;;  %v504_v40 = vpack.c.bf16 %v485_v54, %v484_v3  ;;  %v5360_v4 = vadd.f32 %v6443_v42, %v4571_v25 }
 0x156   : > { %v4612_v18 = vrot.slane %v4598_v36, %v7754_v7  ;;  %v4613_v49 = vcombine.high %v4605_v12, %v4605_v12  ;;  %v5361_v17 = vadd.f32 %v6444_v45, %v4579_v29  ;;  %v5364_v58 = vadd.f32 %v6447_v46, %v7926_v30 }
 0x157   : > { %v6451_v62 = vrot.slane %v4605_v12, 9  ;;  %v6455_v1 = vrot.slane %v7935_v0, 9  ;;  %6703 = vmatprep.mubr.msk.bf16.mxu0 %vm547_vm0, %v504_v40  ;;  %v5362_v19 = vadd.f32 %v6445_v2, %v4578_v28  ;;  %v5363_v20 = vadd.f32 %v6446_v26, %v4580_v41  ;;  %v486_v40 = vld [vmem:[%s7732_s18 + $0xd0] sm:$0xff] }
 0x158   : > { %v4614_v16 = vcombine.high %v4612_v18, %v4612_v18  ;;  %v6452_v6 = vrot.slane %v4613_v49, 9  ;;  %v6453_v8 = vrot.slane %v4612_v18, 9  ;;  %v4632_v33 = vcombine.high %v484_v3, %v484_v3 }
 0x159   : > { %v5368_v9 = vadd.f32 %v6451_v62, %v4605_v12  ;;  %v5372_v14 = vadd.f32 %v6455_v1, %v7935_v0  ;;  %v4639_v41 = vrot.slane %v484_v3, %v7754_v7  ;;  %v7956_v12 = vrot.slane %v485_v54, %v7754_v7 }
 0x15a   : > { %v6454_v23 = vrot.slane %v4614_v16, 9  ;;  %v5369_v25 = vadd.f32 %v6452_v6, %v4613_v49  ;;  %v5370_v29 = vadd.f32 %v6453_v8, %v4612_v18  ;;  %v4646_v2 = vrot.slane %v4632_v33, %v7754_v7  ;;  %v488_v49 = vld [vmem:[%s7732_s18 + $0xe0] sm:$0xff] }
 0x15b   : > { %v7943_v32 = vadd.f32 %v5368_v9, %v5360_v4  ;;  %v7945_v42 = vadd.f32 %v5372_v14, %v5364_v58  ;;  %v4647_v36 = vcombine.high %v4639_v41, %v4639_v41  ;;  %9666 = vst [vmem:[#allocation29_spill] sm:$0xff] %v7956_v12  ;;  %v487_v4 = vld [vmem:[%s7732_s18 + $0xd8] sm:$0xff]  ;;  %v6459_v18 = vrot.slane %v4639_v41, 9  ;;  %v489_v58 = vld [vmem:[%s7732_s18 + $0xe8] sm:$0xff] }
 0x15c   : > { %v5371_v28 = vadd.f32 %v6454_v23, %v4614_v16  ;;  %v7947_v45 = vadd.f32 %v5369_v25, %v5361_v17  ;;  %v7949_v46 = vadd.f32 %v5370_v29, %v5362_v19  ;;  %v4648_v26 = vcombine.high %v4646_v2, %v4646_v2  ;;  %v7964_v6 = vld [vmem:[#allocation10 + $0x80] sm:$0xff]  }
 0x15d   : > { %v6460_v17 = vrot.slane %v4647_v36, 9  ;;  %v6461_v62 = vrot.slane %v4646_v2, 9  ;;  %v6463_v1 = vrot.slane %v7956_v12, 9  ;;  %v505_v19 = vpack.c.bf16 %v487_v4, %v486_v40  ;;  %6711 = vmatprep.subr.bf16.mxu0 %v7964_v6 }
 0x15e   : > { %v7952_v63 = vadd.f32 %v5371_v28, %v5363_v20  ;;  %v4666_v3 = vcombine.high %v486_v40, %v486_v40  ;;  %v4673_v16 = vrot.slane %v486_v40, %v7754_v7  ;;  %v6462_v8 = vrot.slane %v4648_v26, 9  ;;  %6712 = vmatpush3.bf16.msra.mxu0 %v7964_v6 }
 0x15f   : > { %v7967_v54 = vrot.slane %v487_v4, %v7754_v7  ;;  %v506_v20 = vpack.c.bf16 %v489_v58, %v488_v49  ;;  %v5376_v9 = vadd.f32 %v6459_v18, %v4639_v41  ;;  %6704 = vmatmul.mubr.msk.bf16.gmra.mrb[24].mxu0 %vm547_vm0, %v505_v19  ;;  %v5377_v29 = vadd.f32 %v6460_v17, %v4647_v36 }
 0x160   : > { %9665 = vst [vmem:[#allocation28_spill] sm:$0xff] %v7952_v63  ;;  %v4680_v14 = vrot.slane %v4666_v3, %v7754_v7  ;;  %v4681_v23 = vcombine.high %v4673_v16, %v4673_v16  ;;  %v6467_v25 = vrot.slane %v4673_v16, 9  ;;  %v5378_v33 = vadd.f32 %v6461_v62, %v4646_v2  ;;  %6713 = vmatprep.subr.bf16.mxu0 %v6978_v31 }
 0x161   : > { %9667 = vst [vmem:[#allocation30_spill] sm:$0xff] %v7967_v54  ;;  %v5380_v28 = vadd.f32 %v6463_v1, %v7956_v12  ;;  %v6471_v40 = vrot.slane %v7967_v54, 9  ;;  %6707 = vmatprep.mubr.msk.bf16.mxu0 %vm547_vm0, %v506_v20  ;;  %v5379_v3 = vadd.f32 %v6462_v8, %v4648_v26  ;;  %v4707_v26 = vrot.slane %v488_v49, %v7754_v7 }
 0x162   : > { %v4682_v4 = vcombine.high %v4680_v14, %v4680_v14  ;;  %v6468_v41 = vrot.slane %v4681_v23, 9  ;;  %v6469_v18 = vrot.slane %v4680_v14, 9  ;;  %v5384_v19 = vadd.f32 %v6467_v25, %v4673_v16  ;;  %6714 = vmatpush3.bf16.msra.mxu0 %v6978_v31  ;;  %v491_v25 = vld [vmem:[%s7732_s18 + $0xf8] sm:$0xff] }
 0x163   : > { %v5388_v44 = vadd.f32 %v6471_v40, %v7967_v54  ;;  %v4700_v16 = vcombine.high %v488_v49, %v488_v49 }
 0x164   : > { %v6470_v63 = vrot.slane %v4682_v4, 9  ;;  %v5385_v36 = vadd.f32 %v6468_v41, %v4681_v23  ;;  %v5386_v2 = vadd.f32 %v6469_v18, %v4680_v14  ;;  %v7977_v17 = vadd.f32 %v5384_v19, %v5376_v9 }
 0x165   : > { %v7979_v62 = vadd.f32 %v5388_v44, %v5380_v28  ;;  %v7989_v23 = vrot.slane %v4700_v16, %v7754_v7  ;;  %v4715_v14 = vcombine.high %v4707_v26, %v4707_v26  ;;  %v7992_v9 = vrot.slane %v489_v58, %v7754_v7  ;;  %v490_v44 = vld [vmem:[%s7732_s18 + $0xf0] sm:$0xff] }
 0x166   : > { %9668 = vst [vmem:[#allocation31_spill] sm:$0xff] %v7977_v17  ;;  %v5387_v1 = vadd.f32 %v6470_v63, %v4682_v4  ;;  %v7981_v20 = vadd.f32 %v5385_v36, %v5377_v29  ;;  %v7983_v12 = vadd.f32 %v5386_v2, %v5378_v33  ;;  %v6475_v63 = vrot.slane %v4707_v26, 9 }
 0x167   : > { %9669 = vst [vmem:[#allocation32_spill] sm:$0xff] %v7979_v62  ;;  %9673 = vst [vmem:[#allocation36_spill] sm:$0xff] %v7992_v9  ;;  %v7998_v31 = vcombine.high %v7989_v23, %v7989_v23  ;;  %v6476_v29 = vrot.slane %v4715_v14, 9  ;;  %v6479_v33 = vrot.slane %v7992_v9, 9  ;;  %v507_v49 = vpack.c.bf16 %v491_v25, %v490_v44 }
 0x168   : > { %9670 = vst [vmem:[#allocation33_spill] sm:$0xff] %v7981_v20  ;;  %9671 = vst [vmem:[#allocation34_spill] sm:$0xff] %v7983_v12  ;;  %v7986_v8 = vadd.f32 %v5387_v1, %v5379_v3  ;;  %v6477_v28 = vrot.slane %v7989_v23, 9  ;;  %v4734_v40 = vcombine.high %v490_v44, %v490_v44  ;;  %v4741_v4 = vrot.slane %v490_v44, %v7754_v7 }
 0x169   : > { %v8004_v41 = vrot.slane %v491_v25, %v7754_v7  ;;  %6708 = vmatmul.mubr.msk.bf16.gmra.mrb[28].mxu0 %vm547_vm0, %v507_v49  ;;  %v6478_v58 = vrot.slane %v7998_v31, 9  ;;  %v5392_v18 = vadd.f32 %v6475_v63, %v4707_v26  ;;  %v7368_v36 = vmov 0.0  }
 0x16a   : > { %9672 = vst [vmem:[#allocation35_spill] sm:$0xff] %v7986_v8  ;;  %v4748_v19 = vrot.slane %v4734_v40, %v7754_v7  ;;  %v4749_v3 = vcombine.high %v4741_v4, %v4741_v4  ;;  %821 = vst.msk [vmem:[#allocation2 + $0x71] sm:$0x1] %vm798_vm6, %v7368_v36  ;;  %v5393_v2 = vadd.f32 %v6476_v29, %v4715_v14  ;;  %v6483_v16 = vrot.slane %v4741_v4, 9 }
 0x16b   : > { %9674 = vst [vmem:[#allocation37_spill] sm:$0xff] %v8004_v41  ;;  %790 = vst.msk [vmem:[#allocation2] sm:$0xff] %vm789_vm5, %v7368_v36  ;;  %v5396_v1 = vadd.f32 %v6479_v33, %v7992_v9  ;;  %v6487_v26 = vrot.slane %v8004_v41, 9  ;;  %v5394_v44 = vadd.f32 %v6477_v28, %v7989_v23  ;;  %v5395_v29 = vadd.f32 %v6478_v58, %v7998_v31  ;;  %v6979_v58 = vld [vmem:[#allocation10 + $0x40] sm:$0xff]  }
 0x16c   : > { %791 = vst.msk [vmem:[#allocation2 + $0x8] sm:$0xff] %vm789_vm5, %v7368_v36  ;;  %795 = vst.msk [vmem:[#allocation2 + $0x198] sm:$0xff] %vm789_vm5, %v7368_v36  ;;  %v4750_v25 = vcombine.high %v4748_v19, %v4748_v19  ;;  %v6484_v63 = vrot.slane %v4749_v3, 9  ;;  %v6485_v49 = vrot.slane %v4748_v19, 9  ;;  %v5400_v40 = vadd.f32 %v6483_v16, %v4741_v4  ;;  %6527 = vmatprep.subr.bf16.mxu1 %v6979_v58  ;;  %v6986_v58 = vld [vmem:[#allocation10 + $0x18] sm:$0xff]  }
 0x16d   : > { %796 = vst.msk [vmem:[#allocation2 + $0x1a0] sm:$0xff] %vm789_vm5, %v7368_v36  ;;  %v5404_v14 = vadd.f32 %v6487_v26, %v8004_v41 }
 0x16e   : > { %800 = vst.msk [vmem:[#allocation2 + $0x18] sm:$0x1] %vm798_vm6, %v7368_v36  ;;  %801 = vst.msk [vmem:[#allocation2 + $0x30] sm:$0x1] %vm798_vm6, %v7368_v36  ;;  %v6486_v33 = vrot.slane %v4750_v25, 9  ;;  %v5401_v8 = vadd.f32 %v6484_v63, %v4749_v3  ;;  %v5402_v9 = vadd.f32 %v6485_v49, %v4748_v19  ;;  %v8056_v62 = vadd.f32 %v5400_v40, %v5392_v18  ;;  %v6980_v18 = vld [vmem:[#allocation10] sm:$0xff]  }
 0x16f   : > { %802 = vst.msk [vmem:[#allocation2 + $0x48] sm:$0x1] %vm798_vm6, %v7368_v36  ;;  %803 = vst.msk [vmem:[#allocation2 + $0x60] sm:$0x1] %vm798_vm6, %v7368_v36  ;;  %v8058_v17 = vadd.f32 %v5404_v14, %v5396_v1  ;;  %6528 = vmatpush3.bf16.msra.mxu1 %v6980_v18  ;;  %v6982_v14 = vld [vmem:[#allocation10 + $0x8] sm:$0xff]  }
 0x170   : > { %804 = vst.msk [vmem:[#allocation2 + $0x78] sm:$0x1] %vm798_vm6, %v7368_v36  ;;  %805 = vst.msk [vmem:[#allocation2 + $0x90] sm:$0x1] %vm798_vm6, %v7368_v36  ;;  %v5403_v12 = vadd.f32 %v6486_v33, %v4750_v25  ;;  %v8060_v20 = vadd.f32 %v5401_v8, %v5393_v2  ;;  %v8068_v8 = vld [vmem:[#allocation9] ss:$0 sm:$0xff] }
 0x171   : > { %806 = vst.msk [vmem:[#allocation2 + $0xa8] sm:$0x1] %vm798_vm6, %v7368_v36  ;;  %807 = vst.msk [vmem:[#allocation2 + $0xc0] sm:$0x1] %vm798_vm6, %v7368_v36  ;;  %v6981_v25 = vld [vmem:[#allocation10 + $0x48] sm:$0xff]  }
 0x172   : > { %808 = vst.msk [vmem:[#allocation2 + $0xd8] sm:$0x1] %vm798_vm6, %v7368_v36  ;;  %809 = vst.msk [vmem:[#allocation2 + $0xf0] sm:$0x1] %vm798_vm6, %v7368_v36  ;;  %v8064_v4 = vadd.f32 %v5403_v12, %v5395_v29  ;;  %v6983_v29 = vld [vmem:[#allocation10 + $0x50] sm:$0xff]   ;;  %6529 = vmatprep.subr.bf16.mxu1 %v6981_v25 }
 0x173   : > { %810 = vst.msk [vmem:[#allocation2 + $0x108] sm:$0x1] %vm798_vm6, %v7368_v36  ;;  %811 = vst.msk [vmem:[#allocation2 + $0x120] sm:$0x1] %vm798_vm6, %v7368_v36  ;;  %v1061_v23 = vld [vmem:[#allocation2 + $0x2] sm:$0xff]  ;;  %6530 = vmatpush3.bf16.msra.mxu1 %v6982_v14 }
 0x174   : > { %812 = vst.msk [vmem:[#allocation2 + $0x138] sm:$0x1] %vm798_vm6, %v7368_v36  ;;  %813 = vst.msk [vmem:[#allocation2 + $0x150] sm:$0x1] %vm798_vm6, %v7368_v36  ;;  %v932_v28 = vld [vmem:[#allocation2 + $0x1] sm:$0xff]  ;;  %6531 = vmatprep.subr.bf16.mxu1 %v6983_v29 }
 0x175   : > { %814 = vst.msk [vmem:[#allocation2 + $0x168] sm:$0x1] %vm798_vm6, %v7368_v36  ;;  %815 = vst.msk [vmem:[#allocation2 + $0x180] sm:$0x1] %vm798_vm6, %v7368_v36 }
 0x176   : > { %818 = vst.msk [vmem:[#allocation2 + $0x29] sm:$0x1] %vm798_vm6, %v7368_v36  ;;  %819 = vst.msk [vmem:[#allocation2 + $0x41] sm:$0x1] %vm798_vm6, %v7368_v36 }
 0x177   : > { %820 = vst.msk [vmem:[#allocation2 + $0x59] sm:$0x1] %vm798_vm6, %v7368_v36  ;;  %822 = vst.msk [vmem:[#allocation2 + $0x89] sm:$0x1] %vm798_vm6, %v7368_v36 }
 0x178   : > { %823 = vst.msk [vmem:[#allocation2 + $0xa1] sm:$0x1] %vm798_vm6, %v7368_v36  ;;  %824 = vst.msk [vmem:[#allocation2 + $0xb9] sm:$0x1] %vm798_vm6, %v7368_v36 }
 0x179   : > { %825 = vst.msk [vmem:[#allocation2 + $0xd1] sm:$0x1] %vm798_vm6, %v7368_v36  ;;  %826 = vst.msk [vmem:[#allocation2 + $0xe9] sm:$0x1] %vm798_vm6, %v7368_v36 }
 0x17a   : > { %827 = vst.msk [vmem:[#allocation2 + $0x101] sm:$0x1] %vm798_vm6, %v7368_v36  ;;  %828 = vst.msk [vmem:[#allocation2 + $0x119] sm:$0x1] %vm798_vm6, %v7368_v36 }
 0x17b   : > { %829 = vst.msk [vmem:[#allocation2 + $0x131] sm:$0x1] %vm798_vm6, %v7368_v36  ;;  %830 = vst.msk [vmem:[#allocation2 + $0x149] sm:$0x1] %vm798_vm6, %v7368_v36 }
 0x17c   : > { %831 = vst.msk [vmem:[#allocation2 + $0x161] sm:$0x1] %vm798_vm6, %v7368_v36  ;;  %832 = vst.msk [vmem:[#allocation2 + $0x179] sm:$0x1] %vm798_vm6, %v7368_v36 }
 0x17d   : > { %833 = vst.msk [vmem:[#allocation2 + $0x191] sm:$0x1] %vm798_vm6, %v7368_v36  ;;  %799 = vst.msk [vmem:[#allocation2] sm:$0x1] %vm798_vm6, %v7368_v36 }
 0x17e   : > { %793 = vst.msk [vmem:[#allocation2 + $0x10] sm:$0x3] %vm792_vm7, %v7368_v36  ;;  %797 = vst.msk [vmem:[#allocation2 + $0x1a8] sm:$0x3] %vm792_vm7, %v7368_v36 }
 0x17f   : > { %816 = vst.msk [vmem:[#allocation2 + $0x198] sm:$0x1] %vm798_vm6, %v7368_v36  ;;  %817 = vst.msk [vmem:[#allocation2 + $0x11] sm:$0x1] %vm798_vm6, %v7368_v36 }
 0x180   : > { %834 = vst.msk [vmem:[#allocation2 + $0x1a9] sm:$0x1] %vm798_vm6, %v7368_v36  ;;  %9675 = vst [vmem:[#allocation38_spill] sm:$0xff] %v8056_v62  ;;  %v8062_v36 = vadd.f32 %v5402_v9, %v5394_v44  ;;  %v869_v9 = vld [vmem:[#allocation2 + $0x8] sm:$0xff] }
 0x181   : > { %9676 = vst [vmem:[#allocation39_spill] sm:$0xff] %v8058_v17  ;;  %9677 = vst [vmem:[#allocation40_spill] sm:$0xff] %v8060_v20 }
 0x182   : > { %9678 = vst [vmem:[#allocation41_spill] sm:$0xff] %v8062_v36  ;;  %9679 = vst [vmem:[#allocation42_spill] sm:$0xff] %v8064_v4  ;;  %v6987_v4 = vld [vmem:[#allocation10 + $0x60] sm:$0xff]  }
 0x184   : > { %v868_v19 = vld [vmem:[#allocation2] sm:$0xff] }
 0x185   : > { %v933_v54 = vld [vmem:[#allocation2 + $0x9] sm:$0xff]  ;;  %v900_v3 = vpack.c.bf16 %v869_v9, %v868_v19 }
 0x186   : > { %v1062_v16 = vld [vmem:[#allocation2 + $0xa] sm:$0xff]  ;;  %v964_v26 = vpack.c.bf16 %v933_v54, %v932_v28 }
 0x187   : > { %v1093_v31 = vpack.c.bf16 %v1062_v16, %v1061_v23  ;;  %916 = vst.msk [vmem:[#allocation3] sm:$0xff] %vm789_vm5, %v900_v3  ;;  %v6984_v16 = vld [vmem:[#allocation10 + $0x10] sm:$0xff]  }
 0x188   : > { %996 = vrot.lane.b32.xlu0 %v964_v26, %s7369_s16  ;;  %6532 = vmatpush3.bf16.msra.mxu1 %v6984_v16 }
 0x189   : > { %1125 = vrot.lane.b32.xlu1 %v1093_v31, %s7370_s20  ;;  %v6985_v31 = vld [vmem:[#allocation10 + $0x58] sm:$0xff]  }
 0x18a   : > { %6533 = vmatprep.subr.bf16.mxu1 %v6985_v31 }
 0x18c   : > { %6534 = vmatpush3.bf16.msra.mxu1 %v6986_v58 }
 0x18d   : > { %6535 = vmatprep.subr.bf16.mxu1 %v6987_v4 }
 0x1e8   : > { %v6681_v12 = vpop.f32.mrb[0].mxu0 }
 0x1e9   : > { %v639_v2 = vadd.f32 %v6681_v12, %v8068_v8  ;;  %v630_v54 = vpop.f32.mrb[1].mxu0 }
 0x1ea   : > { %v631_v1 = vadd.f32 %v8068_v8, %v630_v54  ;;  %v6682_v44 = vpop.f32.mrb[2].mxu0 }
 0x1eb   : > { %v759_v63 = vmax.f32 %v639_v2, 0.0  ;;  %v642_v49 = vadd.f32 %v6682_v44, %v8068_v8  ;;  %v633_v40 = vpop.f32.mrb[3].mxu0 }
 0x1ec   : > { %v757_v33 = vmax.f32 %v631_v1, 0.0  ;;  %v634_v23 = vadd.f32 %v8068_v8, %v633_v40 }
 0x1ed   : > { %838 = vst.msk [vmem:[#allocation2 + $0x31] sm:$0xff] %vm789_vm5, %v759_v63  ;;  %v760_v28 = vmax.f32 %v642_v49, 0.0 }
 0x1ee   : > { %836 = vst.msk [vmem:[#allocation2 + $0x19] sm:$0xff] %vm789_vm5, %v757_v33  ;;  %v758_v26 = vmax.f32 %v634_v23, 0.0 }
 0x1ef   : > { %839 = vst.msk [vmem:[#allocation2 + $0x39] sm:$0xff] %vm789_vm5, %v760_v28 }
 0x1f0   : > { %837 = vst.msk [vmem:[#allocation2 + $0x21] sm:$0xff] %vm789_vm5, %v758_v26  ;;  %v6685_v18 = vpop.f32.mrb[4].mxu0 }
 0x1f1   : > { %v655_v9 = vadd.f32 %v6685_v18, %v8068_v8  ;;  %v646_v19 = vpop.f32.mrb[5].mxu0 }
 0x1f2   : > { %v647_v54 = vadd.f32 %v8068_v8, %v646_v19  ;;  %v6686_v1 = vpop.f32.mrb[6].mxu0 }
 0x1f3   : > { %v763_v63 = vmax.f32 %v655_v9, 0.0  ;;  %v658_v49 = vadd.f32 %v6686_v1, %v8068_v8  ;;  %v649_v40 = vpop.f32.mrb[7].mxu0  ;;  %v6990_v1 = vld [vmem:[#allocation10 + $0x28] sm:$0xff]  }
 0x1f4   : > { %v1640_v3 = vld [vmem:[#allocation2 + $0x31] sm:$0xff]  ;;  %v761_v16 = vmax.f32 %v647_v54, 0.0  ;;  %v650_v26 = vadd.f32 %v8068_v8, %v649_v40 }
 0x1f5   : > { %v1512_v12 = vld [vmem:[#allocation2 + $0x30] sm:$0xff]  ;;  %v1190_v23 = vld [vmem:[#allocation2 + $0x18] sm:$0xff]  ;;  %842 = vst.msk [vmem:[#allocation2 + $0x61] sm:$0xff] %vm789_vm5, %v763_v63  ;;  %v764_v19 = vmax.f32 %v658_v49, 0.0  ;;  %v6991_v63 = vld [vmem:[#allocation10 + $0x70] sm:$0xff]  }
 0x1f6   : > { %v1768_v2 = vld [vmem:[#allocation2 + $0x32] sm:$0xff]  ;;  %v1386_v33 = vld [vmem:[#allocation2 + $0x3a] sm:$0xff]  ;;  %840 = vst.msk [vmem:[#allocation2 + $0x49] sm:$0xff] %vm789_vm5, %v761_v16  ;;  %v762_v54 = vmax.f32 %v650_v26, 0.0  ;;  %v6992_v49 = vld [vmem:[#allocation10 + $0x30] sm:$0xff]  }
 0x1f7   : > { %v1641_v44 = vld [vmem:[#allocation2 + $0x39] sm:$0xff]  ;;  %v1416_v31 = vpack.c.bf16 %v1386_v33, %v1768_v2  ;;  %v935_v18 = vld [vmem:[#allocation2 + $0x21] sm:$0xff]  ;;  %843 = vst.msk [vmem:[#allocation2 + $0x69] sm:$0xff] %vm789_vm5, %v764_v19  ;;  %v6993_v33 = vld [vmem:[#allocation10 + $0x78] sm:$0xff]  }
 0x1f8   : > { %v1513_v25 = vld [vmem:[#allocation2 + $0x38] sm:$0xff]  ;;  %v1672_v14 = vpack.c.bf16 %v1641_v44, %v1640_v3  ;;  %v1191_v58 = vld [vmem:[#allocation2 + $0x20] sm:$0xff]  ;;  %841 = vst.msk [vmem:[#allocation2 + $0x51] sm:$0xff] %vm789_vm5, %v762_v54 }
 0x1f9   : > { %v1544_v29 = vpack.c.bf16 %v1513_v25, %v1512_v12  ;;  %v934_v28 = vld [vmem:[#allocation2 + $0x19] sm:$0xff]  ;;  %v8086_v9 = vpack.c.bf16 %v1191_v58, %v1190_v23  ;;  %1816 = vst.msk [vmem:[#allocation3 + $0x10] sm:$0xff] %vm789_vm5, %v1416_v31  ;;  %v1384_v25 = vld [vmem:[#allocation2 + $0x22] sm:$0xff] }
 0x1fa   : > { %1704 = vrot.lane.b32.xlu0 %v1672_v14, %s7371_s13  ;;  %v8088_v3 = vpack.c.bf16 %v935_v18, %v934_v28  ;;  %1368 = vst.msk [vmem:[#allocation3 + $0x20] sm:$0xff] %vm789_vm5, %v1672_v14  ;;  %v6988_v12 = vld [vmem:[#allocation10 + $0x20] sm:$0xff]   ;;  %v6989_v2 = vld [vmem:[#allocation10 + $0x68] sm:$0xff]  }
 0x1fb   : > { %1576 = vrot.lane.b32.xlu1 %v1544_v29, %s7370_s20  ;;  %918 = vst.msk [vmem:[#allocation3 + $0x30] sm:$0xff] %vm789_vm5, %v1544_v29  ;;  %6536 = vmatpush3.bf16.msra.mxu1 %v6988_v12  ;;  %917 = vst.msk [vmem:[#allocation3 + $0x18] sm:$0xff] %vm789_vm5, %v8086_v9  ;;  %v1383_v44 = vld [vmem:[#allocation2 + $0x1a] sm:$0xff] }
 0x1fc   : > { %1367 = vst.msk [vmem:[#allocation3 + $0x8] sm:$0xff] %vm789_vm5, %v8088_v3  ;;  %6537 = vmatprep.subr.bf16.mxu1 %v6989_v2  ;;  %v8102_v4 = vpack.c.bf16 %v1384_v25, %v1383_v44  ;;  %v1516_v40 = vld [vmem:[#allocation2 + $0x60] sm:$0xff]  ;;  %v6994_v25 = vld [vmem:[#allocation10 + $0x38] sm:$0xff]  }
 0x1fd   : > { %v1644_v28 = vld [vmem:[#allocation2 + $0x61] sm:$0xff]  ;;  %v1642_v16 = vld [vmem:[#allocation2 + $0x49] sm:$0xff] }
 0x1fe   : > { %1449 = vrot.lane.b32.xlu0 %v1416_v31, %s7369_s16  ;;  %v1772_v26 = vld [vmem:[#allocation2 + $0x62] sm:$0xff]  ;;  %v1773_v58 = vld [vmem:[#allocation2 + $0x6a] sm:$0xff] }
 0x1ff   : > { %1256 = vrot.lane.b32.xlu1 %v1544_v29, %s7371_s13  ;;  %6538 = vmatpush3.bf16.msra.mxu1 %v6990_v1  ;;  %v1517_v29 = vld [vmem:[#allocation2 + $0x68] sm:$0xff]  ;;  %v8108_v18 = vpack.c.bf16 %v1773_v58, %v1772_v26  ;;  %v1771_v12 = vld [vmem:[#allocation2 + $0x52] sm:$0xff] }
 0x200   : > { %6539 = vmatprep.subr.bf16.mxu1 %v6991_v63  ;;  %v1834_v23 = vld [vmem:[#allocation3 + $0x10] sm:$0xff]  ;;  %v1770_v19 = vld [vmem:[#allocation2 + $0x4a] sm:$0xff]  ;;  %v1546_v2 = vpack.c.bf16 %v1517_v29, %v1516_v40 }
 0x201   : > { %6715 = vmatprep.mubr.msk.bf16.mxu0 %vm789_vm5, %v1834_v23  ;;  %v1645_v54 = vld [vmem:[#allocation2 + $0x69] sm:$0xff]  ;;  %v8110_v1 = vpack.c.bf16 %v1771_v12, %v1770_v19  ;;  %v1643_v44 = vld [vmem:[#allocation2 + $0x51] sm:$0xff]  ;;  %1818 = vst.msk [vmem:[#allocation3 + $0x40] sm:$0xff] %vm789_vm5, %v8108_v18  ;;  %v876_v23 = vld [vmem:[#allocation2 + $0x60] sm:$0xff] }
 0x202   : > { %1447 = vrot.lane.b32.xlu0 %v8102_v4, %s7369_s16  ;;  %v8118_v63 = vpack.c.bf16 %v1643_v44, %v1642_v16  ;;  %v877_v40 = vld [vmem:[#allocation2 + $0x68] sm:$0xff] }
 0x203   : > { %1000 = vrot.lane.b32.xlu1 %v1672_v14, %s7369_s16  ;;  %6540 = vmatpush3.bf16.msra.mxu1 %v6992_v49  ;;  %v8112_v14 = vpack.c.bf16 %v1645_v54, %v1644_v28  ;;  %v874_v26 = vld [vmem:[#allocation2 + $0x48] sm:$0xff]  ;;  %1817 = vst.msk [vmem:[#allocation3 + $0x28] sm:$0xff] %vm789_vm5, %v8110_v1  ;;  %v904_v49 = vpack.c.bf16 %v877_v40, %v876_v23  ;;  %v6689_v28 = vpop.f32.mrb[8].mxu0 }
 0x204   : > { %6541 = vmatprep.subr.bf16.mxu1 %v6993_v33  ;;  %v875_v33 = vld [vmem:[#allocation2 + $0x50] sm:$0xff]  ;;  %1369 = vst.msk [vmem:[#allocation3 + $0x38] sm:$0xff] %vm789_vm5, %v8118_v63  ;;  %v671_v16 = vadd.f32 %v6689_v28, %v8068_v8  ;;  %v662_v58 = vpop.f32.mrb[9].mxu0 }
 0x205   : > { %1370 = vst.msk [vmem:[#allocation3 + $0x50] sm:$0xff] %vm789_vm5, %v8112_v14  ;;  %920 = vst.msk [vmem:[#allocation3 + $0x60] sm:$0xff] %vm789_vm5, %v904_v49  ;;  %v663_v29 = vadd.f32 %v8068_v8, %v662_v58  ;;  %v6690_v19 = vpop.f32.mrb[10].mxu0  ;;  %v1515_v49 = vld [vmem:[#allocation2 + $0x50] sm:$0xff] }
 0x206   : > { %1580 = vrot.lane.b32.xlu0 %v1546_v2, %s7370_s20  ;;  %v767_v12 = vmax.f32 %v671_v16, 0.0  ;;  %v674_v54 = vadd.f32 %v6690_v19, %v8068_v8  ;;  %v665_v44 = vpop.f32.mrb[11].mxu0  ;;  %v997_v16 = vpop.permute.xlu0 %996 }
 0x207   : > { %1129 = vrot.lane.b32.xlu1 %v1416_v31, %s7370_s20  ;;  %6542 = vmatpush3.bf16.msra.mxu1 %v6994_v25  ;;  %v903_v31 = vpack.c.bf16 %v875_v33, %v874_v26  ;;  %v765_v25 = vmax.f32 %v663_v29, 0.0  ;;  %v666_v23 = vadd.f32 %v8068_v8, %v665_v44  ;;  %v1514_v26 = vld [vmem:[#allocation2 + $0x48] sm:$0xff]  ;;  %v1126_v19 = vpop.permute.xlu1 %1125  ;;  %1045 = vst.msk [vmem:[#allocation3] sm:$0xff] %vm1044_vm8, %v997_v16 }
 0x208   : > { %6775 = vmatprep.subr.bf16.mxu1 %v7964_v6  ;;  %846 = vst.msk [vmem:[#allocation2 + $0x91] sm:$0xff] %vm789_vm5, %v767_v12  ;;  %v768_v6 = vmax.f32 %v674_v54, 0.0  ;;  %v1840_v40 = vld [vmem:[#allocation3 + $0x40] sm:$0xff] }
 0x209   : > { %919 = vst.msk [vmem:[#allocation3 + $0x48] sm:$0xff] %vm789_vm5, %v903_v31  ;;  %844 = vst.msk [vmem:[#allocation2 + $0x79] sm:$0xff] %vm789_vm5, %v765_v25  ;;  %v766_v33 = vmax.f32 %v666_v23, 0.0 }
 0x20a   : > { %1708 = vrot.lane.b32.xlu0 %v8112_v14, %s7371_s13  ;;  %v1837_v28 = vld [vmem:[#allocation3 + $0x28] sm:$0xff]  ;;  %847 = vst.msk [vmem:[#allocation2 + $0x99] sm:$0xff] %vm789_vm5, %v768_v6 }
 0x20b   : > { %1254 = vrot.lane.b32.xlu1 %v8086_v9, %s7371_s13  ;;  %6716 = vmatmul.mubr.msk.bf16.vlgmr.msra.gmra.mrb[32].mxu0 %vm789_vm5, %v1837_v28  ;;  %845 = vst.msk [vmem:[#allocation2 + $0x81] sm:$0xff] %vm789_vm5, %v766_v33  ;;  %v1545_v9 = vpack.c.bf16 %v1515_v49, %v1514_v26 }
 0x20c   : > { %6719 = vmatprep.mubr.msk.bf16.mxu0 %vm789_vm5, %v1840_v40  ;;  %1174 = vst.msk [vmem:[#allocation3] sm:$0xff] %vm1173_vm9, %v1126_v19  ;;  %v6693_v19 = vpop.f32.mrb[12].mxu0 }
 0x20e   : > { %1453 = vrot.lane.b32.xlu0 %v8108_v18, %s7369_s16 }
 0x20f   : > { %998 = vrot.lane.b32.xlu1 %v8088_v3, %s7369_s16  ;;  %v1648_v31 = vld [vmem:[#allocation2 + $0x91] sm:$0xff] }
 0x210   : > { %v880_v58 = vld [vmem:[#allocation2 + $0x90] sm:$0xff]  ;;  %v1327_v12 = vld [vmem:[#allocation2 + $0x79] sm:$0xff] }
 0x211   : > { %v1776_v3 = vld [vmem:[#allocation2 + $0x92] sm:$0xff]  ;;  %v1777_v29 = vld [vmem:[#allocation2 + $0x9a] sm:$0xff] }
 0x212   : > { %1578 = vrot.lane.b32.xlu0 %v1545_v9, %s7370_s20  ;;  %v8154_v54 = vpack.c.bf16 %v1777_v29, %v1776_v3  ;;  %v1774_v44 = vld [vmem:[#allocation2 + $0x7a] sm:$0xff]  ;;  %v1520_v6 = vld [vmem:[#allocation2 + $0x90] sm:$0xff] }
 0x213   : > { %1127 = vrot.lane.b32.xlu1 %v8102_v4, %s7370_s20  ;;  %v1775_v4 = vld [vmem:[#allocation2 + $0x82] sm:$0xff]  ;;  %v1649_v25 = vld [vmem:[#allocation2 + $0x99] sm:$0xff] }
 0x214   : > { %v8157_v23 = vpack.c.bf16 %v1775_v4, %v1774_v44  ;;  %v1521_v40 = vld [vmem:[#allocation2 + $0x98] sm:$0xff]  ;;  %v8159_v26 = vpack.c.bf16 %v1649_v25, %v1648_v31  ;;  %v1328_v49 = vld [vmem:[#allocation2 + $0x81] sm:$0xff]  ;;  %1820 = vst.msk [vmem:[#allocation3 + $0x70] sm:$0xff] %vm789_vm5, %v8154_v54 }
 0x215   : > { %v881_v33 = vld [vmem:[#allocation2 + $0x98] sm:$0xff]  ;;  %v879_v16 = vld [vmem:[#allocation2 + $0x80] sm:$0xff]  ;;  %v1548_v29 = vpack.c.bf16 %v1521_v40, %v1520_v6 }
 0x216   : > { %1706 = vrot.lane.b32.xlu0 %v8118_v63, %s7371_s13  ;;  %v878_v28 = vld [vmem:[#allocation2 + $0x78] sm:$0xff]  ;;  %1819 = vst.msk [vmem:[#allocation3 + $0x58] sm:$0xff] %vm789_vm5, %v8157_v23  ;;  %1372 = vst.msk [vmem:[#allocation3 + $0x80] sm:$0xff] %vm789_vm5, %v8159_v26  ;;  %v906_v31 = vpack.c.bf16 %v881_v33, %v880_v58 }
 0x217   : > { %1260 = vrot.lane.b32.xlu1 %v1546_v2, %s7371_s13  ;;  %v1355_v2 = vpack.c.bf16 %v1328_v49, %v1327_v12  ;;  %v905_v3 = vpack.c.bf16 %v879_v16, %v878_v28  ;;  %v678_v12 = vpop.f32.mrb[13].mxu0  ;;  %v1518_v16 = vld [vmem:[#allocation2 + $0x78] sm:$0xff] }
 0x218   : > { %922 = vst.msk [vmem:[#allocation3 + $0x90] sm:$0xff] %vm789_vm5, %v906_v31  ;;  %v679_v58 = vadd.f32 %v8068_v8, %v678_v12  ;;  %v6694_v4 = vpop.f32.mrb[14].mxu0  ;;  %v1519_v31 = vld [vmem:[#allocation2 + $0x80] sm:$0xff] }
 0x219   : > { %1371 = vst.msk [vmem:[#allocation3 + $0x68] sm:$0xff] %vm789_vm5, %v1355_v2  ;;  %921 = vst.msk [vmem:[#allocation3 + $0x78] sm:$0xff] %vm789_vm5, %v905_v3  ;;  %v690_v6 = vadd.f32 %v6694_v4, %v8068_v8  ;;  %v681_v40 = vpop.f32.mrb[15].mxu0  ;;  %v1646_v3 = vld [vmem:[#allocation2 + $0x79] sm:$0xff] }
 0x21a   : > { %1451 = vrot.lane.b32.xlu0 %v8110_v1, %s7369_s16  ;;  %v769_v2 = vmax.f32 %v679_v58, 0.0 }
 0x21b   : > { %1004 = vrot.lane.b32.xlu1 %v8112_v14, %s7369_s16  ;;  %v687_v14 = vadd.f32 %v6693_v19, %v8068_v8  ;;  %v1846_v44 = vld [vmem:[#allocation3 + $0x70] sm:$0xff]  ;;  %v772_v33 = vmax.f32 %v690_v6, 0.0 }
 0x21c   : > { %848 = vst.msk [vmem:[#allocation2 + $0xa9] sm:$0xff] %vm789_vm5, %v769_v2  ;;  %v1647_v19 = vld [vmem:[#allocation2 + $0x81] sm:$0xff] }
 0x21d   : > { %v1843_v25 = vld [vmem:[#allocation3 + $0x58] sm:$0xff]  ;;  %v771_v49 = vmax.f32 %v687_v14, 0.0  ;;  %851 = vst.msk [vmem:[#allocation2 + $0xc9] sm:$0xff] %vm789_vm5, %v772_v33  ;;  %v1675_v14 = vpack.c.bf16 %v1647_v19, %v1646_v3 }
 0x21e   : > { %1584 = vrot.lane.b32.xlu0 %v1548_v29, %s7370_s20  ;;  %6720 = vmatmul.mubr.msk.bf16.gmra.mrb[36].mxu0 %vm789_vm5, %v1843_v25 }
 0x21f   : > { %1133 = vrot.lane.b32.xlu1 %v8108_v18, %s7370_s20  ;;  %v682_v18 = vadd.f32 %v8068_v8, %v681_v40  ;;  %6723 = vmatprep.mubr.msk.bf16.mxu0 %vm789_vm5, %v1846_v44  ;;  %850 = vst.msk [vmem:[#allocation2 + $0xc1] sm:$0xff] %vm789_vm5, %v771_v49 }
 0x221   : > { %v770_v28 = vmax.f32 %v682_v18, 0.0 }
 0x222   : > { %1712 = vrot.lane.b32.xlu0 %v8159_v26, %s7371_s13 }
 0x223   : > { %1258 = vrot.lane.b32.xlu1 %v1545_v9, %s7371_s13  ;;  %849 = vst.msk [vmem:[#allocation2 + $0xb1] sm:$0xff] %vm789_vm5, %v770_v28  ;;  %v1547_v9 = vpack.c.bf16 %v1519_v31, %v1518_v16  ;;  %v1331_v6 = vld [vmem:[#allocation2 + $0xa9] sm:$0xff] }
 0x224   : > { %v1781_v44 = vld [vmem:[#allocation2 + $0xca] sm:$0xff] }
 0x225   : > { %v1334_v2 = vld [vmem:[#allocation2 + $0xc9] sm:$0xff] }
 0x226   : > { %1457 = vrot.lane.b32.xlu0 %v8154_v54, %s7369_s16  ;;  %v1780_v12 = vld [vmem:[#allocation2 + $0xc2] sm:$0xff] }
 0x227   : > { %1002 = vrot.lane.b32.xlu1 %v8118_v63, %s7369_s16  ;;  %v1333_v58 = vld [vmem:[#allocation2 + $0xc1] sm:$0xff]  ;;  %v8197_v4 = vpack.c.bf16 %v1781_v44, %v1780_v12 }
 0x228   : > { %v1524_v40 = vld [vmem:[#allocation2 + $0xc0] sm:$0xff]  ;;  %v1358_v33 = vpack.c.bf16 %v1334_v2, %v1333_v58  ;;  %v885_v31 = vld [vmem:[#allocation2 + $0xc8] sm:$0xff] }
 0x229   : > { %1822 = vst.msk [vmem:[#allocation3 + $0xa0] sm:$0xff] %vm789_vm5, %v8197_v4  ;;  %v884_v16 = vld [vmem:[#allocation2 + $0xc0] sm:$0xff]  ;;  %v882_v3 = vld [vmem:[#allocation2 + $0xa8] sm:$0xff] }
 0x22a   : > { %1582 = vrot.lane.b32.xlu0 %v1547_v9, %s7370_s20  ;;  %v1778_v25 = vld [vmem:[#allocation2 + $0xaa] sm:$0xff]  ;;  %v1779_v49 = vld [vmem:[#allocation2 + $0xb2] sm:$0xff]  ;;  %v908_v19 = vpack.c.bf16 %v885_v31, %v884_v16  ;;  %1374 = vst.msk [vmem:[#allocation3 + $0xb0] sm:$0xff] %vm789_vm5, %v1358_v33  ;;  %v1652_v58 = vld [vmem:[#allocation2 + $0xc1] sm:$0xff] }
 0x22b   : > { %1131 = vrot.lane.b32.xlu1 %v8110_v1, %s7370_s20  ;;  %v8200_v63 = vpack.c.bf16 %v1779_v49, %v1778_v25  ;;  %v1525_v1 = vld [vmem:[#allocation2 + $0xc8] sm:$0xff]  ;;  %v1332_v18 = vld [vmem:[#allocation2 + $0xb1] sm:$0xff]  ;;  %v6697_v49 = vpop.f32.mrb[16].mxu0 }
 0x22c   : > { %v1357_v28 = vpack.c.bf16 %v1332_v18, %v1331_v6  ;;  %v1550_v44 = vpack.c.bf16 %v1525_v1, %v1524_v40  ;;  %924 = vst.msk [vmem:[#allocation3 + $0xc0] sm:$0xff] %vm789_vm5, %v908_v19  ;;  %v1653_v25 = vld [vmem:[#allocation2 + $0xc9] sm:$0xff]  ;;  %v694_v2 = vpop.f32.mrb[17].mxu0 }
 0x22d   : > { %1821 = vst.msk [vmem:[#allocation3 + $0x88] sm:$0xff] %vm789_vm5, %v8200_v63  ;;  %v1678_v33 = vpack.c.bf16 %v1653_v25, %v1652_v58  ;;  %v695_v40 = vadd.f32 %v8068_v8, %v694_v2  ;;  %v6698_v1 = vpop.f32.mrb[18].mxu0  ;;  %v1523_v58 = vld [vmem:[#allocation2 + $0xb0] sm:$0xff] }
 0x22e   : > { %1710 = vrot.lane.b32.xlu0 %v1675_v14, %s7371_s13  ;;  %1373 = vst.msk [vmem:[#allocation3 + $0x98] sm:$0xff] %vm789_vm5, %v1357_v28  ;;  %v706_v16 = vadd.f32 %v6698_v1, %v8068_v8  ;;  %v697_v31 = vpop.f32.mrb[19].mxu0 }
 0x22f   : > { %1264 = vrot.lane.b32.xlu1 %v1548_v29, %s7371_s13  ;;  %v883_v29 = vld [vmem:[#allocation2 + $0xb0] sm:$0xff] }
 0x230   : > { %v907_v12 = vpack.c.bf16 %v883_v29, %v882_v3  ;;  %v1852_v6 = vld [vmem:[#allocation3 + $0xa0] sm:$0xff]  ;;  %v698_v3 = vadd.f32 %v8068_v8, %v697_v31  ;;  %v776_v19 = vmax.f32 %v706_v16, 0.0 }
 0x232   : > { %1455 = vrot.lane.b32.xlu0 %v8157_v23, %s7369_s16  ;;  %923 = vst.msk [vmem:[#allocation3 + $0xa8] sm:$0xff] %vm789_vm5, %v907_v12  ;;  %v774_v29 = vmax.f32 %v698_v3, 0.0  ;;  %v1522_v12 = vld [vmem:[#allocation2 + $0xa8] sm:$0xff]  ;;  %855 = vst.msk [vmem:[#allocation2 + $0xf9] sm:$0xff] %vm789_vm5, %v776_v19 }
 0x233   : > { %1008 = vrot.lane.b32.xlu1 %v8159_v26, %s7369_s16  ;;  %v703_v26 = vadd.f32 %v6697_v49, %v8068_v8  ;;  %v1549_v25 = vpack.c.bf16 %v1523_v58, %v1522_v12  ;;  %v1650_v49 = vld [vmem:[#allocation2 + $0xa9] sm:$0xff]  ;;  %v6701_v12 = vpop.f32.mrb[20].mxu0 }
 0x234   : > { %v1849_v18 = vld [vmem:[#allocation3 + $0x88] sm:$0xff]  ;;  %853 = vst.msk [vmem:[#allocation2 + $0xe1] sm:$0xff] %vm789_vm5, %v774_v29 }
 0x235   : > { %6724 = vmatmul.mubr.msk.bf16.gmra.mrb[40].mxu0 %vm789_vm5, %v1849_v18  ;;  %v775_v28 = vmax.f32 %v703_v26, 0.0 }
 0x236   : > { %1588 = vrot.lane.b32.xlu0 %v1550_v44, %s7370_s20  ;;  %6727 = vmatprep.mubr.msk.bf16.mxu0 %vm789_vm5, %v1852_v6 }
 0x237   : > { %1137 = vrot.lane.b32.xlu1 %v8154_v54, %s7370_s20  ;;  %v773_v54 = vmax.f32 %v695_v40, 0.0  ;;  %854 = vst.msk [vmem:[#allocation2 + $0xf1] sm:$0xff] %vm789_vm5, %v775_v28 }
 0x239   : > { %852 = vst.msk [vmem:[#allocation2 + $0xd9] sm:$0xff] %vm789_vm5, %v773_v54  ;;  %v1785_v1 = vld [vmem:[#allocation2 + $0xfa] sm:$0xff] }
 0x23a   : > { %1716 = vrot.lane.b32.xlu0 %v1678_v33, %s7371_s13  ;;  %v1657_v54 = vld [vmem:[#allocation2 + $0xf9] sm:$0xff] }
 0x23b   : > { %1262 = vrot.lane.b32.xlu1 %v1547_v9, %s7371_s13  ;;  %v1651_v9 = vld [vmem:[#allocation2 + $0xb1] sm:$0xff]  ;;  %v1655_v19 = vld [vmem:[#allocation2 + $0xe1] sm:$0xff] }
 0x23c   : > { %v8236_v6 = vpack.c.bf16 %v1651_v9, %v1650_v49 }
 0x23e   : > { %1461 = vrot.lane.b32.xlu0 %v8197_v4, %s7369_s16  ;;  %v1656_v26 = vld [vmem:[#allocation2 + $0xf1] sm:$0xff] }
 0x23f   : > { %1006 = vrot.lane.b32.xlu1 %v1675_v14, %s7369_s16  ;;  %v888_v18 = vld [vmem:[#allocation2 + $0xf0] sm:$0xff]  ;;  %v1783_v14 = vld [vmem:[#allocation2 + $0xe2] sm:$0xff]  ;;  %v889_v29 = vld [vmem:[#allocation2 + $0xf8] sm:$0xff] }
 0x240   : > { %v1654_v2 = vld [vmem:[#allocation2 + $0xd9] sm:$0xff]  ;;  %v910_v49 = vpack.c.bf16 %v889_v29, %v888_v18 }
 0x241   : > { %v1784_v40 = vld [vmem:[#allocation2 + $0xf2] sm:$0xff]  ;;  %v1782_v31 = vld [vmem:[#allocation2 + $0xda] sm:$0xff]  ;;  %v8249_v58 = vpack.c.bf16 %v1655_v19, %v1654_v2 }
 0x242   : > { %1586 = vrot.lane.b32.xlu0 %v1549_v25, %s7370_s20  ;;  %v886_v28 = vld [vmem:[#allocation2 + $0xd8] sm:$0xff]  ;;  %v8238_v16 = vpack.c.bf16 %v1785_v1, %v1784_v40  ;;  %v8242_v3 = vpack.c.bf16 %v1783_v14, %v1782_v31  ;;  %v887_v9 = vld [vmem:[#allocation2 + $0xe0] sm:$0xff]  ;;  %v1528_v40 = vld [vmem:[#allocation2 + $0xf0] sm:$0xff]  ;;  %v719_v31 = vadd.f32 %v6701_v12, %v8068_v8  ;;  %926 = vst.msk [vmem:[#allocation3 + $0xf0] sm:$0xff] %vm789_vm5, %v910_v49 }
 0x243   : > { %1135 = vrot.lane.b32.xlu1 %v8157_v23, %s7370_s20  ;;  %v8245_v23 = vpack.c.bf16 %v1657_v54, %v1656_v26  ;;  %v1529_v1 = vld [vmem:[#allocation2 + $0xf8] sm:$0xff]  ;;  %v909_v26 = vpack.c.bf16 %v887_v9, %v886_v28  ;;  %1375 = vst.msk [vmem:[#allocation3 + $0xc8] sm:$0xff] %vm789_vm5, %v8249_v58 }
 0x244   : > { %1824 = vst.msk [vmem:[#allocation3 + $0xd0] sm:$0xff] %vm789_vm5, %v8238_v16  ;;  %1823 = vst.msk [vmem:[#allocation3 + $0xb8] sm:$0xff] %vm789_vm5, %v8242_v3  ;;  %v779_v18 = vmax.f32 %v719_v31, 0.0  ;;  %v1552_v28 = vpack.c.bf16 %v1529_v1, %v1528_v40  ;;  %v1526_v40 = vld [vmem:[#allocation2 + $0xd8] sm:$0xff]  ;;  %v1527_v1 = vld [vmem:[#allocation2 + $0xe0] sm:$0xff] }
 0x245   : > { %1376 = vst.msk [vmem:[#allocation3 + $0xe0] sm:$0xff] %vm789_vm5, %v8245_v23  ;;  %925 = vst.msk [vmem:[#allocation3 + $0xd8] sm:$0xff] %vm789_vm5, %v909_v26 }
 0x246   : > { %1714 = vrot.lane.b32.xlu0 %v8236_v6, %s7371_s13  ;;  %858 = vst.msk [vmem:[#allocation2 + $0x121] sm:$0xff] %vm789_vm5, %v779_v18 }
 0x247   : > { %1268 = vrot.lane.b32.xlu1 %v1550_v44, %s7371_s13  ;;  %v710_v44 = vpop.f32.mrb[21].mxu0 }
 0x248   : > { %v711_v2 = vadd.f32 %v8068_v8, %v710_v44  ;;  %v6702_v14 = vpop.f32.mrb[22].mxu0 }
 0x249   : > { %v722_v54 = vadd.f32 %v6702_v14, %v8068_v8  ;;  %v713_v19 = vpop.f32.mrb[23].mxu0 }
 0x24a   : > { %1459 = vrot.lane.b32.xlu0 %v8200_v63, %s7369_s16  ;;  %v777_v29 = vmax.f32 %v711_v2, 0.0  ;;  %v714_v12 = vadd.f32 %v8068_v8, %v713_v19 }
 0x24b   : > { %1012 = vrot.lane.b32.xlu1 %v1678_v33, %s7369_s16  ;;  %v780_v9 = vmax.f32 %v722_v54, 0.0  ;;  %v1858_v33 = vld [vmem:[#allocation3 + $0xd0] sm:$0xff]  ;;  %v1855_v31 = vld [vmem:[#allocation3 + $0xb8] sm:$0xff] }
 0x24c   : > { %856 = vst.msk [vmem:[#allocation2 + $0x109] sm:$0xff] %vm789_vm5, %v777_v29  ;;  %v778_v49 = vmax.f32 %v714_v12, 0.0  ;;  %6728 = vmatmul.mubr.msk.bf16.gmra.mrb[44].mxu0 %vm789_vm5, %v1855_v31 }
 0x24d   : > { %859 = vst.msk [vmem:[#allocation2 + $0x129] sm:$0xff] %vm789_vm5, %v780_v9  ;;  %6731 = vmatprep.mubr.msk.bf16.mxu0 %vm789_vm5, %v1858_v33  ;;  %v1660_v44 = vld [vmem:[#allocation2 + $0x121] sm:$0xff]  ;;  %v8286_v9 = vpack.c.bf16 %v1527_v1, %v1526_v40 }
 0x24e   : > { %1592 = vrot.lane.b32.xlu0 %v1552_v28, %s7370_s20  ;;  %857 = vst.msk [vmem:[#allocation2 + $0x111] sm:$0xff] %vm789_vm5, %v778_v49 }
 0x24f   : > { %1141 = vrot.lane.b32.xlu1 %v8197_v4, %s7370_s20  ;;  %v892_v4 = vld [vmem:[#allocation2 + $0x120] sm:$0xff] }
 0x252   : > { %1720 = vrot.lane.b32.xlu0 %v8245_v23, %s7371_s13 }
 0x253   : > { %1266 = vrot.lane.b32.xlu1 %v1549_v25, %s7371_s13  ;;  %v1530_v26 = vld [vmem:[#allocation2 + $0x108] sm:$0xff] }
 0x254   : > { %v1788_v2 = vld [vmem:[#allocation2 + $0x122] sm:$0xff]  ;;  %v1789_v14 = vld [vmem:[#allocation2 + $0x12a] sm:$0xff] }
 0x255   : > { %v1658_v18 = vld [vmem:[#allocation2 + $0x109] sm:$0xff]  ;;  %v8280_v54 = vpack.c.bf16 %v1789_v14, %v1788_v2  ;;  %v1787_v29 = vld [vmem:[#allocation2 + $0x112] sm:$0xff] }
 0x256   : > { %1465 = vrot.lane.b32.xlu0 %v8238_v16, %s7369_s16  ;;  %v1786_v19 = vld [vmem:[#allocation2 + $0x10a] sm:$0xff] }
 0x257   : > { %1010 = vrot.lane.b32.xlu1 %v8236_v6, %s7369_s16  ;;  %v1661_v12 = vld [vmem:[#allocation2 + $0x129] sm:$0xff]  ;;  %v8284_v25 = vpack.c.bf16 %v1787_v29, %v1786_v19  ;;  %v1659_v31 = vld [vmem:[#allocation2 + $0x111] sm:$0xff]  ;;  %1826 = vst.msk [vmem:[#allocation3 + $0x100] sm:$0xff] %vm789_vm5, %v8280_v54  ;;  %v6705_v6 = vpop.f32.mrb[24].mxu0 }
 0x258   : > { %v8288_v49 = vpack.c.bf16 %v1661_v12, %v1660_v44  ;;  %v1531_v33 = vld [vmem:[#allocation2 + $0x110] sm:$0xff]  ;;  %v893_v17 = vld [vmem:[#allocation2 + $0x128] sm:$0xff]  ;;  %v8294_v14 = vpack.c.bf16 %v1659_v31, %v1658_v18  ;;  %v735_v40 = vadd.f32 %v6705_v6, %v8068_v8  ;;  %v726_v1 = vpop.f32.mrb[25].mxu0 }
 0x259   : > { %v8292_v2 = vpack.c.bf16 %v1531_v33, %v1530_v26  ;;  %v912_v36 = vpack.c.bf16 %v893_v17, %v892_v4  ;;  %1825 = vst.msk [vmem:[#allocation3 + $0xe8] sm:$0xff] %vm789_vm5, %v8284_v25  ;;  %v727_v17 = vadd.f32 %v8068_v8, %v726_v1  ;;  %v6706_v44 = vpop.f32.mrb[26].mxu0  ;;  %v1532_v33 = vld [vmem:[#allocation2 + $0x120] sm:$0xff]  ;;  %v1533_v31 = vld [vmem:[#allocation2 + $0x128] sm:$0xff] }
 0x25a   : > { %1590 = vrot.lane.b32.xlu0 %v8286_v9, %s7370_s20  ;;  %1378 = vst.msk [vmem:[#allocation3 + $0x110] sm:$0xff] %vm789_vm5, %v8288_v49  ;;  %1377 = vst.msk [vmem:[#allocation3 + $0xf8] sm:$0xff] %vm789_vm5, %v8294_v14  ;;  %v783_v26 = vmax.f32 %v735_v40, 0.0  ;;  %v738_v4 = vadd.f32 %v6706_v44, %v8068_v8  ;;  %v729_v18 = vpop.f32.mrb[27].mxu0 }
 0x25b   : > { %1139 = vrot.lane.b32.xlu1 %v8200_v63, %s7370_s20  ;;  %928 = vst.msk [vmem:[#allocation3 + $0x120] sm:$0xff] %vm789_vm5, %v912_v36  ;;  %927 = vst.msk [vmem:[#allocation3 + $0x108] sm:$0xff] %vm789_vm5, %v8292_v2  ;;  %v781_v63 = vmax.f32 %v727_v17, 0.0  ;;  %v730_v19 = vadd.f32 %v8068_v8, %v729_v18 }
 0x25c   : > { %862 = vst.msk [vmem:[#allocation2 + $0x151] sm:$0xff] %vm789_vm5, %v783_v26  ;;  %v784_v36 = vmax.f32 %v738_v4, 0.0 }
 0x25d   : > { %860 = vst.msk [vmem:[#allocation2 + $0x139] sm:$0xff] %vm789_vm5, %v781_v63  ;;  %v782_v29 = vmax.f32 %v730_v19, 0.0 }
 0x25e   : > { %1718 = vrot.lane.b32.xlu0 %v8249_v58, %s7371_s13  ;;  %v1864_v12 = vld [vmem:[#allocation3 + $0x100] sm:$0xff]  ;;  %863 = vst.msk [vmem:[#allocation2 + $0x159] sm:$0xff] %vm789_vm5, %v784_v36 }
 0x25f   : > { %1272 = vrot.lane.b32.xlu1 %v1552_v28, %s7371_s13  ;;  %861 = vst.msk [vmem:[#allocation2 + $0x141] sm:$0xff] %vm789_vm5, %v782_v29  ;;  %v8326_v28 = vpack.c.bf16 %v1533_v31, %v1532_v33 }
 0x260   : > { %v1861_v6 = vld [vmem:[#allocation3 + $0xe8] sm:$0xff] }
 0x261   : > { %6732 = vmatmul.mubr.msk.bf16.gmra.mrb[48].mxu0 %vm789_vm5, %v1861_v6  ;;  %v6709_v6 = vpop.f32.mrb[28].mxu0 }
 0x262   : > { %1463 = vrot.lane.b32.xlu0 %v8242_v3, %s7369_s16  ;;  %6735 = vmatprep.mubr.msk.bf16.mxu0 %vm789_vm5, %v1864_v12 }
 0x263   : > { %1016 = vrot.lane.b32.xlu1 %v8245_v23, %s7369_s16  ;;  %v1536_v40 = vld [vmem:[#allocation2 + $0x150] sm:$0xff] }
 0x264   : > { %v1664_v1 = vld [vmem:[#allocation2 + $0x151] sm:$0xff]  ;;  %v1662_v44 = vld [vmem:[#allocation2 + $0x139] sm:$0xff] }
 0x265   : > { %v1534_v17 = vld [vmem:[#allocation2 + $0x138] sm:$0xff] }
 0x266   : > { %1596 = vrot.lane.b32.xlu0 %v8326_v28, %s7370_s20  ;;  %v1792_v26 = vld [vmem:[#allocation2 + $0x152] sm:$0xff]  ;;  %v1793_v4 = vld [vmem:[#allocation2 + $0x15a] sm:$0xff]  ;;  %v1791_v19 = vld [vmem:[#allocation2 + $0x142] sm:$0xff] }
 0x267   : > { %1145 = vrot.lane.b32.xlu1 %v8238_v16, %s7370_s20  ;;  %v1537_v18 = vld [vmem:[#allocation2 + $0x158] sm:$0xff]  ;;  %v8332_v63 = vpack.c.bf16 %v1793_v4, %v1792_v26  ;;  %v1535_v16 = vld [vmem:[#allocation2 + $0x140] sm:$0xff] }
 0x268   : > { %v1790_v23 = vld [vmem:[#allocation2 + $0x13a] sm:$0xff]  ;;  %v8334_v36 = vpack.c.bf16 %v1537_v18, %v1536_v40  ;;  %v8346_v26 = vpack.c.bf16 %v1535_v16, %v1534_v17  ;;  %v751_v18 = vadd.f32 %v6709_v6, %v8068_v8 }
 0x269   : > { %v1665_v29 = vld [vmem:[#allocation2 + $0x159] sm:$0xff]  ;;  %v8336_v12 = vpack.c.bf16 %v1791_v19, %v1790_v23  ;;  %v1663_v31 = vld [vmem:[#allocation2 + $0x141] sm:$0xff]  ;;  %1828 = vst.msk [vmem:[#allocation3 + $0x130] sm:$0xff] %vm789_vm5, %v8332_v63  ;;  %v742_v23 = vpop.f32.mrb[29].mxu0 }
 0x26a   : > { %1724 = vrot.lane.b32.xlu0 %v8288_v49, %s7371_s13  ;;  %v8340_v33 = vpack.c.bf16 %v1665_v29, %v1664_v1  ;;  %v8348_v40 = vpack.c.bf16 %v1663_v31, %v1662_v44  ;;  %930 = vst.msk [vmem:[#allocation3 + $0x150] sm:$0xff] %vm789_vm5, %v8334_v36  ;;  %929 = vst.msk [vmem:[#allocation3 + $0x138] sm:$0xff] %vm789_vm5, %v8346_v26  ;;  %v743_v17 = vadd.f32 %v8068_v8, %v742_v23  ;;  %v6710_v44 = vpop.f32.mrb[30].mxu0 }
 0x26b   : > { %1270 = vrot.lane.b32.xlu1 %v8286_v9, %s7371_s13  ;;  %1827 = vst.msk [vmem:[#allocation3 + $0x118] sm:$0xff] %vm789_vm5, %v8336_v12  ;;  %v787_v9 = vmax.f32 %v751_v18, 0.0  ;;  %v754_v19 = vadd.f32 %v6710_v44, %v8068_v8  ;;  %v745_v29 = vpop.f32.mrb[31].mxu0 }
 0x26c   : > { %v1705_v1 = vpop.permute.xlu0 %1704  ;;  %1380 = vst.msk [vmem:[#allocation3 + $0x140] sm:$0xff] %vm789_vm5, %v8340_v33  ;;  %1379 = vst.msk [vmem:[#allocation3 + $0x128] sm:$0xff] %vm789_vm5, %v8348_v40  ;;  %v785_v6 = vmax.f32 %v743_v17, 0.0  ;;  %v746_v62 = vadd.f32 %v8068_v8, %v745_v29 }
 0x26d   : > { %v1577_v4 = vpop.permute.xlu1 %1576  ;;  %866 = vst.msk [vmem:[#allocation2 + $0x181] sm:$0xff] %vm789_vm5, %v787_v9  ;;  %v788_v18 = vmax.f32 %v754_v19, 0.0 }
 0x26e   : > { %1469 = vrot.lane.b32.xlu0 %v8280_v54, %s7369_s16  ;;  %864 = vst.msk [vmem:[#allocation2 + $0x169] sm:$0xff] %vm789_vm5, %v785_v6 }
 0x26f   : > { %1014 = vrot.lane.b32.xlu1 %v8249_v58, %s7369_s16  ;;  %v786_v58 = vmax.f32 %v746_v62, 0.0  ;;  %867 = vst.msk [vmem:[#allocation2 + $0x189] sm:$0xff] %vm789_vm5, %v788_v18 }
 0x270   : > { %v1450_v16 = vpop.permute.xlu0 %1449  ;;  %v1870_v23 = vld [vmem:[#allocation3 + $0x130] sm:$0xff] }
 0x271   : > { %v8367_v31 = vpop.permute.xlu1 %1256  ;;  %1496 = vst.msk [vmem:[#allocation3 + $0x20] sm:$0xff] %vm1044_vm8, %v1450_v16 }
 0x272   : > { %1594 = vrot.lane.b32.xlu0 %v8292_v2, %s7370_s20  ;;  %v1867_v44 = vld [vmem:[#allocation3 + $0x118] sm:$0xff]  ;;  %865 = vst.msk [vmem:[#allocation2 + $0x171] sm:$0xff] %vm789_vm5, %v786_v58 }
 0x273   : > { %1143 = vrot.lane.b32.xlu1 %v8242_v3, %s7370_s20  ;;  %6736 = vmatmul.mubr.msk.bf16.gmra.mrb[52].mxu0 %vm789_vm5, %v1867_v44 }
 0x274   : > { %v1448_v17 = vpop.permute.xlu0 %1447  ;;  %6739 = vmatprep.mubr.msk.bf16.mxu0 %vm789_vm5, %v1870_v23  ;;  %v1668_v3 = vld [vmem:[#allocation2 + $0x181] sm:$0xff] }
 0x275   : > { %v1001_v9 = vpop.permute.xlu1 %1000  ;;  %1495 = vst.msk [vmem:[#allocation3 + $0x8] sm:$0xff] %vm1044_vm8, %v1448_v17  ;;  %v1538_v19 = vld [vmem:[#allocation2 + $0x168] sm:$0xff] }
 0x276   : > { %1047 = vst.msk [vmem:[#allocation3 + $0x30] sm:$0xff] %vm1044_vm8, %v1001_v9  ;;  %1722 = vrot.lane.b32.xlu0 %v8294_v14, %s7371_s13  ;;  %v1796_v29 = vld [vmem:[#allocation2 + $0x182] sm:$0xff] }
 0x277   : > { %1624 = vst.msk [vmem:[#allocation3 + $0x8] sm:$0xff] %vm1173_vm9, %v1577_v4  ;;  %1276 = vrot.lane.b32.xlu1 %v8326_v28, %s7371_s13  ;;  %v1669_v16 = vld [vmem:[#allocation2 + $0x189] sm:$0xff] }
 0x278   : > { %1752 = vst.msk [vmem:[#allocation3 + $0x8] sm:$0xff] %vm1302_vm10, %v1705_v1  ;;  %v1581_v8 = vpop.permute.xlu0 %1580  ;;  %v1666_v4 = vld [vmem:[#allocation2 + $0x169] sm:$0xff]  ;;  %v8394_v18 = vpack.c.bf16 %v1669_v16, %v1668_v3 }
 0x279   : > { %v1130_v62 = vpop.permute.xlu1 %1129  ;;  %v1794_v6 = vld [vmem:[#allocation2 + $0x16a] sm:$0xff]  ;;  %v1795_v1 = vld [vmem:[#allocation2 + $0x172] sm:$0xff] }
 0x27a   : > { %1176 = vst.msk [vmem:[#allocation3 + $0x30] sm:$0xff] %vm1173_vm9, %v1130_v62  ;;  %1467 = vrot.lane.b32.xlu0 %v8284_v25, %s7369_s16  ;;  %v1539_v28 = vld [vmem:[#allocation2 + $0x170] sm:$0xff]  ;;  %v8396_v44 = vpack.c.bf16 %v1795_v1, %v1794_v6 }
 0x27b   : > { %1020 = vrot.lane.b32.xlu1 %v8288_v49, %s7369_s16  ;;  %v8398_v9 = vpack.c.bf16 %v1539_v28, %v1538_v19  ;;  %v1667_v17 = vld [vmem:[#allocation2 + $0x171] sm:$0xff]  ;;  %1382 = vst.msk [vmem:[#allocation3 + $0x170] sm:$0xff] %vm789_vm5, %v8394_v18  ;;  %v7002_v28 = vld [vmem:[#allocation10 + $0x88] sm:$0xff]  }
 0x27c   : > { %v1709_v58 = vpop.permute.xlu0 %1708  ;;  %v1414_v62 = vld [vmem:[#allocation2 + $0x18a] sm:$0xff]  ;;  %v8401_v20 = vpack.c.bf16 %v1667_v17, %v1666_v4  ;;  %1829 = vst.msk [vmem:[#allocation3 + $0x148] sm:$0xff] %vm789_vm5, %v8396_v44 }
 0x27d   : > { %v1255_v23 = vpop.permute.xlu1 %1254  ;;  %v8403_v41 = vpack.c.bf16 %v1414_v62, %v1796_v29  ;;  %931 = vst.msk [vmem:[#allocation3 + $0x168] sm:$0xff] %vm789_vm5, %v8398_v9 }
 0x27e   : > { %1303 = vst.msk [vmem:[#allocation3] sm:$0xff] %vm1302_vm10, %v1255_v23  ;;  %1600 = vrot.lane.b32.xlu0 %v8334_v36, %s7370_s20 }
 0x27f   : > { %v1833_v49 = vld [vmem:[#allocation3 + $0x8] sm:$0xff]  ;;  %1149 = vrot.lane.b32.xlu1 %v8280_v54, %s7370_s20  ;;  %1381 = vst.msk [vmem:[#allocation3 + $0x158] sm:$0xff] %vm789_vm5, %v8401_v20  ;;  %1830 = vst.msk [vmem:[#allocation3 + $0x160] sm:$0xff] %vm789_vm5, %v8403_v41 }
 0x280   : > { %2111 = vmatprep.mubr.bf16.mxu1 %v1833_v49  ;;  %v1454_v3 = vpop.permute.xlu0 %1453  ;;  %v1540_v49 = vld [vmem:[#allocation2 + $0x180] sm:$0xff] }
 0x281   : > { %v999_v19 = vpop.permute.xlu1 %998  ;;  %1498 = vst.msk [vmem:[#allocation3 + $0x50] sm:$0xff] %vm1044_vm8, %v1454_v3  ;;  %v1541_v3 = vld [vmem:[#allocation2 + $0x188] sm:$0xff] }
 0x282   : > { %1046 = vst.msk [vmem:[#allocation3 + $0x18] sm:$0xff] %vm1044_vm8, %v999_v19  ;;  %1728 = vrot.lane.b32.xlu0 %v8340_v33, %s7371_s13 }
 0x283   : > { %1274 = vrot.lane.b32.xlu1 %v8292_v2, %s7371_s13  ;;  %v1873_v4 = vld [vmem:[#allocation3 + $0x148] sm:$0xff] }
 0x284   : > { %v1579_v54 = vpop.permute.xlu0 %1578  ;;  %6740 = vmatmul.mubr.msk.bf16.gmra.mrb[56].mxu0 %vm789_vm5, %v1873_v4  ;;  %v7001_v2 = vld [vmem:[#allocation10 + $0x80] sm:$0xff]  }
 0x285   : > { %v1128_v29 = vpop.permute.xlu1 %1127  ;;  %v1832_v16 = vld [vmem:[#allocation3] sm:$0xff]  ;;  %1625 = vst.msk [vmem:[#allocation3 + $0x20] sm:$0xff] %vm1173_vm9, %v1579_v54 }
 0x286   : > { %1175 = vst.msk [vmem:[#allocation3 + $0x18] sm:$0xff] %vm1173_vm9, %v1128_v29  ;;  %2112 = vmatmul.mubr.bf16.vlgmr.msra.gmra.mrb[0].mxu1 %v1832_v16  ;;  %1473 = vrot.lane.b32.xlu0 %v8332_v63, %s7369_s16 }
 0x287   : > { %1304 = vst.msk [vmem:[#allocation3 + $0x18] sm:$0xff] %vm1302_vm10, %v8367_v31  ;;  %1018 = vrot.lane.b32.xlu1 %v8294_v14, %s7369_s16  ;;  %6777 = vmatpush3.bf16.msra.mxu1 %v7001_v2 }
 0x288   : > { %v1707_v6 = vpop.permute.xlu0 %1706  ;;  %6776 = vmatprep.subr.bf16.mxu1 %v7002_v28 }
 0x289   : > { %v1261_v1 = vpop.permute.xlu1 %1260  ;;  %1753 = vst.msk [vmem:[#allocation3 + $0x20] sm:$0xff] %vm1302_vm10, %v1707_v6  ;;  %v1543_v6 = vld [vmem:[#allocation2 + $0x1a0] sm:$0xff] }
 0x28a   : > { %1598 = vrot.lane.b32.xlu0 %v8346_v26, %s7370_s20 }
 0x28b   : > { %1147 = vrot.lane.b32.xlu1 %v8284_v25, %s7370_s20  ;;  %6778 = vmatpush3.bf16.msra.mxu1 %v7002_v28 }
 0x28c   : > { %v1452_v31 = vpop.permute.xlu0 %1451 }
 0x28d   : > { %v1005_v23 = vpop.permute.xlu1 %1004  ;;  %1497 = vst.msk [vmem:[#allocation3 + $0x38] sm:$0xff] %vm1044_vm8, %v1452_v31 }
 0x28e   : > { %1049 = vst.msk [vmem:[#allocation3 + $0x60] sm:$0xff] %vm1044_vm8, %v1005_v23  ;;  %1726 = vrot.lane.b32.xlu0 %v8348_v40, %s7371_s13  ;;  %v1835_v62 = vld [vmem:[#allocation3 + $0x18] sm:$0xff] }
 0x28f   : > { %1626 = vst.msk [vmem:[#allocation3 + $0x38] sm:$0xff] %vm1173_vm9, %v1581_v8  ;;  %1280 = vrot.lane.b32.xlu1 %v8334_v36, %s7371_s13 }
 0x290   : > { %1754 = vst.msk [vmem:[#allocation3 + $0x38] sm:$0xff] %vm1302_vm10, %v1709_v58  ;;  %v1585_v14 = vpop.permute.xlu0 %1584  ;;  %v1836_v25 = vld [vmem:[#allocation3 + $0x20] sm:$0xff]  ;;  %v8452_v58 = vpack.c.bf16 %v1541_v3, %v1540_v49  ;;  %v1799_v3 = vld [vmem:[#allocation2 + $0x1a2] sm:$0xff] }
 0x291   : > { %v1134_v17 = vpop.permute.xlu1 %1133  ;;  %2119 = vmatprep.mubr.bf16.mxu1 %v1836_v25 }
 0x292   : > { %1178 = vst.msk [vmem:[#allocation3 + $0x60] sm:$0xff] %vm1173_vm9, %v1134_v17  ;;  %1471 = vrot.lane.b32.xlu0 %v8336_v12, %s7369_s16  ;;  %2120 = vmatmul.mubr.bf16.gmra.mrb[4].mxu1 %v1835_v62  ;;  %v1671_v17 = vld [vmem:[#allocation2 + $0x1a1] sm:$0xff] }
 0x293   : > { %1024 = vrot.lane.b32.xlu1 %v8340_v33, %s7369_s16 }
 0x294   : > { %v1713_v8 = vpop.permute.xlu0 %1712 }
 0x295   : > { %v1259_v36 = vpop.permute.xlu1 %1258 }
 0x296   : > { %1305 = vst.msk [vmem:[#allocation3 + $0x30] sm:$0xff] %vm1302_vm10, %v1259_v36  ;;  %1604 = vrot.lane.b32.xlu0 %v8452_v58, %s7370_s20 }
 0x297   : > { %v1839_v19 = vld [vmem:[#allocation3 + $0x38] sm:$0xff]  ;;  %1278 = vrot.lane.b32.xlu1 %v8346_v26, %s7371_s13 }
 0x298   : > { %2127 = vmatprep.mubr.bf16.mxu1 %v1839_v19  ;;  %v1458_v54 = vpop.permute.xlu0 %1457 }
 0x299   : > { %1500 = vst.msk [vmem:[#allocation3 + $0x80] sm:$0xff] %vm1044_vm8, %v1458_v54  ;;  %v1003_v29 = vpop.permute.xlu1 %1002 }
 0x29a   : > { %1048 = vst.msk [vmem:[#allocation3 + $0x48] sm:$0xff] %vm1044_vm8, %v1003_v29  ;;  %1732 = vrot.lane.b32.xlu0 %v8394_v18, %s7371_s13 }
 0x29b   : > { %1022 = vrot.lane.b32.xlu1 %v8348_v40, %s7369_s16 }
 0x29c   : > { %v1583_v33 = vpop.permute.xlu0 %1582 }
 0x29d   : > { %1627 = vst.msk [vmem:[#allocation3 + $0x50] sm:$0xff] %vm1173_vm9, %v1583_v33  ;;  %v1132_v16 = vpop.permute.xlu1 %1131  ;;  %v1838_v4 = vld [vmem:[#allocation3 + $0x30] sm:$0xff] }
 0x29e   : > { %1177 = vst.msk [vmem:[#allocation3 + $0x48] sm:$0xff] %vm1173_vm9, %v1132_v16  ;;  %2128 = vmatmul.mubr.bf16.gmra.mrb[8].mxu1 %v1838_v4  ;;  %1602 = vrot.lane.b32.xlu0 %v8398_v9, %s7370_s20 }
 0x29f   : > { %1306 = vst.msk [vmem:[#allocation3 + $0x48] sm:$0xff] %vm1302_vm10, %v1261_v1  ;;  %1151 = vrot.lane.b32.xlu1 %v8336_v12, %s7370_s20  ;;  %v1542_v12 = vld [vmem:[#allocation2 + $0x198] sm:$0xff] }
 0x2a0   : > { %v1711_v26 = vpop.permute.xlu0 %1710  ;;  %v1559_v23 = vpack.c.bf16 %v1543_v6, %v1542_v12 }
 0x2a1   : > { %1755 = vst.msk [vmem:[#allocation3 + $0x50] sm:$0xff] %vm1302_vm10, %v1711_v26  ;;  %v1265_v40 = vpop.permute.xlu1 %1264 }
 0x2a2   : > { %1730 = vrot.lane.b32.xlu0 %v8401_v20, %s7371_s13 }
 0x2a3   : > { %1153 = vrot.lane.b32.xlu1 %v8332_v63, %s7370_s20 }
 0x2a4   : > { %v1456_v18 = vpop.permute.xlu0 %1455 }
 0x2a5   : > { %1499 = vst.msk [vmem:[#allocation3 + $0x68] sm:$0xff] %vm1044_vm8, %v1456_v18  ;;  %v1009_v2 = vpop.permute.xlu1 %1008 }
 0x2a6   : > { %1628 = vst.msk [vmem:[#allocation3 + $0x68] sm:$0xff] %vm1173_vm9, %v1585_v14  ;;  %1475 = vrot.lane.b32.xlu0 %v8396_v44, %s7369_s16  ;;  %v1841_v31 = vld [vmem:[#allocation3 + $0x48] sm:$0xff] }
 0x2a7   : > { %1051 = vst.msk [vmem:[#allocation3 + $0x90] sm:$0xff] %vm1044_vm8, %v1009_v2  ;;  %1282 = vrot.lane.b32.xlu1 %v8398_v9, %s7371_s13  ;;  %v1670_v14 = vld [vmem:[#allocation2 + $0x199] sm:$0xff] }
 0x2a8   : > { %1756 = vst.msk [vmem:[#allocation3 + $0x68] sm:$0xff] %vm1302_vm10, %v1713_v8  ;;  %v1589_v1 = vpop.permute.xlu0 %1588  ;;  %v1842_v63 = vld [vmem:[#allocation3 + $0x50] sm:$0xff]  ;;  %v1687_v49 = vpack.c.bf16 %v1671_v17, %v1670_v14 }
 0x2a9   : > { %v1138_v28 = vpop.permute.xlu1 %1137  ;;  %2135 = vmatprep.mubr.bf16.mxu1 %v1842_v63 }
 0x2aa   : > { %1180 = vst.msk [vmem:[#allocation3 + $0x90] sm:$0xff] %vm1173_vm9, %v1138_v28  ;;  %1477 = vrot.lane.b32.xlu0 %v8403_v41, %s7369_s16  ;;  %2136 = vmatmul.mubr.bf16.gmra.mrb[12].mxu1 %v1841_v31  ;;  %v1798_v41 = vld [vmem:[#allocation2 + $0x19a] sm:$0xff] }
 0x2ab   : > { %1026 = vrot.lane.b32.xlu1 %v8401_v20, %s7369_s16  ;;  %v1815_v36 = vpack.c.bf16 %v1799_v3, %v1798_v41 }
 0x2ac   : > { %v1717_v9 = vpop.permute.xlu0 %1716 }
 0x2ad   : > { %v1263_v25 = vpop.permute.xlu1 %1262  ;;  %1831 = vst.msk [vmem:[#allocation3 + $0x178] sm:$0xff] %vm789_vm5, %v1815_v36 }
 0x2ae   : > { %1307 = vst.msk [vmem:[#allocation3 + $0x60] sm:$0xff] %vm1302_vm10, %v1263_v25  ;;  %1606 = vrot.lane.b32.xlu0 %v1559_v23, %s7370_s20 }
 0x2af   : > { %v1845_v62 = vld [vmem:[#allocation3 + $0x68] sm:$0xff]  ;;  %1155 = vrot.lane.b32.xlu1 %v8396_v44, %s7370_s20 }
 0x2b0   : > { %2143 = vmatprep.mubr.bf16.mxu1 %v1845_v62  ;;  %v1462_v8 = vpop.permute.xlu0 %1461 }
 0x2b1   : > { %1502 = vst.msk [vmem:[#allocation3 + $0xb0] sm:$0xff] %vm1044_vm8, %v1462_v8  ;;  %v1007_v20 = vpop.permute.xlu1 %1006 }
 0x2b2   : > { %1050 = vst.msk [vmem:[#allocation3 + $0x78] sm:$0xff] %vm1044_vm8, %v1007_v20  ;;  %1734 = vrot.lane.b32.xlu0 %v1687_v49, %s7371_s13 }
 0x2b3   : > { %1284 = vrot.lane.b32.xlu1 %v8452_v58, %s7371_s13 }
 0x2b4   : > { %v1587_v19 = vpop.permute.xlu0 %1586 }
 0x2b5   : > { %1629 = vst.msk [vmem:[#allocation3 + $0x80] sm:$0xff] %vm1173_vm9, %v1587_v19  ;;  %v1136_v44 = vpop.permute.xlu1 %1135  ;;  %v1844_v54 = vld [vmem:[#allocation3 + $0x60] sm:$0xff] }
 0x2b6   : > { %1179 = vst.msk [vmem:[#allocation3 + $0x78] sm:$0xff] %vm1173_vm9, %v1136_v44  ;;  %2144 = vmatmul.mubr.bf16.gmra.mrb[16].mxu1 %v1844_v54 }
 0x2b7   : > { %1308 = vst.msk [vmem:[#allocation3 + $0x78] sm:$0xff] %vm1302_vm10, %v1265_v40 }
 0x2b8   : > { %v1715_v29 = vpop.permute.xlu0 %1714 }
 0x2b9   : > { %1757 = vst.msk [vmem:[#allocation3 + $0x80] sm:$0xff] %vm1302_vm10, %v1715_v29  ;;  %v1269_v33 = vpop.permute.xlu1 %1268 }
 0x2bc   : > { %v1460_v16 = vpop.permute.xlu0 %1459 }
 0x2bd   : > { %1501 = vst.msk [vmem:[#allocation3 + $0x98] sm:$0xff] %vm1044_vm8, %v1460_v16  ;;  %v1013_v4 = vpop.permute.xlu1 %1012 }
 0x2be   : > { %1630 = vst.msk [vmem:[#allocation3 + $0x98] sm:$0xff] %vm1173_vm9, %v1589_v1  ;;  %v1847_v2 = vld [vmem:[#allocation3 + $0x78] sm:$0xff] }
 0x2bf   : > { %1053 = vst.msk [vmem:[#allocation3 + $0xc0] sm:$0xff] %vm1044_vm8, %v1013_v4 }
 0x2c0   : > { %1758 = vst.msk [vmem:[#allocation3 + $0x98] sm:$0xff] %vm1302_vm10, %v1717_v9  ;;  %v1593_v58 = vpop.permute.xlu0 %1592  ;;  %v1848_v26 = vld [vmem:[#allocation3 + $0x80] sm:$0xff] }
 0x2c1   : > { %v1142_v18 = vpop.permute.xlu1 %1141  ;;  %2151 = vmatprep.mubr.bf16.mxu1 %v1848_v26 }
 0x2c2   : > { %1182 = vst.msk [vmem:[#allocation3 + $0xc0] sm:$0xff] %vm1173_vm9, %v1142_v18  ;;  %2152 = vmatmul.mubr.bf16.gmra.mrb[20].mxu1 %v1847_v2 }
 0x2c4   : > { %v1721_v40 = vpop.permute.xlu0 %1720 }
 0x2c5   : > { %v1267_v12 = vpop.permute.xlu1 %1266 }
 0x2c6   : > { %1309 = vst.msk [vmem:[#allocation3 + $0x90] sm:$0xff] %vm1302_vm10, %v1267_v12 }
 0x2c7   : > { %v1851_v6 = vld [vmem:[#allocation3 + $0x98] sm:$0xff] }
 0x2c8   : > { %2159 = vmatprep.mubr.bf16.mxu1 %v1851_v6  ;;  %v1466_v63 = vpop.permute.xlu0 %1465 }
 0x2c9   : > { %1504 = vst.msk [vmem:[#allocation3 + $0xe0] sm:$0xff] %vm1044_vm8, %v1466_v63  ;;  %v1011_v1 = vpop.permute.xlu1 %1010 }
 0x2ca   : > { %1052 = vst.msk [vmem:[#allocation3 + $0xa8] sm:$0xff] %vm1044_vm8, %v1011_v1 }
 0x2cc   : > { %v1591_v28 = vpop.permute.xlu0 %1590 }
 0x2cd   : > { %1631 = vst.msk [vmem:[#allocation3 + $0xb0] sm:$0xff] %vm1173_vm9, %v1591_v28  ;;  %v1140_v31 = vpop.permute.xlu1 %1139  ;;  %v1850_v23 = vld [vmem:[#allocation3 + $0x90] sm:$0xff] }
 0x2ce   : > { %1181 = vst.msk [vmem:[#allocation3 + $0xa8] sm:$0xff] %vm1173_vm9, %v1140_v31  ;;  %2160 = vmatmul.mubr.bf16.gmra.mrb[24].mxu1 %v1850_v23 }
 0x2cf   : > { %1310 = vst.msk [vmem:[#allocation3 + $0xa8] sm:$0xff] %vm1302_vm10, %v1269_v33 }
 0x2d0   : > { %v1719_v14 = vpop.permute.xlu0 %1718 }
 0x2d1   : > { %1759 = vst.msk [vmem:[#allocation3 + $0xb0] sm:$0xff] %vm1302_vm10, %v1719_v14  ;;  %v1273_v17 = vpop.permute.xlu1 %1272 }
 0x2d4   : > { %v1464_v9 = vpop.permute.xlu0 %1463 }
 0x2d5   : > { %1503 = vst.msk [vmem:[#allocation3 + $0xc8] sm:$0xff] %vm1044_vm8, %v1464_v9  ;;  %v1017_v25 = vpop.permute.xlu1 %1016 }
 0x2d6   : > { %1632 = vst.msk [vmem:[#allocation3 + $0xc8] sm:$0xff] %vm1173_vm9, %v1593_v58  ;;  %v1853_v3 = vld [vmem:[#allocation3 + $0xa8] sm:$0xff] }
 0x2d7   : > { %1055 = vst.msk [vmem:[#allocation3 + $0xf0] sm:$0xff] %vm1044_vm8, %v1017_v25 }
 0x2d8   : > { %1760 = vst.msk [vmem:[#allocation3 + $0xc8] sm:$0xff] %vm1302_vm10, %v1721_v40  ;;  %v1597_v62 = vpop.permute.xlu0 %1596  ;;  %v1854_v49 = vld [vmem:[#allocation3 + $0xb0] sm:$0xff] }
 0x2d9   : > { %v1146_v41 = vpop.permute.xlu1 %1145  ;;  %2167 = vmatprep.mubr.bf16.mxu1 %v1854_v49 }
 0x2da   : > { %1184 = vst.msk [vmem:[#allocation3 + $0xf0] sm:$0xff] %vm1173_vm9, %v1146_v41  ;;  %2168 = vmatmul.mubr.bf16.gmra.mrb[28].mxu1 %v1853_v3 }
 0x2dc   : > { %v1725_v8 = vpop.permute.xlu0 %1724 }
 0x2dd   : > { %v1271_v36 = vpop.permute.xlu1 %1270 }
 0x2de   : > { %1311 = vst.msk [vmem:[#allocation3 + $0xc0] sm:$0xff] %vm1302_vm10, %v1271_v36  ;;  %v8523_v54 = vpop.f32.mrb[32].mxu0 }
 0x2df   : > { %v1857_v20 = vld [vmem:[#allocation3 + $0xc8] sm:$0xff]  ;;  %v8526_v29 = vpop.f32.mrb[33].mxu0 }
 0x2e0   : > { %2175 = vmatprep.mubr.bf16.mxu1 %v1857_v20  ;;  %v1470_v19 = vpop.permute.xlu0 %1469  ;;  %v8528_v33 = vpop.f32.mrb[34].mxu0 }
 0x2e1   : > { %1506 = vst.msk [vmem:[#allocation3 + $0x110] sm:$0xff] %vm1044_vm8, %v1470_v19  ;;  %v1015_v44 = vpop.permute.xlu1 %1014  ;;  %v8530_v4 = vpop.f32.mrb[35].mxu0 }
 0x2e2   : > { %1054 = vst.msk [vmem:[#allocation3 + $0xd8] sm:$0xff] %vm1044_vm8, %v1015_v44 }
 0x2e4   : > { %v1595_v16 = vpop.permute.xlu0 %1594 }
 0x2e5   : > { %1633 = vst.msk [vmem:[#allocation3 + $0xe0] sm:$0xff] %vm1173_vm9, %v1595_v16  ;;  %v1144_v58 = vpop.permute.xlu1 %1143  ;;  %v1856_v26 = vld [vmem:[#allocation3 + $0xc0] sm:$0xff] }
 0x2e6   : > { %1183 = vst.msk [vmem:[#allocation3 + $0xd8] sm:$0xff] %vm1173_vm9, %v1144_v58  ;;  %2176 = vmatmul.mubr.bf16.gmra.mrb[32].mxu1 %v1856_v26 }
 0x2e7   : > { %1312 = vst.msk [vmem:[#allocation3 + $0xd8] sm:$0xff] %vm1302_vm10, %v1273_v17 }
 0x2e8   : > { %v1723_v18 = vpop.permute.xlu0 %1722 }
 0x2e9   : > { %1761 = vst.msk [vmem:[#allocation3 + $0xe0] sm:$0xff] %vm1302_vm10, %v1723_v18  ;;  %v1277_v2 = vpop.permute.xlu1 %1276 }
 0x2ec   : > { %v1468_v40 = vpop.permute.xlu0 %1467 }
 0x2ed   : > { %1505 = vst.msk [vmem:[#allocation3 + $0xf8] sm:$0xff] %vm1044_vm8, %v1468_v40  ;;  %v1021_v12 = vpop.permute.xlu1 %1020 }
 0x2ee   : > { %1634 = vst.msk [vmem:[#allocation3 + $0xf8] sm:$0xff] %vm1173_vm9, %v1597_v62  ;;  %v1859_v28 = vld [vmem:[#allocation3 + $0xd8] sm:$0xff] }
 0x2ef   : > { %1057 = vst.msk [vmem:[#allocation3 + $0x120] sm:$0xff] %vm1044_vm8, %v1021_v12 }
 0x2f0   : > { %1762 = vst.msk [vmem:[#allocation3 + $0xf8] sm:$0xff] %vm1302_vm10, %v1725_v8  ;;  %v1601_v6 = vpop.permute.xlu0 %1600  ;;  %v1860_v63 = vld [vmem:[#allocation3 + $0xe0] sm:$0xff] }
 0x2f1   : > { %v1150_v1 = vpop.permute.xlu1 %1149  ;;  %2183 = vmatprep.mubr.bf16.mxu1 %v1860_v63  ;;  %v8541_v23 = vpop.f32.mrb[36].mxu0 }
 0x2f2   : > { %1186 = vst.msk [vmem:[#allocation3 + $0x120] sm:$0xff] %vm1173_vm9, %v1150_v1  ;;  %2184 = vmatmul.mubr.bf16.gmra.mrb[36].mxu1 %v1859_v28  ;;  %v8544_v17 = vpop.f32.mrb[37].mxu0 }
 0x2f3   : > { %v8546_v25 = vpop.f32.mrb[38].mxu0 }
 0x2f4   : > { %v1729_v31 = vpop.permute.xlu0 %1728  ;;  %v8548_v62 = vpop.f32.mrb[39].mxu0 }
 0x2f5   : > { %v1275_v14 = vpop.permute.xlu1 %1274 }
 0x2f6   : > { %1313 = vst.msk [vmem:[#allocation3 + $0xf0] sm:$0xff] %vm1302_vm10, %v1275_v14 }
 0x2f7   : > { %v1863_v9 = vld [vmem:[#allocation3 + $0xf8] sm:$0xff] }
 0x2f8   : > { %2191 = vmatprep.mubr.bf16.mxu1 %v1863_v9  ;;  %v1474_v49 = vpop.permute.xlu0 %1473 }
 0x2f9   : > { %1508 = vst.msk [vmem:[#allocation3 + $0x140] sm:$0xff] %vm1044_vm8, %v1474_v49  ;;  %v1019_v41 = vpop.permute.xlu1 %1018 }
 0x2fa   : > { %1056 = vst.msk [vmem:[#allocation3 + $0x108] sm:$0xff] %vm1044_vm8, %v1019_v41 }
 0x2fc   : > { %v1599_v3 = vpop.permute.xlu0 %1598 }
 0x2fd   : > { %1635 = vst.msk [vmem:[#allocation3 + $0x110] sm:$0xff] %vm1173_vm9, %v1599_v3  ;;  %v1148_v8 = vpop.permute.xlu1 %1147  ;;  %v1862_v36 = vld [vmem:[#allocation3 + $0xf0] sm:$0xff] }
 0x2fe   : > { %1185 = vst.msk [vmem:[#allocation3 + $0x108] sm:$0xff] %vm1173_vm9, %v1148_v8  ;;  %2192 = vmatmul.mubr.bf16.gmra.mrb[40].mxu1 %v1862_v36 }
 0x2ff   : > { %1314 = vst.msk [vmem:[#allocation3 + $0x108] sm:$0xff] %vm1302_vm10, %v1277_v2 }
 0x300   : > { %v1727_v20 = vpop.permute.xlu0 %1726 }
 0x301   : > { %1763 = vst.msk [vmem:[#allocation3 + $0x110] sm:$0xff] %vm1302_vm10, %v1727_v20  ;;  %v1281_v19 = vpop.permute.xlu1 %1280 }
 0x304   : > { %v1472_v44 = vpop.permute.xlu0 %1471 }
 0x305   : > { %1507 = vst.msk [vmem:[#allocation3 + $0x128] sm:$0xff] %vm1044_vm8, %v1472_v44  ;;  %v1025_v16 = vpop.permute.xlu1 %1024 }
 0x306   : > { %1636 = vst.msk [vmem:[#allocation3 + $0x128] sm:$0xff] %vm1173_vm9, %v1601_v6  ;;  %v1865_v40 = vld [vmem:[#allocation3 + $0x108] sm:$0xff] }
 0x307   : > { %1059 = vst.msk [vmem:[#allocation3 + $0x150] sm:$0xff] %vm1044_vm8, %v1025_v16 }
 0x308   : > { %1764 = vst.msk [vmem:[#allocation3 + $0x128] sm:$0xff] %vm1302_vm10, %v1729_v31  ;;  %v1605_v58 = vpop.permute.xlu0 %1604  ;;  %v1866_v26 = vld [vmem:[#allocation3 + $0x110] sm:$0xff]  ;;  %v8561_v2 = vpop.f32.mrb[40].mxu0 }
 0x309   : > { %v1279_v18 = vpop.permute.xlu1 %1278  ;;  %2199 = vmatprep.mubr.bf16.mxu1 %v1866_v26  ;;  %9680 = vst [vmem:[#allocation43_spill] sm:$0xff] %v8561_v2  ;;  %v8563_v1 = vpop.f32.mrb[41].mxu0 }
 0x30a   : > { %1315 = vst.msk [vmem:[#allocation3 + $0x120] sm:$0xff] %vm1302_vm10, %v1279_v18  ;;  %2200 = vmatmul.mubr.bf16.gmra.mrb[44].mxu1 %v1865_v40  ;;  %9681 = vst [vmem:[#allocation44_spill] sm:$0xff] %v8563_v1  ;;  %v8566_v6 = vpop.f32.mrb[42].mxu0 }
 0x30b   : > { %9682 = vst [vmem:[#allocation45_spill] sm:$0xff] %v8566_v6  ;;  %v8568_v31 = vpop.f32.mrb[43].mxu0 }
 0x30c   : > { %v1733_v12 = vpop.permute.xlu0 %1732  ;;  %9683 = vst [vmem:[#allocation46_spill] sm:$0xff] %v8568_v31 }
 0x30d   : > { %v1023_v63 = vpop.permute.xlu1 %1022 }
 0x30e   : > { %1058 = vst.msk [vmem:[#allocation3 + $0x138] sm:$0xff] %vm1044_vm8, %v1023_v63 }
 0x30f   : > { %v1869_v28 = vld [vmem:[#allocation3 + $0x128] sm:$0xff] }
 0x310   : > { %2207 = vmatprep.mubr.bf16.mxu1 %v1869_v28  ;;  %v1603_v14 = vpop.permute.xlu0 %1602 }
 0x311   : > { %1637 = vst.msk [vmem:[#allocation3 + $0x140] sm:$0xff] %vm1173_vm9, %v1603_v14  ;;  %v1152_v9 = vpop.permute.xlu1 %1151  ;;  %v1868_v49 = vld [vmem:[#allocation3 + $0x120] sm:$0xff] }
 0x312   : > { %1187 = vst.msk [vmem:[#allocation3 + $0x138] sm:$0xff] %vm1173_vm9, %v1152_v9  ;;  %2208 = vmatmul.mubr.bf16.gmra.mrb[48].mxu1 %v1868_v49 }
 0x313   : > { %1316 = vst.msk [vmem:[#allocation3 + $0x138] sm:$0xff] %vm1302_vm10, %v1281_v19 }
 0x314   : > { %v1731_v41 = vpop.permute.xlu0 %1730 }
 0x315   : > { %1765 = vst.msk [vmem:[#allocation3 + $0x140] sm:$0xff] %vm1302_vm10, %v1731_v41  ;;  %v1154_v3 = vpop.permute.xlu1 %1153  ;;  %v7003_v41 = vld [vmem:[%s7732_s18 + $0x8] sm:$0xff] }
 0x316   : > { %1188 = vst.msk [vmem:[#allocation3 + $0x150] sm:$0xff] %vm1173_vm9, %v1154_v3  ;;  %v4241_v3 = vcombine.high %v7003_v41, %v7003_v41 }
 0x318   : > { %v1476_v8 = vpop.permute.xlu0 %1475 }
 0x319   : > { %1509 = vst.msk [vmem:[#allocation3 + $0x158] sm:$0xff] %vm1044_vm8, %v1476_v8  ;;  %v1283_v36 = vpop.permute.xlu1 %1282 }
 0x31a   : > { %1638 = vst.msk [vmem:[#allocation3 + $0x158] sm:$0xff] %vm1173_vm9, %v1605_v58  ;;  %v1871_v16 = vld [vmem:[#allocation3 + $0x138] sm:$0xff] }
 0x31b   : > { %1317 = vst.msk [vmem:[#allocation3 + $0x150] sm:$0xff] %vm1302_vm10, %v1283_v36  ;;  %1766 = vst.msk [vmem:[#allocation3 + $0x158] sm:$0xff] %vm1302_vm10, %v1733_v12 }
 0x31c   : > { %v1478_v20 = vpop.permute.xlu0 %1477  ;;  %v1872_v44 = vld [vmem:[#allocation3 + $0x140] sm:$0xff] }
 0x31d   : > { %1510 = vst.msk [vmem:[#allocation3 + $0x170] sm:$0xff] %vm1044_vm8, %v1478_v20  ;;  %v1027_v19 = vpop.permute.xlu1 %1026  ;;  %2215 = vmatprep.mubr.bf16.mxu1 %v1872_v44  ;;  %v1876_v20 = vld [vmem:[#allocation3 + $0x160] sm:$0xff]  ;;  %v4255_v44 = vrot.slane %v4241_v3, %v7754_v7  ;;  %v5473_v3 = vmul.f32 0.25, %v7780_v52 }
 0x31e   : > { %1060 = vst.msk [vmem:[#allocation3 + $0x168] sm:$0xff] %vm1044_vm8, %v1027_v19  ;;  %2216 = vmatmul.mubr.bf16.gmra.mrb[52].mxu1 %v1871_v16  ;;  %v7004_v19 = vld [vmem:[%s7732_s18 + $0x18] sm:$0xff] }
 0x31f   : > { %v8583_v40 = vpop.f32.mrb[44].mxu0  ;;  %v4275_v16 = vcombine.high %v7004_v19, %v7004_v19  ;;  %v6369_v19 = vrot.slane %v4255_v44, 9 }
 0x320   : > { %v1607_v26 = vpop.permute.xlu0 %1606  ;;  %9684 = vst [vmem:[#allocation47_spill] sm:$0xff] %v8583_v40  ;;  %v8586_v28 = vpop.f32.mrb[45].mxu0 }
 0x321   : > { %1639 = vst.msk [vmem:[#allocation3 + $0x170] sm:$0xff] %vm1173_vm9, %v1607_v26  ;;  %v1156_v18 = vpop.permute.xlu1 %1155  ;;  %9685 = vst [vmem:[#allocation48_spill] sm:$0xff] %v8586_v28  ;;  %v8589_v9 = vpop.f32.mrb[46].mxu0  ;;  %v4256_v26 = vcombine.high %v7761_v15, %v7761_v15  ;;  %v7005_v15 = vld [vmem:[%s7732_s18 + $0x28] sm:$0xff]  ;;  %v8618_v2 = vadd.f32 %v6369_v19, %v4255_v44 }
 0x322   : > { %1189 = vst.msk [vmem:[#allocation3 + $0x168] sm:$0xff] %vm1173_vm9, %v1156_v18  ;;  %v1875_v58 = vld [vmem:[#allocation3 + $0x158] sm:$0xff]  ;;  %v1874_v14 = vld [vmem:[#allocation3 + $0x150] sm:$0xff]  ;;  %9686 = vst [vmem:[#allocation49_spill] sm:$0xff] %v8589_v9  ;;  %v8591_v49 = vpop.f32.mrb[47].mxu0  ;;  %v4257_v18 = vcombine.high %v4255_v44, %v4255_v44  ;;  %v4309_v9 = vcombine.high %v7005_v15, %v7005_v15 }
 0x323   : > { %2223 = vmatprep.mubr.bf16.mxu1 %v1875_v58  ;;  %9687 = vst [vmem:[#allocation50_spill] sm:$0xff] %v8591_v49  ;;  %v4289_v58 = vrot.slane %v4275_v16, %v7754_v7  ;;  %v6368_v41 = vrot.slane %v4256_v26, 9  ;;  %9692 = vst [vmem:[#allocation55_spill] sm:$0xff] %v8618_v2 }
 0x324   : > { %v1735_v12 = vpop.permute.xlu0 %1734  ;;  %v4323_v15 = vrot.slane %v4309_v9, %v7754_v7  ;;  %v5481_v9 = vmul.f32 0.25, %v7815_v38  ;;  %v5480_v38 = vmul.f32 0.25, %v7811_v34 }
 0x325   : > { %1767 = vst.msk [vmem:[#allocation3 + $0x170] sm:$0xff] %vm1302_vm10, %v1735_v12  ;;  %v1285_v63 = vpop.permute.xlu1 %1284  ;;  %v4290_v12 = vcombine.high %v7773_v37, %v7773_v37  ;;  %v6370_v37 = vrot.slane %v4257_v18, 9 }
 0x326   : > { %1318 = vst.msk [vmem:[#allocation3 + $0x168] sm:$0xff] %vm1302_vm10, %v1285_v63  ;;  %2224 = vmatmul.mubr.bf16.gmra.mrb[56].mxu1 %v1874_v14  ;;  %v1879_v63 = vld [vmem:[#allocation3 + $0x178] sm:$0xff]  ;;  %v5472_v14 = vmul.f32 0.25, %v7777_v51  ;;  %v6377_v51 = vrot.slane %v4289_v58, 9  ;;  %v8649_v19 = vcombine.high %v4323_v15, %v4323_v15 }
 0x327   : > { %v6376_v40 = vrot.slane %v4290_v12, 9  ;;  %v8624_v1 = vadd.f32 %v6370_v37, %v4257_v18  ;;  %v5501_v37 = vmul.f32 0.25, %v7877_v47 }
 0x328   : > { %v5536_v52 = vpack.c.bf16 %v5472_v14, %v5472_v14  ;;  %9702 = vst [vmem:[#allocation65_spill] sm:$0xff] %v8649_v19 }
 0x329   : > { %9693 = vst [vmem:[#allocation56_spill] sm:$0xff] %v8624_v1  ;;  %v8628_v14 = vadd.f32 %v6376_v40, %v4290_v12  ;;  %v4358_v40 = vcombine.high %v7802_v11, %v7802_v11  ;;  %v6385_v12 = vrot.slane %v4323_v15, 9  ;;  %v5502_v11 = vmul.f32 0.25, %v7879_v48 }
 0x32a   : > { %v8635_v44 = vunpack.c.l.b16 %v5536_v52 }
 0x32b   : > { %9695 = vst [vmem:[#allocation58_spill] sm:$0xff] %v8628_v14  ;;  %v6392_v52 = vrot.slane %v4358_v40, 9  ;;  %v8661_v34 = vadd.f32 %v6385_v12, %v4323_v15 }
 0x32c   : > { %v1878_v8 = vld [vmem:[#allocation3 + $0x170] sm:$0xff]  ;;  %9698 = vst [vmem:[#allocation61_spill] sm:$0xff] %v8635_v44 }
 0x32d   : > { %2231 = vmatprep.mubr.bf16.mxu1 %v1878_v8  ;;  %v1877_v36 = vld [vmem:[#allocation3 + $0x168] sm:$0xff]  ;;  %v5474_v8 = vmul.f32 0.25, %v7782_v53  ;;  %v8616_v53 = vadd.f32 %v6368_v41, %v4256_v26  ;;  %v8630_v26 = vadd.f32 %v6377_v51, %v4289_v58  ;;  %v8633_v41 = vmul.f32 0.25, %v7784_v55  ;;  %9704 = vst [vmem:[#allocation67_spill] sm:$0xff] %v8661_v34 }
 0x32e   : > { %2232 = vmatmul.mubr.bf16.gmra.mrb[60].mxu1 %v1877_v36  ;;  %v5476_v36 = vmul.f32 0.25, %v7786_v56  ;;  %v5537_v56 = vpack.c.bf16 %v5473_v3, %v5473_v3  ;;  %v5482_v3 = vmul.f32 0.25, %v7817_v39  ;;  %v5484_v39 = vmul.f32 0.25, %v7813_v35 }
 0x32f   : > { %6743 = vmatprep.mubr.msk.bf16.mxu1 %vm789_vm5, %v1876_v20  ;;  %9691 = vst [vmem:[#allocation54_spill] sm:$0xff] %v8616_v53  ;;  %9696 = vst [vmem:[#allocation59_spill] sm:$0xff] %v8630_v26 }
 0x330   : > { %v5540_v6 = vpack.c.bf16 %v5476_v36, %v5476_v36  ;;  %9697 = vst [vmem:[#allocation60_spill] sm:$0xff] %v8633_v41  ;;  %v5493_v36 = vmul.f32 0.25, %v7839_v59  ;;  %v7007_v59 = vld [vmem:[%s7732_s18 + $0x88] sm:$0xff]  ;;  %v5548_v47 = vpack.c.bf16 %v5484_v39, %v5484_v39 }
 0x332   : > { %v8643_v18 = vunpack.c.l.b16 %v5540_v6  ;;  %v5545_v6 = vpack.c.bf16 %v5481_v9, %v5481_v9 }
 0x334   : > { %v8606_v20 = vpop.f32.mrb[48].mxu0  ;;  %9701 = vst [vmem:[#allocation64_spill] sm:$0xff] %v8643_v18  ;;  %v8665_v48 = vunpack.c.l.b16 %v5545_v6 }
 0x335   : > { %9688 = vst [vmem:[#allocation51_spill] sm:$0xff] %v8606_v20  ;;  %v8610_v16 = vpop.f32.mrb[49].mxu0  ;;  %v5538_v20 = vpack.c.bf16 %v5474_v8, %v5474_v8 }
 0x336   : > { %6744 = vmatmul.mubr.msk.bf16.vlgmr.msra.gmra.mrb[64].mxu1 %vm789_vm5, %v1879_v63  ;;  %9689 = vst [vmem:[#allocation52_spill] sm:$0xff] %v8610_v16  ;;  %v8612_v49 = vpop.f32.mrb[50].mxu0  ;;  %v4324_v63 = vcombine.high %v7792_v61, %v7792_v61  ;;  %v7006_v16 = vld [vmem:[%s7732_s18 + $0x38] sm:$0xff]  ;;  %v8639_v61 = vunpack.c.l.b16 %v5537_v56  ;;  %v4513_v56 = vcombine.high %v7007_v59, %v7007_v59  ;;  %9706 = vst [vmem:[#allocation69_spill] sm:$0xff] %v8665_v48 }
 0x337   : > { %9690 = vst [vmem:[#allocation53_spill] sm:$0xff] %v8612_v49  ;;  %v8614_v28 = vpop.f32.mrb[51].mxu0  ;;  %v4343_v31 = vcombine.high %v7006_v16, %v7006_v16  ;;  %v8626_v49 = vcombine.high %v4289_v58, %v4289_v58  ;;  %v8641_v8 = vunpack.c.l.b16 %v5538_v20  ;;  %v5494_v20 = vmul.f32 0.25, %v7841_v60 }
 0x338   : > { %9699 = vst [vmem:[#allocation62_spill] sm:$0xff] %v8639_v61  ;;  %v6384_v58 = vrot.slane %v4324_v63, 9  ;;  %v5546_v16 = vpack.c.bf16 %v5482_v3, %v5482_v3  ;;  %v5557_v60 = vpack.c.bf16 %v5493_v36, %v5493_v36  ;;  %v5544_v3 = vpack.c.bf16 %v5480_v38, %v5480_v38 }
 0x339   : > { %9694 = vst [vmem:[#allocation57_spill] sm:$0xff] %v8626_v49  ;;  %9700 = vst [vmem:[#allocation63_spill] sm:$0xff] %v8641_v8  ;;  %v4357_v55 = vrot.slane %v4343_v31, %v7754_v7  ;;  %v5558_v44 = vpack.c.bf16 %v5494_v20, %v5494_v20  ;;  %v5565_v31 = vpack.c.bf16 %v5501_v37, %v5501_v37  ;;  %v8679_v38 = vmul.f32 0.25, %v7820_v43  ;;  %v7009_v43 = vld [vmem:[%s7732_s18 + $0xa8] sm:$0xff] }
 0x33a   : > { %v8659_v18 = vadd.f32 %v6384_v58, %v4324_v63  ;;  %v8667_v51 = vunpack.c.l.b16 %v5546_v16  ;;  %v5566_v8 = vpack.c.bf16 %v5502_v11, %v5502_v11  ;;  %v8669_v61 = vadd.f32 %v6392_v52, %v4358_v40  ;;  %v7008_v58 = vld [vmem:[%s7732_s18 + $0x98] sm:$0xff] }
 0x33b   : > { %v6393_v35 = vrot.slane %v4357_v55, 9  ;;  %v8663_v9 = vcombine.high %v4357_v55, %v4357_v55  ;;  %v8672_v63 = vmul.f32 0.25, %v7843_v13  ;;  %v4527_v15 = vrot.slane %v4513_v56, %v7754_v7  ;;  %9711 = vst [vmem:[#allocation74_spill] sm:$0xff] %v8679_v38 }
 0x33c   : > { %9703 = vst [vmem:[#allocation66_spill] sm:$0xff] %v8659_v18  ;;  %9707 = vst [vmem:[#allocation70_spill] sm:$0xff] %v8667_v51  ;;  %v4547_v12 = vcombine.high %v7008_v58, %v7008_v58  ;;  %v8681_v39 = vunpack.c.l.b16 %v5557_v60  ;;  %v4528_v20 = vcombine.high %v7891_v50, %v7891_v50  ;;  %v8685_v6 = vunpack.c.l.b16 %v5544_v3 }
 0x33d   : > { %9705 = vst [vmem:[#allocation68_spill] sm:$0xff] %v8663_v9  ;;  %9708 = vst [vmem:[#allocation71_spill] sm:$0xff] %v8669_v61  ;;  %v8676_v36 = vadd.f32 %v6393_v35, %v4357_v55  ;;  %v8687_v40 = vunpack.c.l.b16 %v5548_v47  ;;  %v8689_v13 = vunpack.c.l.b16 %v5558_v44  ;;  %v8692_v16 = vmul.f32 0.25, %v7881_v10 }
 0x33e   : > { %9709 = vst [vmem:[#allocation72_spill] sm:$0xff] %v8672_v63  ;;  %9712 = vst [vmem:[#allocation75_spill] sm:$0xff] %v8681_v39  ;;  %v8698_v11 = vunpack.c.l.b16 %v5565_v31  ;;  %v8700_v52 = vunpack.c.l.b16 %v5566_v8  ;;  %v6433_v59 = vrot.slane %v4527_v15, 9  ;;  %v4561_v10 = vrot.slane %v4547_v12, %v7754_v7 }
 0x33f   : > { %9710 = vst [vmem:[#allocation73_spill] sm:$0xff] %v8676_v36  ;;  %9713 = vst [vmem:[#allocation76_spill] sm:$0xff] %v8685_v6  ;;  %v4562_v56 = vcombine.high %v7905_v57, %v7905_v57  ;;  %v6432_v60 = vrot.slane %v4528_v20, 9  ;;  %v5505_v8 = vmul.f32 0.25, %v7917_v24  ;;  %v5506_v3 = vmul.f32 0.25, %v7919_v22  ;;  %v7010_v24 = vld [vmem:[%s7732_s18 + $0xb8] sm:$0xff] }
 0x340   : > { %9714 = vst [vmem:[#allocation77_spill] sm:$0xff] %v8687_v40  ;;  %9715 = vst [vmem:[#allocation78_spill] sm:$0xff] %v8689_v13  ;;  %v5504_v44 = vmul.f32 0.25, %v7913_v5  ;;  %v4581_v57 = vcombine.high %v7009_v43, %v7009_v43  ;;  %v5508_v39 = vmul.f32 0.25, %v7915_v21  ;;  %v4615_v63 = vcombine.high %v7010_v24, %v7010_v24 }
 0x341   : > { %9716 = vst [vmem:[#allocation79_spill] sm:$0xff] %v8692_v16  ;;  %9717 = vst [vmem:[#allocation80_spill] sm:$0xff] %v8698_v11  ;;  %v8725_v22 = vcombine.high %v4527_v15, %v4527_v15  ;;  %v8727_v40 = vadd.f32 %v6433_v59, %v4527_v15  ;;  %v6440_v58 = vrot.slane %v4562_v56, 9  ;;  %v6441_v13 = vrot.slane %v4561_v10, 9 }
 0x342   : > { %9718 = vst [vmem:[#allocation81_spill] sm:$0xff] %v8700_v52  ;;  %v8729_v12 = vadd.f32 %v6432_v60, %v4528_v20  ;;  %v5569_v5 = vpack.c.bf16 %v5505_v8, %v5505_v8  ;;  %v5570_v16 = vpack.c.bf16 %v5506_v3, %v5506_v3  ;;  %v4596_v43 = vcombine.high %v7926_v30, %v7926_v30  ;;  %v7011_v20 = vld [vmem:[%s7732_s18 + $0xc8] sm:$0xff] }
 0x343   : > { %9719 = vst [vmem:[#allocation82_spill] sm:$0xff] %v8725_v22  ;;  %9720 = vst [vmem:[#allocation83_spill] sm:$0xff] %v8727_v40  ;;  %v8733_v55 = vcombine.high %v4561_v10, %v4561_v10  ;;  %v5568_v31 = vpack.c.bf16 %v5504_v44, %v5504_v44  ;;  %v4595_v21 = vrot.slane %v4581_v57, %v7754_v7  ;;  %v5513_v59 = vmul.f32 0.25, %v7947_v45 }
 0x344   : > { %9721 = vst [vmem:[#allocation84_spill] sm:$0xff] %v8729_v12  ;;  %v4630_v24 = vcombine.high %v7935_v0, %v7935_v0  ;;  %v5572_v22 = vpack.c.bf16 %v5508_v39, %v5508_v39  ;;  %v4629_v15 = vrot.slane %v4615_v63, %v7754_v7  ;;  %v4649_v60 = vcombine.high %v7011_v20, %v7011_v20 }
 0x345   : > { %9722 = vst [vmem:[#allocation85_spill] sm:$0xff] %v8733_v55  ;;  %v8741_v8 = vadd.f32 %v6440_v58, %v4562_v56  ;;  %v8743_v3 = vadd.f32 %v6441_v13, %v4561_v10  ;;  %v5512_v30 = vmul.f32 0.25, %v7943_v32  ;;  %v5514_v44 = vmul.f32 0.25, %v7949_v46  ;;  %v7014_v55 = vld [vmem:[%s7732_s18 + $0xf8] sm:$0xff] }
 0x346   : > { %v8694_v37 = vpop.f32.mrb[52].mxu0  ;;  %v8747_v57 = vunpack.c.l.b16 %v5569_v5  ;;  %v8749_v40 = vunpack.c.l.b16 %v5570_v16  ;;  %v6448_v0 = vrot.slane %v4596_v43, 9  ;;  %v5516_v63 = vmul.f32 0.25, %v7945_v42 }
 0x347   : > { %v8702_v50 = vpop.f32.mrb[53].mxu0  ;;  %9723 = vst [vmem:[#allocation86_spill] sm:$0xff] %v8741_v8  ;;  %9724 = vst [vmem:[#allocation87_spill] sm:$0xff] %v8743_v3  ;;  %v8753_v45 = vmul.f32 0.25, %v7922_v27  ;;  %v8755_v39 = vunpack.c.l.b16 %v5568_v31  ;;  %v6449_v56 = vrot.slane %v4595_v21, 9  ;;  %v6456_v13 = vrot.slane %v4630_v24, 9 }
 0x348   : > { %v8709_v35 = vpop.f32.mrb[54].mxu0  ;;  %9725 = vst [vmem:[#allocation88_spill] sm:$0xff] %v8747_v57  ;;  %9726 = vst [vmem:[#allocation89_spill] sm:$0xff] %v8749_v40  ;;  %v8757_v10 = vunpack.c.l.b16 %v5572_v22  ;;  %v6457_v32 = vrot.slane %v4629_v15, 9  ;;  %v5577_v58 = vpack.c.bf16 %v5513_v59, %v5513_v59  ;;  %v4663_v46 = vrot.slane %v4649_v60, %v7754_v7  ;;  %v7012_v3 = vld [vmem:[%s7732_s18 + $0xd8] sm:$0xff]  ;;  %v9735_v60 = vld [vmem:[#allocation29_spill] sm:$0xff] }
 0x349   : > { %v8714_v47 = vpop.f32.mrb[55].mxu0  ;;  %9727 = vst [vmem:[#allocation90_spill] sm:$0xff] %v8753_v45  ;;  %9728 = vst [vmem:[#allocation91_spill] sm:$0xff] %v8755_v39  ;;  %v8760_v5 = vcombine.high %v4595_v21, %v4595_v21  ;;  %v5576_v16 = vpack.c.bf16 %v5512_v30, %v5512_v30  ;;  %v5578_v20 = vpack.c.bf16 %v5514_v44, %v5514_v44  ;;  %v9737_v44 = vld [vmem:[#allocation28_spill] sm:$0xff] }
 0x34a   : > { %9729 = vst [vmem:[#allocation92_spill] sm:$0xff] %v8757_v10  ;;  %v4683_v8 = vcombine.high %v7012_v3, %v7012_v3  ;;  %v8765_v31 = vadd.f32 %v6448_v0, %v4596_v43  ;;  %v5580_v39 = vpack.c.bf16 %v5516_v63, %v5516_v63  ;;  %v8767_v45 = vadd.f32 %v6449_v56, %v4595_v21  ;;  %v9743_v63 = vld [vmem:[#allocation30_spill] sm:$0xff] }
 0x34b   : > { %9730 = vst [vmem:[#allocation93_spill] sm:$0xff] %v8760_v5  ;;  %v8769_v22 = vcombine.high %v4629_v15, %v4629_v15  ;;  %v8771_v59 = vadd.f32 %v6456_v13, %v4630_v24  ;;  %v4664_v10 = vcombine.high %v9735_v60, %v9735_v60  ;;  %v8775_v30 = vadd.f32 %v6457_v32, %v4629_v15  ;;  %v8791_v13 = vld [vmem:[#allocation12] ss:$0 sm:$0xff]  ;;  %v9746_v60 = vld [vmem:[#allocation33_spill] sm:$0xff] }
 0x34c   : > { %9731 = vst [vmem:[#allocation94_spill] sm:$0xff] %v8765_v31  ;;  %9732 = vst [vmem:[#allocation95_spill] sm:$0xff] %v8767_v45  ;;  %v8778_v3 = vmul.f32 0.25, %v9737_v44  ;;  %v8780_v42 = vunpack.c.l.b16 %v5577_v58  ;;  %v8782_v27 = vcombine.high %v4663_v46, %v4663_v46  ;;  %v8784_v0 = vunpack.c.l.b16 %v5576_v16 }
 0x34d   : > { %9733 = vst [vmem:[#allocation96_spill] sm:$0xff] %v8769_v22  ;;  %9734 = vst [vmem:[#allocation97_spill] sm:$0xff] %v8771_v59  ;;  %v8786_v21 = vunpack.c.l.b16 %v5578_v20  ;;  %v4697_v24 = vrot.slane %v4683_v8, %v7754_v7  ;;  %v4698_v56 = vcombine.high %v9743_v63, %v9743_v63  ;;  %v8795_v58 = vunpack.c.l.b16 %v5580_v39  ;;  %v9748_v63 = vld [vmem:[#allocation31_spill] sm:$0xff] }
 0x34e   : > { %9736 = vst [vmem:[#allocation29_spill] sm:$0xff] %v8775_v30  ;;  %9738 = vst [vmem:[#allocation28_spill] sm:$0xff] %v8778_v3  ;;  %v5521_v44 = vmul.f32 0.25, %v9746_v60  ;;  %v6464_v8 = vrot.slane %v4664_v10, 9  ;;  %v6465_v57 = vrot.slane %v4663_v46, 9  ;;  %v5520_v3 = vmul.f32 0.25, %v9748_v63 }
 0x34f   : > { %9739 = vst [vmem:[#allocation98_spill] sm:$0xff] %v8780_v42  ;;  %9740 = vst [vmem:[#allocation99_spill] sm:$0xff] %v8782_v27  ;;  %v9747_v27 = vld [vmem:[#allocation34_spill] sm:$0xff]  ;;  %v9749_v30 = vld [vmem:[#allocation32_spill] sm:$0xff]  ;;  %v6472_v22 = vrot.slane %v4698_v56, 9  ;;  %v6473_v5 = vrot.slane %v4697_v24, 9  ;;  %v4751_v63 = vcombine.high %v7014_v55, %v7014_v55 }
 0x350   : > { %9741 = vst [vmem:[#allocation100_spill] sm:$0xff] %v8784_v0  ;;  %9742 = vst [vmem:[#allocation101_spill] sm:$0xff] %v8786_v21  ;;  %v5522_v16 = vmul.f32 0.25, %v9747_v27  ;;  %v5524_v45 = vmul.f32 0.25, %v9749_v30  ;;  %v5585_v52 = vpack.c.bf16 %v5521_v44, %v5521_v44  ;;  %v8814_v39 = vadd.f32 %v6464_v8, %v4664_v10  ;;  %v9753_v42 = vld [vmem:[#allocation36_spill] sm:$0xff]  ;;  %v9756_v10 = vld [vmem:[#allocation37_spill] sm:$0xff] }
 0x351   : > { %9745 = vst [vmem:[#allocation102_spill] sm:$0xff] %v8795_v58  ;;  %v7013_v58 = vld [vmem:[%s7732_s18 + $0xe8] sm:$0xff]  ;;  %v4732_v12 = vcombine.high %v9753_v42, %v9753_v42  ;;  %v8822_v44 = vcombine.high %v4697_v24, %v4697_v24  ;;  %s7372_s18 = smov [#allocation19]  }
 0x352   : > { %v4717_v60 = vcombine.high %v7013_v58, %v7013_v58  ;;  %v5586_v30 = vpack.c.bf16 %v5522_v16, %v5522_v16  ;;  %9751 = vst [vmem:[#allocation34_spill] sm:$0xff] %v8814_v39  ;;  %v8816_v58 = vadd.f32 %v6465_v57, %v4663_v46  ;;  %v8824_v16 = vadd.f32 %v6472_v22, %v4698_v56  ;;  %s7274_s16 = sshll.u32 %s7372_s18, 4  ;;  %s7275_s16 = int_to_ptr.vmem [resolvable:$false] %s7274_s16 }
 0x353   : > { %9754 = vst [vmem:[#allocation32_spill] sm:$0xff] %v8822_v44  ;;  %v4766_v57 = vcombine.high %v9756_v10, %v9756_v10  ;;  %v8829_v46 = vadd.f32 %v6473_v5, %v4697_v24  ;;  %v8834_v8 = vunpack.c.l.b16 %v5585_v52  ;;  %v9766_v52 = vld [vmem:[#allocation38_spill] sm:$0xff]  ;;  %s7276_s20 = scalar_lea.vmem %s7275_s16, 2048  ;;  %p7277_p2 = scmp.lt.s32.totalorder %s9544_s14, %s7275_s16 }
 0x354   : > { %9752 = vst [vmem:[#allocation31_spill] sm:$0xff] %v8816_v58  ;;  %9755 = vst [vmem:[#allocation36_spill] sm:$0xff] %v8824_v16  ;;  %v8836_v42 = vunpack.c.l.b16 %v5586_v30  ;;  %p7278_p8 = scmp.lt.s32.totalorder %s7276_s20, %s7270_s21 }
 0x355   : > { %9757 = vst [vmem:[#allocation37_spill] sm:$0xff] %v8829_v46  ;;  %9760 = vst [vmem:[#allocation103_spill] sm:$0xff] %v8834_v8 }
 0x356   : > { %9761 = vst [vmem:[#allocation104_spill] sm:$0xff] %v8836_v42  ;;  %p7279_p4 = por %p7278_p8, %p7277_p2 }
 0x357   : > { %v8793_v32 = vpop.f32.mrb[56].mxu0 }
 0x358   : > { %9744 = vst [vmem:[#allocation30_spill] sm:$0xff] %v8793_v32  ;;  %v8799_v40 = vpop.f32.mrb[57].mxu0  ;;  %p7280_p10 = pnand %p7279_p4, %p7273_p0 }
 0x359   : > { %v6543_v43 = vpop.f32.mrb[0].mxu1  ;;  %v8803_v31 = vpop.f32.mrb[58].mxu0 }
 0x35a   : > { %v6544_v15 = vpop.f32.mrb[1].mxu1  ;;  %9750 = vst [vmem:[#allocation33_spill] sm:$0xff] %v8803_v31 }
 0x35b   : > { %v6545_v0 = vadd.f32 %v6544_v15, %v6543_v43  ;;  %v6546_v20 = vpop.f32.mrb[2].mxu1  ;;  %v8808_v15 = vpop.f32.mrb[59].mxu0 }
 0x35c   : > { %v6547_v59 = vpop.f32.mrb[3].mxu1 }
 0x35d   : > { %v2114_v27 = vadd.f32 %v6545_v0, %v8791_v13  ;;  %v6548_v43 = vadd.f32 %v6547_v59, %v6546_v20  ;;  %v5584_v0 = vpack.c.bf16 %v5520_v3, %v5520_v3  ;;  %v5588_v59 = vpack.c.bf16 %v5524_v45, %v5524_v45  ;;  %v9758_v45 = vld [vmem:[#allocation35_spill] sm:$0xff] }
 0x35e   : > { %v4731_v20 = vrot.slane %v4717_v60, %v7754_v7  ;;  %v8832_v3 = vmul.f32 0.25, %v9758_v45  ;;  %v5528_v45 = vmul.f32 0.25, %v9766_v52 }
 0x35f   : > { %v2275_v11 = vadd.f32 %v8526_v29, %v2114_v27  ;;  %v2117_v51 = vadd.f32 %v6548_v43, %v8791_v13  ;;  %v4765_v29 = vrot.slane %v4751_v63, %v7754_v7  ;;  %v8841_v60 = vunpack.c.l.b16 %v5588_v59 }
 0x360   : > { %9759 = vst [vmem:[#allocation35_spill] sm:$0xff] %v8832_v3  ;;  %v6480_v27 = vrot.slane %v4732_v12, 9  ;;  %v6481_v43 = vrot.slane %v4731_v20, 9  ;;  %v8844_v24 = vcombine.high %v4731_v20, %v4731_v20  ;;  %v6488_v63 = vrot.slane %v4766_v57, 9 }
 0x361   : > { %v2401_v21 = vmax.f32 %v2275_v11, 0.0  ;;  %v2278_v55 = vadd.f32 %v8530_v4, %v2117_v51  ;;  %v8838_v11 = vunpack.c.l.b16 %v5584_v0  ;;  %v9763_v4 = vld [vmem:[#allocation40_spill] sm:$0xff]  ;;  %v6489_v10 = vrot.slane %v4765_v29, 9 }
 0x362   : > { %v5529_v51 = vmul.f32 0.25, %v9763_v4  ;;  %9764 = vst [vmem:[#allocation40_spill] sm:$0xff] %v8841_v60  ;;  %9765 = vst [vmem:[#allocation106_spill] sm:$0xff] %v8844_v24  ;;  %v9767_v4 = vld [vmem:[#allocation41_spill] sm:$0xff]  ;;  %v8853_v24 = vadd.f32 %v6480_v27, %v4732_v12  ;;  %v8855_v52 = vadd.f32 %v6481_v43, %v4731_v20  ;;  %v8857_v44 = vcombine.high %v4765_v29, %v4765_v29  ;;  %v9775_v43 = vld [vmem:[#allocation42_spill] sm:$0xff] }
 0x363   : > { %9762 = vst [vmem:[#allocation105_spill] sm:$0xff] %v8838_v11  ;;  %v2465_v22 = vcombine.high %v2401_v21, %v2401_v21  ;;  %v2402_v56 = vmax.f32 %v2278_v55, 0.0  ;;  %v2472_v5 = vrot.slane %v2401_v21, %v7754_v7  ;;  %v5530_v3 = vmul.f32 0.25, %v9767_v4  ;;  %v9768_v55 = vld [vmem:[#allocation39_spill] sm:$0xff] }
 0x364   : > { %v5532_v59 = vmul.f32 0.25, %v9768_v55  ;;  %v5593_v46 = vpack.c.bf16 %v5529_v51, %v5529_v51  ;;  %9769 = vst [vmem:[#allocation38_spill] sm:$0xff] %v8853_v24  ;;  %9770 = vst [vmem:[#allocation41_spill] sm:$0xff] %v8855_v52  ;;  %v8859_v42 = vadd.f32 %v6488_v63, %v4766_v57  ;;  %v8861_v4 = vadd.f32 %v6489_v10, %v4765_v29 }
 0x365   : > { %v6549_v30 = vpop.f32.mrb[4].mxu1  ;;  %v2479_v58 = vrot.slane %v2465_v22, %v7754_v7  ;;  %v2489_v21 = vrot.slane %v2402_v56, %v7754_v7  ;;  %9771 = vst [vmem:[#allocation39_spill] sm:$0xff] %v8857_v44  ;;  %v2480_v0 = vcombine.high %v2472_v5, %v2472_v5  ;;  %v5592_v55 = vpack.c.bf16 %v5528_v45, %v5528_v45 }
 0x366   : > { %v6550_v60 = vpop.f32.mrb[5].mxu1  ;;  %9772 = vst [vmem:[#allocation107_spill] sm:$0xff] %v8859_v42  ;;  %9773 = vst [vmem:[#allocation108_spill] sm:$0xff] %v8861_v4  ;;  %v2482_v51 = vcombine.high %v2402_v56, %v2402_v56  ;;  %v5594_v8 = vpack.c.bf16 %v5530_v3, %v5530_v3  ;;  %v5596_v22 = vpack.c.bf16 %v5532_v59, %v5532_v59  ;;  %v6228_v20 = vrot.slane %v2472_v5, 9 }
 0x367   : > { %v6551_v16 = vadd.f32 %v6550_v60, %v6549_v30  ;;  %v6552_v39 = vpop.f32.mrb[6].mxu1  ;;  %v8864_v30 = vunpack.c.l.b16 %v5593_v46  ;;  %v2481_v12 = vcombine.high %v2479_v58, %v2479_v58  ;;  %v2497_v27 = vcombine.high %v2489_v21, %v2489_v21 }
 0x368   : > { %v6553_v11 = vpop.f32.mrb[7].mxu1  ;;  %v8867_v52 = vmul.f32 0.25, %v9775_v43  ;;  %v6229_v24 = vrot.slane %v2480_v0, 9  ;;  %v8871_v63 = vunpack.c.l.b16 %v5592_v55  ;;  %v6230_v3 = vrot.slane %v2479_v58, 9 }
 0x369   : > { %v2122_v48 = vadd.f32 %v6551_v16, %v8791_v13  ;;  %v6554_v60 = vadd.f32 %v6553_v11, %v6552_v39  ;;  %9774 = vst [vmem:[#allocation109_spill] sm:$0xff] %v8864_v30  ;;  %v2496_v56 = vrot.slane %v2482_v51, %v7754_v7  ;;  %v6232_v16 = vrot.slane %v2489_v21, 9 }
 0x36a   : > { %9776 = vst [vmem:[#allocation42_spill] sm:$0xff] %v8867_v52  ;;  %9777 = vst [vmem:[#allocation110_spill] sm:$0xff] %v8871_v63  ;;  %v8874_v39 = vunpack.c.l.b16 %v5594_v8  ;;  %v8876_v46 = vunpack.c.l.b16 %v5596_v22  ;;  %v6231_v59 = vrot.slane %v2481_v12, 9  ;;  %v3521_v43 = vadd.f32 %v6228_v20, %v2472_v5 }
 0x36b   : > { %v2283_v57 = vadd.f32 %v8523_v54, %v2122_v48  ;;  %v2125_v29 = vadd.f32 %v6554_v60, %v8791_v13  ;;  %v6233_v54 = vrot.slane %v2497_v27, 9  ;;  %v3522_v48 = vadd.f32 %v6229_v24, %v2480_v0 }
 0x36c   : > { %9778 = vst [vmem:[#allocation111_spill] sm:$0xff] %v8874_v39  ;;  %9779 = vst [vmem:[#allocation112_spill] sm:$0xff] %v8876_v46  ;;  %v3523_v52 = vadd.f32 %v6230_v3, %v2479_v58  ;;  %v2498_v51 = vcombine.high %v2496_v56, %v2496_v56  ;;  %v6234_v4 = vrot.slane %v2496_v56, 9  ;;  %v3525_v8 = vadd.f32 %v6232_v16, %v2489_v21 }
 0x36d   : > { %v2403_v11 = vmax.f32 %v2283_v57, 0.0  ;;  %v2286_v10 = vadd.f32 %v8528_v33, %v2125_v29  ;;  %v3524_v45 = vadd.f32 %v6231_v59, %v2481_v12  ;;  %v3526_v30 = vadd.f32 %v6233_v54, %v2497_v27 }
 0x36e   : > { %v3527_v44 = vadd.f32 %v6234_v4, %v2496_v56  ;;  %v6235_v56 = vrot.slane %v2498_v51, 9 }
 0x36f   : > { %v2499_v60 = vcombine.high %v2403_v11, %v2403_v11  ;;  %v2506_v55 = vrot.slane %v2403_v11, %v7754_v7  ;;  %v2404_v63 = vmax.f32 %v2286_v10, 0.0 }
 0x371   : > { %v6555_v42 = vpop.f32.mrb[8].mxu1  ;;  %v2513_v22 = vrot.slane %v2499_v60, %v7754_v7  ;;  %v2514_v57 = vcombine.high %v2506_v55, %v2506_v55  ;;  %v6236_v46 = vrot.slane %v2506_v55, 9  ;;  %v2516_v33 = vcombine.high %v2404_v63, %v2404_v63 }
 0x372   : > { %v6556_v29 = vpop.f32.mrb[9].mxu1  ;;  %v2523_v5 = vrot.slane %v2404_v63, %v7754_v7 }
 0x373   : > { %v6557_v24 = vadd.f32 %v6556_v29, %v6555_v42  ;;  %v6558_v0 = vpop.f32.mrb[10].mxu1  ;;  %v2515_v20 = vcombine.high %v2513_v22, %v2513_v22  ;;  %v6237_v11 = vrot.slane %v2514_v57, 9  ;;  %v6238_v10 = vrot.slane %v2513_v22, 9 }
 0x374   : > { %v3529_v58 = vadd.f32 %v6236_v46, %v2506_v55  ;;  %v6559_v3 = vpop.f32.mrb[11].mxu1  ;;  %v2530_v21 = vrot.slane %v2516_v33, %v7754_v7  ;;  %v2531_v16 = vcombine.high %v2523_v5, %v2523_v5  ;;  %v6240_v60 = vrot.slane %v2523_v5, 9 }
 0x375   : > { %v6239_v6 = vrot.slane %v2515_v20, 9  ;;  %v3530_v38 = vadd.f32 %v6237_v11, %v2514_v57  ;;  %v3531_v41 = vadd.f32 %v6238_v10, %v2513_v22  ;;  %v2130_v4 = vadd.f32 %v6557_v24, %v8791_v13  ;;  %v6995_v57 = vld [vmem:[#allocation13] sm:$0xff]   ;;  %v6996_v22 = vld [vmem:[#allocation13 + $0x8] sm:$0xff]  }
 0x376   : > { %v3649_v36 = vadd.f32 %v3529_v58, %v3521_v43  ;;  %v2532_v12 = vcombine.high %v2530_v21, %v2530_v21  ;;  %v6241_v27 = vrot.slane %v2531_v16, 9  ;;  %v6242_v59 = vrot.slane %v2530_v21, 9  ;;  %6747 = vmatprep.subr.bf16.mxu0 %v6995_v57 }
 0x377   : > { %v3533_v63 = vadd.f32 %v6240_v60, %v2523_v5  ;;  %v3532_v42 = vadd.f32 %v6239_v6, %v2515_v20  ;;  %v3650_v54 = vadd.f32 %v3530_v38, %v3522_v48  ;;  %v3651_v29 = vadd.f32 %v3531_v41, %v3523_v52  ;;  %6748 = vmatpush3.bf16.msra.mxu0 %v6995_v57 }
 0x378   : > { %v3713_v34 = vmul.f32 0.25, %v3649_v36  ;;  %v3534_v61 = vadd.f32 %v6241_v27, %v2531_v16  ;;  %v3535_v46 = vadd.f32 %v6242_v59, %v2530_v21  ;;  %v6243_v43 = vrot.slane %v2532_v12, 9  ;;  %6749 = vmatprep.subr.bf16.mxu0 %v6996_v22 }
 0x379   : > { %v3653_v55 = vadd.f32 %v3533_v63, %v3525_v8  ;;  %v3652_v33 = vadd.f32 %v3532_v42, %v3524_v45  ;;  %v3714_v18 = vmul.f32 0.25, %v3650_v54  ;;  %v3715_v1 = vmul.f32 0.25, %v3651_v29 }
 0x37a   : > { %v3654_v11 = vadd.f32 %v3534_v61, %v3526_v30  ;;  %v3655_v10 = vadd.f32 %v3535_v46, %v3527_v44  ;;  %v3777_v6 = vpack.c.bf16 %v3713_v34, %v3713_v34  ;;  %v2291_v8 = vadd.f32 %v8544_v17, %v2130_v4 }
 0x37b   : > { %v3717_v58 = vmul.f32 0.25, %v3653_v55  ;;  %v3716_v5 = vmul.f32 0.25, %v3652_v33  ;;  %v3778_v38 = vpack.c.bf16 %v3714_v18, %v3714_v18  ;;  %v3779_v41 = vpack.c.bf16 %v3715_v1, %v3715_v1  ;;  %6750 = vmatpush3.bf16.msra.mxu0 %v6996_v22 }
 0x37c   : > { %v3718_v52 = vmul.f32 0.25, %v3654_v11  ;;  %v3528_v24 = vadd.f32 %v6235_v56, %v2498_v51  ;;  %v6560_v16 = vadd.f32 %v6559_v3, %v6558_v0  ;;  %v3536_v34 = vadd.f32 %v6243_v43, %v2532_v12 }
 0x37d   : > { %v3781_v48 = vpack.c.bf16 %v3717_v58, %v3717_v58  ;;  %v6561_v45 = vpop.f32.mrb[12].mxu1  ;;  %v3780_v20 = vpack.c.bf16 %v3716_v5, %v3716_v5  ;;  %v3917_v21 = vunpack.c.l.b16 %v3778_v38  ;;  %v8887_v44 = vunpack.c.l.b16 %v3779_v41 }
 0x37e   : > { %v6562_v61 = vpop.f32.mrb[13].mxu1  ;;  %v2405_v18 = vmax.f32 %v2291_v8, 0.0  ;;  %v3916_v60 = vunpack.c.l.b16 %v3777_v6  ;;  %v3782_v59 = vpack.c.bf16 %v3718_v52, %v3718_v52  ;;  %v2133_v63 = vadd.f32 %v6560_v16, %v8791_v13 }
 0x37f   : > { %v6563_v1 = vadd.f32 %v6562_v61, %v6561_v45  ;;  %v6564_v30 = vpop.f32.mrb[14].mxu1  ;;  %v3980_v27 = vrot.slane %v3917_v21, 7  ;;  %v8890_v42 = vmul.f32 0.25, %v3655_v10  ;;  %v8892_v51 = vunpack.c.l.b16 %v3781_v48 }
 0x380   : > { %v6565_v17 = vpop.f32.mrb[15].mxu1  ;;  %v2533_v54 = vcombine.high %v2405_v18, %v2405_v18  ;;  %v2540_v0 = vrot.slane %v2405_v18, %v7754_v7  ;;  %v8895_v3 = vunpack.c.l.b16 %v3780_v20  ;;  %v2294_v29 = vadd.f32 %v8548_v62, %v2133_v63 }
 0x381   : > { %v8898_v12 = vsel %vm3981_vm1, %v3980_v27, %v3916_v60  ;;  %v2138_v46 = vadd.f32 %v6563_v1, %v8791_v13  ;;  %v6566_v33 = vadd.f32 %v6565_v17, %v6564_v30  ;;  %v8904_v57 = vunpack.c.l.b16 %v3782_v59 }
 0x382   : > { %v2547_v4 = vrot.slane %v2533_v54, %v7754_v7  ;;  %v2548_v56 = vcombine.high %v2540_v0, %v2540_v0  ;;  %v2406_v43 = vmax.f32 %v2294_v29, 0.0  ;;  %v3656_v11 = vadd.f32 %v3536_v34, %v3528_v24 }
 0x383   : > { %v2299_v22 = vadd.f32 %v8541_v23, %v2138_v46  ;;  %v6244_v58 = vrot.slane %v2540_v0, 9  ;;  %v2141_v52 = vadd.f32 %v6566_v33, %v8791_v13 }
 0x384   : > { %v2549_v10 = vcombine.high %v2547_v4, %v2547_v4  ;;  %v6245_v5 = vrot.slane %v2548_v56, 9  ;;  %v6246_v6 = vrot.slane %v2547_v4, 9  ;;  %v2550_v38 = vcombine.high %v2406_v43, %v2406_v43 }
 0x385   : > { %v2557_v62 = vrot.slane %v2406_v43, %v7754_v7  ;;  %v2407_v41 = vmax.f32 %v2299_v22, 0.0  ;;  %v3537_v61 = vadd.f32 %v6244_v58, %v2540_v0  ;;  %v2302_v1 = vadd.f32 %v8546_v25, %v2141_v52 }
 0x386   : > { %v6247_v45 = vrot.slane %v2549_v10, 9  ;;  %v2564_v23 = vrot.slane %v2550_v38, %v7754_v7  ;;  %v3538_v34 = vadd.f32 %v6245_v5, %v2548_v56  ;;  %v3539_v60 = vadd.f32 %v6246_v6, %v2547_v4 }
 0x387   : > { %v2565_v24 = vcombine.high %v2557_v62, %v2557_v62  ;;  %v6248_v21 = vrot.slane %v2557_v62, 9  ;;  %v2567_v16 = vcombine.high %v2407_v41, %v2407_v41  ;;  %v2574_v18 = vrot.slane %v2407_v41, %v7754_v7 }
 0x388   : > { %v3540_v27 = vadd.f32 %v6247_v45, %v2549_v10  ;;  %v2566_v59 = vcombine.high %v2564_v23, %v2564_v23  ;;  %v8916_v17 = vmul.f32 0.25, %v3656_v11  ;;  %v2408_v33 = vmax.f32 %v2302_v1, 0.0 }
 0x389   : > { %v6567_v30 = vpop.f32.mrb[16].mxu1  ;;  %v2581_v54 = vrot.slane %v2567_v16, %v7754_v7  ;;  %v2582_v29 = vcombine.high %v2574_v18, %v2574_v18  ;;  %v6252_v46 = vrot.slane %v2574_v18, 9  ;;  %v6249_v22 = vrot.slane %v2565_v24, 9 }
 0x38a   : > { %v6568_v63 = vpop.f32.mrb[17].mxu1  ;;  %v6250_v0 = vrot.slane %v2564_v23, 9  ;;  %v3541_v56 = vadd.f32 %v6248_v21, %v2557_v62  ;;  %v6251_v10 = vrot.slane %v2566_v59, 9  ;;  %v2584_v6 = vcombine.high %v2408_v33, %v2408_v33  ;;  %v9780_v21 = vld [vmem:[#allocation44_spill] sm:$0xff] }
 0x38b   : > { %v6570_v43 = vpop.f32.mrb[18].mxu1  ;;  %v6569_v58 = vadd.f32 %v6568_v63, %v6567_v30  ;;  %v2583_v38 = vcombine.high %v2581_v54, %v2581_v54  ;;  %v6253_v25 = vrot.slane %v2582_v29, 9  ;;  %v6254_v41 = vrot.slane %v2581_v54, 9 }
 0x38c   : > { %v6571_v5 = vpop.f32.mrb[19].mxu1  ;;  %v3545_v4 = vadd.f32 %v6252_v46, %v2574_v18  ;;  %v2591_v11 = vrot.slane %v2408_v33, %v7754_v7  ;;  %v2598_v8 = vrot.slane %v2584_v6, %v7754_v7  ;;  %v3542_v2 = vadd.f32 %v6249_v22, %v2565_v24 }
 0x38d   : > { %v2146_v52 = vadd.f32 %v6569_v58, %v8791_v13  ;;  %v6255_v45 = vrot.slane %v2583_v38, 9  ;;  %v3546_v16 = vadd.f32 %v6253_v25, %v2582_v29  ;;  %v3547_v36 = vadd.f32 %v6254_v41, %v2581_v54 }
 0x38e   : > { %v3657_v1 = vadd.f32 %v3545_v4, %v3537_v61  ;;  %v2599_v48 = vcombine.high %v2591_v11, %v2591_v11  ;;  %v6256_v62 = vrot.slane %v2591_v11, 9  ;;  %v2600_v46 = vcombine.high %v2598_v8, %v2598_v8 }
 0x38f   : > { %v2307_v30 = vadd.f32 %v9780_v21, %v2146_v52  ;;  %v3548_v63 = vadd.f32 %v6255_v45, %v2583_v38  ;;  %v3658_v55 = vadd.f32 %v3546_v16, %v3538_v34  ;;  %v3659_v20 = vadd.f32 %v3547_v36, %v3539_v60 }
 0x390   : > { %v3721_v18 = vmul.f32 0.25, %v3657_v1  ;;  %v6257_v39 = vrot.slane %v2599_v48, 9  ;;  %v6258_v26 = vrot.slane %v2598_v8, 9  ;;  %v3549_v33 = vadd.f32 %v6256_v62, %v2591_v11 }
 0x391   : > { %v3660_v58 = vadd.f32 %v3548_v63, %v3540_v27  ;;  %v3722_v14 = vmul.f32 0.25, %v3658_v55  ;;  %v3723_v29 = vmul.f32 0.25, %v3659_v20  ;;  %v3543_v54 = vadd.f32 %v6250_v0, %v2564_v23 }
 0x392   : > { %v3550_v61 = vadd.f32 %v6257_v39, %v2599_v48  ;;  %v3551_v25 = vadd.f32 %v6258_v26, %v2598_v8  ;;  %v3661_v41 = vadd.f32 %v3549_v33, %v3541_v56  ;;  %v3785_v6 = vpack.c.bf16 %v3721_v18, %v3721_v18 }
 0x393   : > { %v3724_v4 = vmul.f32 0.25, %v3660_v58  ;;  %v3786_v53 = vpack.c.bf16 %v3722_v14, %v3722_v14  ;;  %v6259_v52 = vrot.slane %v2600_v46, 9  ;;  %v3787_v34 = vpack.c.bf16 %v3723_v29, %v3723_v29  ;;  %v9781_v58 = vld [vmem:[#allocation46_spill] sm:$0xff] }
 0x394   : > { %v3662_v36 = vadd.f32 %v3550_v61, %v3542_v2  ;;  %v3663_v60 = vadd.f32 %v3551_v25, %v3543_v54  ;;  %v3725_v45 = vmul.f32 0.25, %v3661_v41  ;;  %v2409_v24 = vmax.f32 %v2307_v30, 0.0 }
 0x395   : > { %v6573_v38 = vpop.f32.mrb[20].mxu1  ;;  %v3788_v1 = vpack.c.bf16 %v3724_v4, %v3724_v4  ;;  %v3925_v11 = vunpack.c.l.b16 %v3786_v53  ;;  %v3544_v39 = vadd.f32 %v6251_v10, %v2566_v59  ;;  %v6572_v8 = vadd.f32 %v6571_v5, %v6570_v43 }
 0x396   : > { %v6574_v16 = vpop.f32.mrb[21].mxu1  ;;  %v3726_v26 = vmul.f32 0.25, %v3662_v36  ;;  %v3789_v48 = vpack.c.bf16 %v3725_v45, %v3725_v45  ;;  %v3924_v14 = vunpack.c.l.b16 %v3785_v6  ;;  %v3552_v22 = vadd.f32 %v6259_v52, %v2600_v46 }
 0x397   : > { %v6576_v27 = vpop.f32.mrb[22].mxu1  ;;  %v4001_v23 = vrot.slane %v3925_v11, 7  ;;  %v2601_v0 = vcombine.high %v2409_v24, %v2409_v24  ;;  %v8925_v2 = vunpack.c.l.b16 %v3787_v34  ;;  %v8927_v56 = vunpack.c.l.b16 %v3788_v1  ;;  %v9782_v34 = vld [vmem:[#allocation43_spill] sm:$0xff] }
 0x398   : > { %v6577_v20 = vpop.f32.mrb[23].mxu1  ;;  %v2608_v53 = vrot.slane %v2409_v24, %v7754_v7  ;;  %v2149_v62 = vadd.f32 %v6572_v8, %v8791_v13  ;;  %v3790_v59 = vpack.c.bf16 %v3726_v26, %v3726_v26  ;;  %v6575_v43 = vadd.f32 %v6574_v16, %v6573_v38  ;;  %v9783_v8 = vld [vmem:[#allocation45_spill] sm:$0xff] }
 0x399   : > { %v8932_v21 = vsel %vm3981_vm1, %v4001_v23, %v3924_v14  ;;  %v2615_v10 = vrot.slane %v2601_v0, %v7754_v7  ;;  %v8935_v5 = vmul.f32 0.25, %v3663_v60  ;;  %v8937_v30 = vunpack.c.l.b16 %v3789_v48 }
 0x39a   : > { %v2616_v63 = vcombine.high %v2608_v53, %v2608_v53  ;;  %v6260_v18 = vrot.slane %v2608_v53, 9  ;;  %v2310_v29 = vadd.f32 %v9781_v58, %v2149_v62  ;;  %v2154_v54 = vadd.f32 %v6575_v43, %v8791_v13 }
 0x39b   : > { %v2617_v46 = vcombine.high %v2615_v10, %v2615_v10  ;;  %v6262_v33 = vrot.slane %v2615_v10, 9  ;;  %v6578_v41 = vadd.f32 %v6577_v20, %v6576_v27  ;;  %v3664_v4 = vadd.f32 %v3552_v22, %v3544_v39 }
 0x39c   : > { %v6261_v25 = vrot.slane %v2616_v63, 9  ;;  %v8943_v52 = vunpack.c.l.b16 %v3790_v59  ;;  %v2410_v38 = vmax.f32 %v2310_v29, 0.0  ;;  %v2315_v36 = vadd.f32 %v9782_v34, %v2154_v54 }
 0x39d   : > { %v6263_v45 = vrot.slane %v2617_v46, 9  ;;  %v3553_v16 = vadd.f32 %v6260_v18, %v2608_v53  ;;  %v2157_v1 = vadd.f32 %v6578_v41, %v8791_v13  ;;  %v3555_v11 = vadd.f32 %v6262_v33, %v2615_v10 }
 0x39e   : > { %v2618_v24 = vcombine.high %v2410_v38, %v2410_v38  ;;  %v2625_v26 = vrot.slane %v2410_v38, %v7754_v7  ;;  %v2411_v48 = vmax.f32 %v2315_v36, 0.0  ;;  %v3554_v39 = vadd.f32 %v6261_v25, %v2616_v63 }
 0x39f   : > { %v2318_v20 = vadd.f32 %v9783_v8, %v2157_v1  ;;  %v8950_v23 = vmul.f32 0.25, %v3664_v4  ;;  %v3556_v43 = vadd.f32 %v6263_v45, %v2617_v46 }
 0x3a0   : > { %v2632_v0 = vrot.slane %v2618_v24, %v7754_v7  ;;  %v2633_v53 = vcombine.high %v2625_v26, %v2625_v26  ;;  %v6264_v62 = vrot.slane %v2625_v26, 9  ;;  %v2635_v59 = vcombine.high %v2411_v48, %v2411_v48 }
 0x3a1   : > { %v6579_v27 = vpop.f32.mrb[24].mxu1  ;;  %v2642_v18 = vrot.slane %v2411_v48, %v7754_v7  ;;  %v2412_v33 = vmax.f32 %v2318_v20, 0.0 }
 0x3a2   : > { %v6580_v14 = vpop.f32.mrb[25].mxu1  ;;  %v2634_v29 = vcombine.high %v2632_v0, %v2632_v0  ;;  %v6265_v54 = vrot.slane %v2633_v53, 9  ;;  %v6266_v25 = vrot.slane %v2632_v0, 9  ;;  %v3557_v41 = vadd.f32 %v6264_v62, %v2625_v26 }
 0x3a3   : > { %v8955_v10 = vpop.f32.mrb[26].mxu1  ;;  %v6581_v63 = vadd.f32 %v6580_v14, %v6579_v27  ;;  %v2649_v4 = vrot.slane %v2635_v59, %v7754_v7  ;;  %v2650_v38 = vcombine.high %v2642_v18, %v2642_v18  ;;  %v6268_v34 = vrot.slane %v2642_v18, 9 }
 0x3a4   : > { %v8958_v58 = vpop.f32.mrb[27].mxu1  ;;  %v2652_v36 = vcombine.high %v2412_v33, %v2412_v33  ;;  %v6267_v1 = vrot.slane %v2634_v29, 9  ;;  %v3558_v24 = vadd.f32 %v6265_v54, %v2633_v53  ;;  %v3559_v8 = vadd.f32 %v6266_v25, %v2632_v0 }
 0x3a5   : > { %v2659_v46 = vrot.slane %v2412_v33, %v7754_v7  ;;  %v2651_v45 = vcombine.high %v2649_v4, %v2649_v4  ;;  %v6269_v48 = vrot.slane %v2650_v38, 9  ;;  %v6270_v20 = vrot.slane %v2649_v4, 9 }
 0x3a6   : > { %v3561_v27 = vadd.f32 %v6268_v34, %v2642_v18  ;;  %v3560_v14 = vadd.f32 %v6267_v1, %v2634_v29  ;;  %v2666_v60 = vrot.slane %v2652_v36, %v7754_v7 }
 0x3a7   : > { %v2667_v6 = vcombine.high %v2659_v46, %v2659_v46  ;;  %v6272_v61 = vrot.slane %v2659_v46, 9  ;;  %v6271_v26 = vrot.slane %v2651_v45, 9  ;;  %v3562_v62 = vadd.f32 %v6269_v48, %v2650_v38 }
 0x3a8   : > { %v3563_v59 = vadd.f32 %v6270_v20, %v2649_v4  ;;  %v3665_v22 = vadd.f32 %v3561_v27, %v3553_v16  ;;  %v2668_v55 = vcombine.high %v2666_v60, %v2666_v60  ;;  %v6274_v19 = vrot.slane %v2666_v60, 9 }
 0x3a9   : > { %v6273_v9 = vrot.slane %v2667_v6, 9  ;;  %v3565_v53 = vadd.f32 %v6272_v61, %v2659_v46  ;;  %v3564_v0 = vadd.f32 %v6271_v26, %v2651_v45  ;;  %v3666_v54 = vadd.f32 %v3562_v62, %v3554_v39 }
 0x3aa   : > { %v3667_v33 = vadd.f32 %v3563_v59, %v3555_v11  ;;  %v3729_v25 = vmul.f32 0.25, %v3665_v22  ;;  %v6275_v49 = vrot.slane %v2668_v55, 9  ;;  %v3567_v18 = vadd.f32 %v6274_v19, %v2666_v60 }
 0x3ab   : > { %v3566_v31 = vadd.f32 %v6273_v9, %v2667_v6  ;;  %v3669_v29 = vadd.f32 %v3565_v53, %v3557_v41  ;;  %v3668_v36 = vadd.f32 %v3564_v0, %v3556_v43  ;;  %v3730_v1 = vmul.f32 0.25, %v3666_v54  ;;  %v9784_v53 = vld [vmem:[#allocation48_spill] sm:$0xff] }
 0x3ac   : > { %v3731_v32 = vmul.f32 0.25, %v3667_v33  ;;  %v3793_v38 = vpack.c.bf16 %v3729_v25, %v3729_v25  ;;  %v3568_v16 = vadd.f32 %v6275_v49, %v2668_v55  ;;  %v3671_v20 = vadd.f32 %v3567_v18, %v3559_v8 }
 0x3ad   : > { %v8963_v34 = vpop.f32.mrb[28].mxu1  ;;  %v3670_v48 = vadd.f32 %v3566_v31, %v3558_v24  ;;  %v3733_v61 = vmul.f32 0.25, %v3669_v29  ;;  %v3732_v11 = vmul.f32 0.25, %v3668_v36  ;;  %v3794_v39 = vpack.c.bf16 %v3730_v1, %v3730_v1 }
 0x3ae   : > { %v8965_v4 = vpop.f32.mrb[29].mxu1  ;;  %v3795_v22 = vpack.c.bf16 %v3731_v32, %v3731_v32  ;;  %v3932_v9 = vunpack.c.l.b16 %v3793_v38  ;;  %v3672_v6 = vadd.f32 %v3568_v16, %v3560_v14  ;;  %v3735_v43 = vmul.f32 0.25, %v3671_v20 }
 0x3af   : > { %v8967_v46 = vpop.f32.mrb[30].mxu1  ;;  %v3734_v60 = vmul.f32 0.25, %v3670_v48  ;;  %v3797_v41 = vpack.c.bf16 %v3733_v61, %v3733_v61  ;;  %v3796_v45 = vpack.c.bf16 %v3732_v11, %v3732_v11  ;;  %v3933_v27 = vunpack.c.l.b16 %v3794_v39 }
 0x3b0   : > { %v8969_v19 = vpop.f32.mrb[31].mxu1  ;;  %v3934_v26 = vunpack.c.l.b16 %v3795_v22  ;;  %v2162_v49 = vadd.f32 %v6581_v63, %v8791_v13  ;;  %v3736_v31 = vmul.f32 0.25, %v3672_v6  ;;  %v3799_v24 = vpack.c.bf16 %v3735_v43, %v3735_v43 }
 0x3b1   : > { %v3798_v55 = vpack.c.bf16 %v3734_v60, %v3734_v60  ;;  %v3936_v8 = vunpack.c.l.b16 %v3797_v41  ;;  %v3935_v62 = vunpack.c.l.b16 %v3796_v45  ;;  %v4015_v32 = vrot.slane %v3933_v27, 7 }
 0x3b2   : > { %v4017_v59 = vrot.slane %v3934_v26, 6  ;;  %v2323_v0 = vadd.f32 %v9784_v53, %v2162_v49  ;;  %v3800_v14 = vpack.c.bf16 %v3736_v31, %v3736_v31  ;;  %v3792_v33 = vpack.c.bf16 %v8950_v23, %v8950_v23 }
 0x3b3   : > { %v3937_v54 = vunpack.c.l.b16 %v3798_v55  ;;  %v9785_v25 = vpack.c.bf16 %v8890_v42, %v8890_v42  ;;  %v4016_v18 = vsel %vm3981_vm1, %v4015_v32, %v3932_v9  ;;  %v4019_v29 = vrot.slane %v3935_v62, 5 }
 0x3b4   : > { %v3938_v36 = vunpack.c.l.b16 %v3799_v24  ;;  %v2413_v1 = vmax.f32 %v2323_v0, 0.0  ;;  %v4018_v38 = vsel %vm3984_vm2, %v4017_v59, %v4016_v18  ;;  %v3939_v16 = vunpack.c.l.b16 %v3800_v14 }
 0x3b5   : > { %v3922_v63 = vunpack.c.l.b16 %v9785_v25  ;;  %v4021_v48 = vrot.slane %v3936_v8, 4  ;;  %v4023_v20 = vrot.slane %v3937_v54, 3  ;;  %v4020_v61 = vsel %vm3987_vm3, %v4019_v29, %v4018_v38 }
 0x3b6   : > { %v2669_v11 = vcombine.high %v2413_v1, %v2413_v1  ;;  %v2676_v39 = vrot.slane %v2413_v1, %v7754_v7  ;;  %v9786_v23 = vrot.slane %v8887_v44, 6  ;;  %v9787_v9 = vpack.c.bf16 %v8916_v17, %v8916_v17 }
 0x3b7   : > { %v4022_v22 = vsel %vm3990_vm4, %v4021_v48, %v4020_v61  ;;  %v9788_v60 = vpack.c.bf16 %v8935_v5, %v8935_v5  ;;  %v9789_v41 = vrot.slane %v8895_v3, 5  ;;  %v3931_v49 = vunpack.c.l.b16 %v3792_v33 }
 0x3b8   : > { %v3985_v42 = vsel %vm3984_vm2, %v9786_v23, %v8898_v12  ;;  %v3923_v6 = vunpack.c.l.b16 %v9787_v9  ;;  %v4024_v26 = vsel %vm3993_vm11, %v4023_v20, %v4022_v22  ;;  %v2683_v44 = vrot.slane %v2669_v11, %v7754_v7 }
 0x3b9   : > { %v3930_v43 = vunpack.c.l.b16 %v9788_v60  ;;  %v3988_v45 = vsel %vm3987_vm3, %v9789_v41, %v3985_v42  ;;  %v6591_v27 = vpop.f32.mrb[32].mxu1  ;;  %v2684_v12 = vcombine.high %v2676_v39, %v2676_v39  ;;  %v4025_v55 = vrot.slane %v3938_v36, 2  ;;  %v9795_v60 = vld [vmem:[#allocation47_spill] sm:$0xff]  ;;  %v9796_v41 = vld [vmem:[#allocation49_spill] sm:$0xff] }
 0x3ba   : > { %v6592_v31 = vpop.f32.mrb[33].mxu1  ;;  %v9790_v17 = vrot.slane %v8892_v51, 4  ;;  %v3992_v5 = vrot.slane %v8904_v57, 3  ;;  %v9791_v3 = vrot.slane %v8925_v2, 6  ;;  %v4027_v32 = vrot.slane %v3939_v16, 1 }
 0x3bb   : > { %v6594_v62 = vpop.f32.mrb[34].mxu1  ;;  %v2685_v59 = vcombine.high %v2683_v44, %v2683_v44  ;;  %v6276_v53 = vrot.slane %v2676_v39, 9  ;;  %v3995_v0 = vrot.slane %v3922_v63, 2  ;;  %v6277_v54 = vrot.slane %v2684_v12, 9 }
 0x3bc   : > { %v3991_v24 = vsel %vm3990_vm4, %v9790_v17, %v3988_v45  ;;  %v4004_v8 = vsel %vm3984_vm2, %v9791_v3, %v8932_v21  ;;  %v6595_v14 = vpop.f32.mrb[35].mxu1  ;;  %v3998_v25 = vrot.slane %v3923_v6, 1  ;;  %v9792_v51 = vrot.slane %v8927_v56, 5  ;;  %v9794_v6 = vld [vmem:[#allocation50_spill] sm:$0xff] }
 0x3bd   : > { %v3994_v33 = vsel %vm3993_vm11, %v3992_v5, %v3991_v24  ;;  %v6278_v57 = vrot.slane %v2683_v44, 9  ;;  %v4009_v2 = vrot.slane %v8943_v52, 3  ;;  %v4011_v21 = vrot.slane %v3930_v43, 2 }
 0x3be   : > { %v4006_v18 = vsel %vm3987_vm3, %v9792_v51, %v4004_v8  ;;  %v3997_v29 = vsel %vm3996_vm12, %v3995_v0, %v3994_v33  ;;  %v6279_v36 = vrot.slane %v2685_v59, 9  ;;  %v9793_v63 = vrot.slane %v8937_v30, 4 }
 0x3bf   : > { %v4000_v1 = vsel %vm3999_vm13, %v3998_v25, %v3997_v29  ;;  %v6584_v16 = vadd.f32 %v8958_v58, %v8955_v10  ;;  %v4013_v48 = vrot.slane %v3931_v49, 1  ;;  %v6587_v20 = vadd.f32 %v8965_v4, %v8963_v34 }
 0x3c0   : > { %v4008_v38 = vsel %vm3990_vm4, %v9793_v63, %v4006_v18  ;;  %v6590_v52 = vadd.f32 %v8969_v19, %v8967_v46  ;;  %v6593_v23 = vadd.f32 %v6592_v31, %v6591_v27  ;;  %v6596_v30 = vadd.f32 %v6595_v14, %v6594_v62 }
 0x3c1   : > { %v4010_v56 = vsel %vm3993_vm11, %v4009_v2, %v4008_v38  ;;  %v2165_v11 = vadd.f32 %v6584_v16, %v8791_v13  ;;  %v2170_v22 = vadd.f32 %v6587_v20, %v8791_v13  ;;  %v4026_v58 = vsel %vm3996_vm12, %v4025_v55, %v4024_v26  ;;  %v9797_v26 = vld [vmem:[#allocation52_spill] sm:$0xff] }
 0x3c2   : > { %v4012_v61 = vsel %vm3996_vm12, %v4011_v21, %v4010_v56  ;;  %v2173_v10 = vadd.f32 %v6590_v52, %v8791_v13  ;;  %v2178_v4 = vadd.f32 %v6593_v23, %v8791_v13  ;;  %v2181_v46 = vadd.f32 %v6596_v30, %v8791_v13  ;;  %v9060_v30 = vld [vmem:[#allocation16] sm:$0xff]  }
 0x3c3   : > { %v4014_v42 = vsel %vm3999_vm13, %v4013_v48, %v4012_v61  ;;  %v2326_v34 = vadd.f32 %v9794_v6, %v2165_v11  ;;  %v3569_v19 = vadd.f32 %v6276_v53, %v2676_v39  ;;  %v2331_v43 = vadd.f32 %v9795_v60, %v2170_v22  ;;  %6759 = vmatprep.subr.bf16.mxu0 %v9060_v30 }
 0x3c4   : > { %v4099_v9 = vpack.c.b16 %v4014_v42, %v4000_v1  ;;  %v2334_v45 = vadd.f32 %v9796_v41, %v2173_v10  ;;  %v9035_v27 = vsel %vm3999_vm13, %v4027_v32, %v4026_v58  ;;  %v3570_v49 = vadd.f32 %v6277_v54, %v2684_v12 }
 0x3c5   : > { %v2414_v31 = vmax.f32 %v2326_v34, 0.0  ;;  %v2339_v55 = vadd.f32 %v9797_v26, %v2178_v4  ;;  %v2342_v17 = vadd.f32 %v8614_v28, %v2181_v46  ;;  %v9040_v24 = vpop.f32.mrb[36].mxu1  ;;  %v3571_v5 = vadd.f32 %v6278_v57, %v2683_v44 }
 0x3c6   : > { %6751 = vmatprep.mubr.msk.bf16.mxu0 %vm789_vm5, %v4099_v9  ;;  %v3572_v13 = vadd.f32 %v6279_v36, %v2685_v59  ;;  %v2415_v39 = vmax.f32 %v2331_v43, 0.0  ;;  %v2416_v3 = vmax.f32 %v2334_v45, 0.0  ;;  %v9042_v8 = vpop.f32.mrb[37].mxu1 }
 0x3c7   : > { %v2686_v62 = vcombine.high %v2414_v31, %v2414_v31  ;;  %v2693_v32 = vrot.slane %v2414_v31, %v7754_v7  ;;  %v9045_v53 = vmax.f32 %v2339_v55, 0.0  ;;  %v9047_v12 = vmax.f32 %v2342_v17, 0.0  ;;  %v9049_v0 = vpop.f32.mrb[38].mxu1 }
 0x3c8   : > { %v2703_v14 = vcombine.high %v2415_v39, %v2415_v39  ;;  %v2710_v28 = vrot.slane %v2415_v39, %v7754_v7  ;;  %v2720_v54 = vcombine.high %v2416_v3, %v2416_v3  ;;  %v2727_v44 = vrot.slane %v2416_v3, %v7754_v7  ;;  %v9053_v59 = vpop.f32.mrb[39].mxu1 }
 0x3c9   : > { %v2700_v33 = vrot.slane %v2686_v62, %v7754_v7  ;;  %v2701_v25 = vcombine.high %v2693_v32, %v2693_v32  ;;  %v6280_v51 = vrot.slane %v2693_v32, 9  ;;  %v2737_v18 = vcombine.high %v9045_v53, %v9045_v53 }
 0x3ca   : > { %v2717_v57 = vrot.slane %v2703_v14, %v7754_v7  ;;  %v2718_v29 = vcombine.high %v2710_v28, %v2710_v28  ;;  %v6284_v2 = vrot.slane %v2710_v28, 9  ;;  %v2734_v21 = vrot.slane %v2720_v54, %v7754_v7 }
 0x3cb   : > { %v2702_v36 = vcombine.high %v2700_v33, %v2700_v33  ;;  %v6281_v1 = vrot.slane %v2701_v25, 9  ;;  %v6282_v63 = vrot.slane %v2700_v33, 9  ;;  %v3573_v38 = vadd.f32 %v6280_v51, %v2693_v32 }
 0x3cc   : > { %v2719_v16 = vcombine.high %v2717_v57, %v2717_v57  ;;  %v6285_v56 = vrot.slane %v2718_v29, 9  ;;  %v6286_v48 = vrot.slane %v2717_v57, 9  ;;  %v3577_v20 = vadd.f32 %v6284_v2, %v2710_v28 }
 0x3cd   : > { %v6283_v52 = vrot.slane %v2702_v36, 9  ;;  %v3574_v61 = vadd.f32 %v6281_v1, %v2701_v25  ;;  %v3575_v11 = vadd.f32 %v6282_v63, %v2700_v33  ;;  %v2735_v23 = vcombine.high %v2727_v44, %v2727_v44 }
 0x3ce   : > { %v6287_v42 = vrot.slane %v2719_v16, 9  ;;  %v3578_v22 = vadd.f32 %v6285_v56, %v2718_v29  ;;  %v3579_v10 = vadd.f32 %v6286_v48, %v2717_v57  ;;  %v3673_v58 = vadd.f32 %v3577_v20, %v3569_v19 }
 0x3cf   : > { %v3576_v9 = vadd.f32 %v6283_v52, %v2702_v36  ;;  %v2736_v6 = vcombine.high %v2734_v21, %v2734_v21  ;;  %v6288_v34 = vrot.slane %v2727_v44, 9  ;;  %v6289_v4 = vrot.slane %v2735_v23, 9 }
 0x3d0   : > { %v3580_v46 = vadd.f32 %v6287_v42, %v2719_v16  ;;  %v3674_v60 = vadd.f32 %v3578_v22, %v3570_v49  ;;  %v3675_v43 = vadd.f32 %v3579_v10, %v3571_v5  ;;  %v3737_v41 = vmul.f32 0.25, %v3673_v58 }
 0x3d1   : > { %v6290_v45 = vrot.slane %v2734_v21, 9  ;;  %v6291_v31 = vrot.slane %v2736_v6, 9  ;;  %v3581_v26 = vadd.f32 %v6288_v34, %v2727_v44  ;;  %v3582_v55 = vadd.f32 %v6289_v4, %v2735_v23  ;;  %v9063_v17 = vpop.f32.mrb[40].mxu1 }
 0x3d2   : > { %v3676_v39 = vadd.f32 %v3580_v46, %v3572_v13  ;;  %v3738_v3 = vmul.f32 0.25, %v3674_v60  ;;  %v3739_v62 = vmul.f32 0.25, %v3675_v43  ;;  %v3801_v19 = vpack.c.bf16 %v3737_v41, %v3737_v41  ;;  %v6604_v32 = vpop.f32.mrb[41].mxu1 }
 0x3d3   : > { %v3583_v14 = vadd.f32 %v6290_v45, %v2734_v21  ;;  %v3584_v28 = vadd.f32 %v6291_v31, %v2736_v6  ;;  %v3677_v54 = vadd.f32 %v3581_v26, %v3573_v38  ;;  %v3678_v33 = vadd.f32 %v3582_v55, %v3574_v61  ;;  %v9065_v25 = vpop.f32.mrb[42].mxu1 }
 0x3d4   : > { %v3740_v49 = vmul.f32 0.25, %v3676_v39  ;;  %v3802_v5 = vpack.c.bf16 %v3738_v3, %v3738_v3  ;;  %v3803_v51 = vpack.c.bf16 %v3739_v62, %v3739_v62  ;;  %v3940_v57 = vunpack.c.l.b16 %v3801_v19  ;;  %v6607_v29 = vpop.f32.mrb[43].mxu1 }
 0x3d5   : > { %v3679_v44 = vadd.f32 %v3583_v14, %v3575_v11  ;;  %v3680_v2 = vadd.f32 %v3584_v28, %v3576_v9  ;;  %v3741_v36 = vmul.f32 0.25, %v3677_v54  ;;  %v3742_v1 = vmul.f32 0.25, %v3678_v33 }
 0x3d6   : > { %v3804_v13 = vpack.c.bf16 %v3740_v49, %v3740_v49  ;;  %v3941_v63 = vunpack.c.l.b16 %v3802_v5  ;;  %v3942_v16 = vunpack.c.l.b16 %v3803_v51  ;;  %v2744_v21 = vrot.slane %v9045_v53, %v7754_v7 }
 0x3d7   : > { %v3743_v56 = vmul.f32 0.25, %v3679_v44  ;;  %v3744_v38 = vmul.f32 0.25, %v3680_v2  ;;  %v3805_v48 = vpack.c.bf16 %v3741_v36, %v3741_v36  ;;  %v3806_v20 = vpack.c.bf16 %v3742_v1, %v3742_v1 }
 0x3d8   : > { %v3943_v52 = vunpack.c.l.b16 %v3804_v13  ;;  %v4029_v61 = vrot.slane %v3941_v63, 7  ;;  %v4031_v23 = vrot.slane %v3942_v16, 6  ;;  %v2751_v11 = vrot.slane %v2737_v18, %v7754_v7 }
 0x3d9   : > { %v3807_v42 = vpack.c.bf16 %v3743_v56, %v3743_v56  ;;  %v3808_v22 = vpack.c.bf16 %v3744_v38, %v3744_v38  ;;  %v3944_v10 = vunpack.c.l.b16 %v3805_v48  ;;  %v3945_v58 = vunpack.c.l.b16 %v3806_v20  ;;  %v9097_v38 = vld [vmem:[#allocation12] ss:$0 sm:$0xff] }
 0x3da   : > { %v4030_v9 = vsel %vm3981_vm1, %v4029_v61, %v3940_v57  ;;  %v4033_v6 = vrot.slane %v3943_v52, 5  ;;  %v2752_v34 = vcombine.high %v2744_v21, %v2744_v21  ;;  %v2753_v4 = vcombine.high %v2751_v11, %v2751_v11  ;;  %v9798_v52 = vld [vmem:[#allocation51_spill] sm:$0xff] }
 0x3db   : > { %v4032_v46 = vsel %vm3984_vm2, %v4031_v23, %v4030_v9  ;;  %v3946_v60 = vunpack.c.l.b16 %v3807_v42  ;;  %v3947_v43 = vunpack.c.l.b16 %v3808_v22  ;;  %v4035_v41 = vrot.slane %v3944_v10, 4  ;;  %v9799_v23 = vld [vmem:[#allocation53_spill] sm:$0xff]  ;;  %v6998_v10 = vld [vmem:[#allocation16 + $0x8] sm:$0xff]  }
 0x3dc   : > { %v4034_v45 = vsel %vm3987_vm3, %v4033_v6, %v4032_v46  ;;  %v4037_v31 = vrot.slane %v3945_v58, 3  ;;  %v6292_v26 = vrot.slane %v2744_v21, 9  ;;  %v6293_v53 = vrot.slane %v2752_v34, 9 }
 0x3dd   : > { %v4036_v18 = vsel %vm3990_vm4, %v4035_v41, %v4034_v45  ;;  %v4039_v55 = vrot.slane %v3946_v60, 2  ;;  %v4041_v39 = vrot.slane %v3947_v43, 1  ;;  %v6294_v3 = vrot.slane %v2751_v11, 9  ;;  %v6609_v62 = vpop.f32.mrb[44].mxu1 }
 0x3de   : > { %v4038_v19 = vsel %vm3993_vm11, %v4037_v31, %v4036_v18  ;;  %v6295_v14 = vrot.slane %v2753_v4, 9  ;;  %v9078_v28 = vadd.f32 %v6292_v26, %v2744_v21  ;;  %v9080_v54 = vadd.f32 %v6293_v53, %v2752_v34  ;;  %v6610_v33 = vpop.f32.mrb[45].mxu1 }
 0x3df   : > { %v9082_v49 = vadd.f32 %v6294_v3, %v2751_v11  ;;  %v2754_v5 = vcombine.high %v9047_v12, %v9047_v12  ;;  %v2761_v51 = vrot.slane %v9047_v12, %v7754_v7  ;;  %v6599_v57 = vadd.f32 %v9042_v8, %v9040_v24  ;;  %v6612_v44 = vpop.f32.mrb[46].mxu1  ;;  %v6999_v3 = vld [vmem:[#allocation16 + $0x10] sm:$0xff]  }
 0x3e0   : > { %v9090_v2 = vadd.f32 %v6295_v14, %v2753_v4  ;;  %v6602_v36 = vadd.f32 %v9053_v59, %v9049_v0  ;;  %v6605_v1 = vadd.f32 %v6604_v32, %v9063_v17  ;;  %v4040_v13 = vsel %vm3996_vm12, %v4039_v55, %v4038_v19  ;;  %v6613_v63 = vpop.f32.mrb[47].mxu1 }
 0x3e1   : > { %v2768_v16 = vrot.slane %v2754_v5, %v7754_v7  ;;  %v2769_v21 = vcombine.high %v2761_v51, %v2761_v51  ;;  %v6296_v56 = vrot.slane %v2761_v51, 9  ;;  %v2186_v12 = vadd.f32 %v9097_v38, %v6599_v57 }
 0x3e2   : > { %v2189_v24 = vadd.f32 %v9097_v38, %v6602_v36  ;;  %v2194_v8 = vadd.f32 %v9097_v38, %v6605_v1  ;;  %v4042_v48 = vsel %vm3999_vm13, %v4041_v39, %v4040_v13  ;;  %v6608_v0 = vadd.f32 %v6607_v29, %v9065_v25 }
 0x3e3   : > { %v2770_v59 = vcombine.high %v2768_v16, %v2768_v16  ;;  %v6297_v17 = vrot.slane %v2769_v21, 9  ;;  %v6298_v32 = vrot.slane %v2768_v16, 9  ;;  %v3589_v20 = vadd.f32 %v6296_v56, %v2761_v51  ;;  %v7000_v56 = vld [vmem:[#allocation16 + $0x18] sm:$0xff]  }
 0x3e4   : > { %v2347_v61 = vadd.f32 %v9798_v52, %v2186_v12  ;;  %v2350_v11 = vadd.f32 %v9799_v23, %v2189_v24  ;;  %v2355_v42 = vadd.f32 %v8702_v50, %v2194_v8  ;;  %v4100_v22 = vpack.c.b16 %v4042_v48, %v9035_v27 }
 0x3e5   : > { %v6299_v58 = vrot.slane %v2770_v59, 9  ;;  %v3590_v9 = vadd.f32 %v6297_v17, %v2769_v21  ;;  %v3591_v6 = vadd.f32 %v6298_v32, %v2768_v16  ;;  %v2197_v34 = vadd.f32 %v9097_v38, %v6608_v0  ;;  %v6615_v4 = vpop.f32.mrb[48].mxu1 }
 0x3e6   : > { %v2419_v25 = vmax.f32 %v2347_v61, 0.0  ;;  %v2420_v29 = vmax.f32 %v2350_v11, 0.0  ;;  %v2421_v46 = vmax.f32 %v2355_v42, 0.0  ;;  %6752 = vmatmul.mubr.msk.bf16.vlgmr.msra.gmra.mrb[60].mxu0 %vm789_vm5, %v4100_v22  ;;  %v6611_v60 = vadd.f32 %v6610_v33, %v6609_v62  ;;  %v6616_v43 = vpop.f32.mrb[49].mxu1 }
 0x3e7   : > { %v9110_v41 = vadd.f32 %v6299_v58, %v2770_v59  ;;  %v2358_v50 = vadd.f32 %v8714_v47, %v2197_v34  ;;  %v9113_v45 = vadd.f32 %v6613_v63, %v6612_v44  ;;  %v9115_v27 = vadd.f32 %v6616_v43, %v6615_v4  ;;  %v9117_v31 = vpop.f32.mrb[50].mxu1  ;;  %6760 = vmatpush3.bf16.msra.mxu0 %v9060_v30 }
 0x3e8   : > { %v2771_v26 = vcombine.high %v2419_v25, %v2419_v25  ;;  %v2778_v53 = vrot.slane %v2419_v25, %v7754_v7  ;;  %v2788_v18 = vcombine.high %v2420_v29, %v2420_v29  ;;  %v2795_v55 = vrot.slane %v2420_v29, %v7754_v7  ;;  %v9122_v39 = vpop.f32.mrb[51].mxu1  ;;  %6761 = vmatprep.subr.bf16.mxu0 %v6998_v10 }
 0x3e9   : > { %v2805_v62 = vcombine.high %v2421_v46, %v2421_v46  ;;  %v9125_v47 = vrot.slane %v2421_v46, %v7754_v7  ;;  %v9127_v19 = vmax.f32 %v2358_v50, 0.0  ;;  %v9130_v14 = vadd.f32 %v9097_v38, %v6611_v60 }
 0x3ea   : > { %v2785_v30 = vrot.slane %v2771_v26, %v7754_v7  ;;  %v2786_v33 = vcombine.high %v2778_v53, %v2778_v53  ;;  %v6300_v5 = vrot.slane %v2778_v53, 9  ;;  %v2802_v51 = vrot.slane %v2788_v18, %v7754_v7 }
 0x3eb   : > { %v2803_v57 = vcombine.high %v2795_v55, %v2795_v55  ;;  %v6304_v44 = vrot.slane %v2795_v55, 9  ;;  %v9135_v36 = vrot.slane %v2805_v62, %v7754_v7  ;;  %v2820_v1 = vcombine.high %v9125_v47, %v9125_v47  ;;  %6762 = vmatpush3.bf16.msra.mxu0 %v6998_v10 }
 0x3ec   : > { %v2787_v13 = vcombine.high %v2785_v30, %v2785_v30  ;;  %v6301_v63 = vrot.slane %v2786_v33, 9  ;;  %v6302_v16 = vrot.slane %v2785_v30, 9  ;;  %v3593_v21 = vadd.f32 %v6300_v5, %v2778_v53  ;;  %6763 = vmatprep.subr.bf16.mxu0 %v6999_v3 }
 0x3ed   : > { %v2804_v12 = vcombine.high %v2802_v51, %v2802_v51  ;;  %v6305_v24 = vrot.slane %v2803_v57, 9  ;;  %v6306_v8 = vrot.slane %v2802_v51, 9  ;;  %v3597_v48 = vadd.f32 %v6304_v44, %v2795_v55 }
 0x3ee   : > { %v6303_v0 = vrot.slane %v2787_v13, 9  ;;  %v3594_v59 = vadd.f32 %v6301_v63, %v2786_v33  ;;  %v3595_v17 = vadd.f32 %v6302_v16, %v2785_v30  ;;  %v3681_v32 = vadd.f32 %v3593_v21, %v9078_v28 }
 0x3ef   : > { %v6307_v52 = vrot.slane %v2804_v12, 9  ;;  %v3598_v61 = vadd.f32 %v6305_v24, %v2803_v57  ;;  %v3599_v23 = vadd.f32 %v6306_v8, %v2802_v51  ;;  %v3685_v11 = vadd.f32 %v3597_v48, %v3589_v20  ;;  %6764 = vmatpush3.bf16.msra.mxu0 %v6999_v3 }
 0x3f0   : > { %v3596_v42 = vadd.f32 %v6303_v0, %v2787_v13  ;;  %v3682_v22 = vadd.f32 %v3594_v59, %v9080_v54  ;;  %v3683_v10 = vadd.f32 %v3595_v17, %v9082_v49  ;;  %v3745_v58 = vmul.f32 0.25, %v3681_v32  ;;  %6765 = vmatprep.subr.bf16.mxu0 %v7000_v56 }
 0x3f1   : > { %v9142_v34 = vadd.f32 %v6307_v52, %v2804_v12  ;;  %v3686_v4 = vadd.f32 %v3598_v61, %v3590_v9  ;;  %v3687_v25 = vadd.f32 %v3599_v23, %v3591_v6  ;;  %v3749_v29 = vmul.f32 0.25, %v3685_v11  ;;  %v6621_v46 = vpop.f32.mrb[52].mxu1 }
 0x3f2   : > { %v3684_v28 = vadd.f32 %v3596_v42, %v9090_v2  ;;  %v3746_v60 = vmul.f32 0.25, %v3682_v22  ;;  %v3747_v43 = vmul.f32 0.25, %v3683_v10  ;;  %v3809_v50 = vpack.c.bf16 %v3745_v58, %v3745_v58  ;;  %v6622_v20 = vpop.f32.mrb[53].mxu1 }
 0x3f3   : > { %v3750_v26 = vmul.f32 0.25, %v3686_v4  ;;  %v9145_v53 = vmul.f32 0.25, %v3687_v25  ;;  %v3813_v54 = vpack.c.bf16 %v3749_v29, %v3749_v29  ;;  %v2821_v49 = vcombine.high %v9135_v36, %v9135_v36  ;;  %v9149_v18 = vpop.f32.mrb[54].mxu1  ;;  %6766 = vmatpush3.bf16.msra.mxu0 %v7000_v56 }
 0x3f4   : > { %v3748_v9 = vmul.f32 0.25, %v3684_v28  ;;  %v3810_v6 = vpack.c.bf16 %v3746_v60, %v3746_v60  ;;  %v3811_v55 = vpack.c.bf16 %v3747_v43, %v3747_v43  ;;  %v3948_v3 = vunpack.c.l.b16 %v3809_v50  ;;  %v9151_v62 = vpop.f32.mrb[55].mxu1 }
 0x3f5   : > { %v3814_v2 = vpack.c.bf16 %v3750_v26, %v3750_v26  ;;  %v9153_v30 = vunpack.c.l.b16 %v3813_v54  ;;  %v6308_v33 = vrot.slane %v9125_v47, 9  ;;  %v6309_v5 = vrot.slane %v2820_v1, 9 }
 0x3f6   : > { %v3812_v51 = vpack.c.bf16 %v3748_v9, %v3748_v9  ;;  %v3949_v57 = vunpack.c.l.b16 %v3810_v6  ;;  %v9156_v44 = vunpack.c.l.b16 %v3811_v55  ;;  %v6310_v13 = vrot.slane %v9135_v36, 9 }
 0x3f7   : > { %v9159_v63 = vunpack.c.l.b16 %v3814_v2  ;;  %v6311_v21 = vrot.slane %v2821_v49, 9  ;;  %v3601_v56 = vadd.f32 %v6308_v33, %v9125_v47  ;;  %v3602_v48 = vadd.f32 %v6309_v5, %v2820_v1 }
 0x3f8   : > { %v9163_v12 = vunpack.c.l.b16 %v3812_v51  ;;  %v4043_v24 = vrot.slane %v3949_v57, 7  ;;  %v4045_v8 = vrot.slane %v9156_v44, 6  ;;  %v3603_v0 = vadd.f32 %v6310_v13, %v9135_v36 }
 0x3f9   : > { %v9167_v59 = vadd.f32 %v6311_v21, %v2821_v49  ;;  %v2822_v17 = vcombine.high %v9127_v19, %v9127_v19  ;;  %v2829_v32 = vrot.slane %v9127_v19, %v7754_v7  ;;  %v9173_v52 = vpop.f32.mrb[56].mxu1  ;;  %v2363_v1 = vadd.f32 %v8694_v37, %v9130_v14 }
 0x3fa   : > { %v9176_v47 = vsel %vm3981_vm1, %v4043_v24, %v3948_v3  ;;  %v2205_v36 = vadd.f32 %v9097_v38, %v9113_v45  ;;  %v9183_v23 = vpop.f32.mrb[57].mxu1  ;;  %v2210_v19 = vadd.f32 %v9097_v38, %v9115_v27  ;;  %v6620_v37 = vadd.f32 %v9122_v39, %v9117_v31 }
 0x3fb   : > { %v2836_v11 = vrot.slane %v2822_v17, %v7754_v7  ;;  %v2837_v42 = vcombine.high %v2829_v32, %v2829_v32  ;;  %v6312_v22 = vrot.slane %v2829_v32, 9  ;;  %v9188_v10 = vpop.f32.mrb[58].mxu1  ;;  %v2423_v58 = vmax.f32 %v2363_v1, 0.0 }
 0x3fc   : > { %v2366_v4 = vadd.f32 %v8709_v35, %v2205_v36  ;;  %v9193_v14 = vadd.f32 %v6622_v20, %v6621_v46  ;;  %v9195_v45 = vpop.f32.mrb[59].mxu1  ;;  %v2371_v26 = vadd.f32 %v8799_v40, %v2210_v19  ;;  %v2213_v9 = vadd.f32 %v9097_v38, %v6620_v37 }
 0x3fd   : > { %v2838_v25 = vcombine.high %v2836_v11, %v2836_v11  ;;  %v6313_v29 = vrot.slane %v2837_v42, 9  ;;  %v6314_v28 = vrot.slane %v2836_v11, 9  ;;  %v3605_v60 = vadd.f32 %v6312_v22, %v2829_v32 }
 0x3fe   : > { %v2839_v43 = vcombine.high %v2423_v58, %v2423_v58  ;;  %v2846_v50 = vrot.slane %v2423_v58, %v7754_v7  ;;  %v2424_v27 = vmax.f32 %v2366_v4, 0.0  ;;  %v2425_v3 = vmax.f32 %v2371_v26, 0.0 }
 0x3ff   : > { %v6315_v54 = vrot.slane %v2838_v25, 9  ;;  %v3606_v49 = vadd.f32 %v6313_v29, %v2837_v42  ;;  %v3607_v35 = vadd.f32 %v6314_v28, %v2836_v11  ;;  %v9205_v2 = vadd.f32 %v8808_v15, %v2213_v9 }
 0x400   : > { %v2853_v31 = vrot.slane %v2839_v43, %v7754_v7  ;;  %v2854_v39 = vcombine.high %v2846_v50, %v2846_v50  ;;  %v6316_v46 = vrot.slane %v2846_v50, 9  ;;  %v2856_v20 = vcombine.high %v2424_v27, %v2424_v27 }
 0x401   : > { %v9201_v6 = vadd.f32 %v6315_v54, %v2838_v25  ;;  %v2863_v55 = vrot.slane %v2424_v27, %v7754_v7  ;;  %v9207_v33 = vpop.f32.mrb[60].mxu1  ;;  %v2873_v32 = vcombine.high %v2425_v3, %v2425_v3 }
 0x402   : > { %v2855_v40 = vcombine.high %v2853_v31, %v2853_v31  ;;  %v6317_v5 = vrot.slane %v2854_v39, 9  ;;  %v6318_v51 = vrot.slane %v2853_v31, 9  ;;  %v3609_v57 = vadd.f32 %v6316_v46, %v2846_v50  ;;  %v9209_v13 = vpop.f32.mrb[61].mxu1 }
 0x403   : > { %v2870_v21 = vrot.slane %v2856_v20, %v7754_v7  ;;  %v2871_v24 = vcombine.high %v2863_v55, %v2863_v55  ;;  %v6320_v17 = vrot.slane %v2863_v55, 9  ;;  %v9212_v1 = vpop.f32.mrb[62].mxu1 }
 0x404   : > { %v6319_v36 = vrot.slane %v2855_v40, 9  ;;  %v3610_v11 = vadd.f32 %v6317_v5, %v2854_v39  ;;  %v3611_v42 = vadd.f32 %v6318_v51, %v2853_v31  ;;  %v3689_v15 = vadd.f32 %v3609_v57, %v3601_v56  ;;  %v9214_v22 = vpop.f32.mrb[63].mxu1 }
 0x405   : > { %v2872_v19 = vcombine.high %v2870_v21, %v2870_v21  ;;  %v6321_v58 = vrot.slane %v2871_v24, 9  ;;  %v6322_v4 = vrot.slane %v2870_v21, 9  ;;  %v3613_v37 = vadd.f32 %v6320_v17, %v2863_v55 }
 0x406   : > { %v3612_v25 = vadd.f32 %v6319_v36, %v2855_v40  ;;  %v3690_v29 = vadd.f32 %v3610_v11, %v3602_v48  ;;  %v3691_v28 = vadd.f32 %v3611_v42, %v3603_v0  ;;  %v3753_v43 = vmul.f32 0.25, %v3689_v15 }
 0x407   : > { %v6323_v50 = vrot.slane %v2872_v19, 9  ;;  %v3614_v27 = vadd.f32 %v6321_v58, %v2871_v24  ;;  %v3615_v26 = vadd.f32 %v6322_v4, %v2870_v21  ;;  %v3693_v54 = vadd.f32 %v3613_v37, %v3605_v60 }
 0x408   : > { %v3692_v9 = vadd.f32 %v3612_v25, %v9167_v59  ;;  %v3754_v46 = vmul.f32 0.25, %v3690_v29  ;;  %v3755_v39 = vmul.f32 0.25, %v3691_v28  ;;  %v3817_v31 = vpack.c.bf16 %v3753_v43, %v3753_v43 }
 0x409   : > { %v3616_v56 = vadd.f32 %v6323_v50, %v2872_v19  ;;  %v3694_v20 = vadd.f32 %v3614_v27, %v3606_v49  ;;  %v3695_v5 = vadd.f32 %v3615_v26, %v3607_v35  ;;  %v3757_v51 = vmul.f32 0.25, %v3693_v54  ;;  %v9217_v57 = vpop.f32.mrb[64].mxu1 }
 0x40a   : > { %v3756_v55 = vmul.f32 0.25, %v3692_v9  ;;  %v3818_v40 = vpack.c.bf16 %v3754_v46, %v3754_v46  ;;  %v3819_v48 = vpack.c.bf16 %v3755_v39, %v3755_v39  ;;  %v3956_v0 = vunpack.c.l.b16 %v3817_v31  ;;  %v9219_v17 = vpop.f32.mrb[65].mxu1 }
 0x40b   : > { %v3758_v24 = vmul.f32 0.25, %v3694_v20  ;;  %v9221_v21 = vmul.f32 0.25, %v3695_v5  ;;  %v3821_v60 = vpack.c.bf16 %v3757_v51, %v3757_v51  ;;  %v2880_v59 = vrot.slane %v2425_v3, %v7754_v7  ;;  %v9224_v36 = vpop.f32.mrb[66].mxu1 }
 0x40c   : > { %v3820_v11 = vpack.c.bf16 %v3756_v55, %v3756_v55  ;;  %v3957_v49 = vunpack.c.l.b16 %v3818_v40  ;;  %v9226_v35 = vunpack.c.l.b16 %v3819_v48  ;;  %v2887_v42 = vrot.slane %v2873_v32, %v7754_v7  ;;  %v9229_v15 = vpop.f32.mrb[67].mxu1 }
 0x40d   : > { %v3822_v19 = vpack.c.bf16 %v3758_v24, %v3758_v24  ;;  %v9231_v58 = vunpack.c.l.b16 %v3821_v60  ;;  %v2888_v4 = vcombine.high %v2880_v59, %v2880_v59  ;;  %v6324_v37 = vrot.slane %v2880_v59, 9 }
 0x40e   : > { %v9233_v25 = vunpack.c.l.b16 %v3820_v11  ;;  %v4057_v29 = vrot.slane %v3957_v49, 7  ;;  %v2889_v28 = vcombine.high %v2887_v42, %v2887_v42  ;;  %v6326_v26 = vrot.slane %v2887_v42, 9  ;;  %v9801_v49 = vld [vmem:[#allocation33_spill] sm:$0xff] }
 0x40f   : > { %v9236_v43 = vunpack.c.l.b16 %v3822_v19  ;;  %v6325_v27 = vrot.slane %v2888_v4, 9  ;;  %v3617_v46 = vadd.f32 %v6324_v37, %v2880_v59  ;;  %v2426_v20 = vmax.f32 %v9205_v2, 0.0  ;;  %v9800_v2 = vld [vmem:[#allocation30_spill] sm:$0xff] }
 0x410   : > { %v9240_v32 = vsel %vm3981_vm1, %v4057_v29, %v3956_v0  ;;  %v6327_v9 = vrot.slane %v2889_v28, 9  ;;  %v3619_v31 = vadd.f32 %v6326_v26, %v2887_v42  ;;  %v2218_v5 = vadd.f32 %v9097_v38, %v9193_v14 }
 0x411   : > { %v3618_v39 = vadd.f32 %v6325_v27, %v2888_v4  ;;  %v6626_v55 = vadd.f32 %v9151_v62, %v9149_v18  ;;  %v9252_v40 = vadd.f32 %v9183_v23, %v9173_v52  ;;  %v9256_v48 = vadd.f32 %v9195_v45, %v9188_v10 }
 0x412   : > { %v9246_v51 = vadd.f32 %v6327_v9, %v2889_v28  ;;  %v2890_v0 = vcombine.high %v2426_v20, %v2426_v20  ;;  %v2897_v24 = vrot.slane %v2426_v20, %v7754_v7  ;;  %v2379_v60 = vadd.f32 %v9800_v2, %v2218_v5 }
 0x413   : > { %v9262_v14 = vadd.f32 %v9209_v13, %v9207_v33  ;;  %v2221_v59 = vadd.f32 %v9097_v38, %v6626_v55  ;;  %v3688_v18 = vadd.f32 %v9142_v34, %v9110_v41  ;;  %v3696_v62 = vadd.f32 %v3616_v56, %v9201_v6 }
 0x414   : > { %v3815_v52 = vpack.c.bf16 %v9145_v53, %v9145_v53  ;;  %v2904_v23 = vrot.slane %v2890_v0, %v7754_v7  ;;  %v2905_v10 = vcombine.high %v2897_v24, %v2897_v24  ;;  %v6328_v45 = vrot.slane %v2897_v24, 9 }
 0x415   : > { %v2427_v11 = vmax.f32 %v2379_v60, 0.0  ;;  %v2382_v42 = vadd.f32 %v9801_v49, %v2221_v59  ;;  %v3752_v19 = vmul.f32 0.25, %v3688_v18  ;;  %v3760_v33 = vmul.f32 0.25, %v3696_v62 }
 0x416   : > { %v3823_v13 = vpack.c.bf16 %v9221_v21, %v9221_v21  ;;  %v2906_v4 = vcombine.high %v2904_v23, %v2904_v23  ;;  %v6329_v37 = vrot.slane %v2905_v10, 9  ;;  %v6330_v41 = vrot.slane %v2904_v23, 9 }
 0x417   : > { %v3621_v34 = vadd.f32 %v6328_v45, %v2897_v24  ;;  %v2907_v6 = vcombine.high %v2427_v11, %v2427_v11  ;;  %v2914_v56 = vrot.slane %v2427_v11, %v7754_v7  ;;  %v2428_v53 = vmax.f32 %v2382_v42, 0.0 }
 0x418   : > { %v3816_v29 = vpack.c.bf16 %v3752_v19, %v3752_v19  ;;  %v6331_v28 = vrot.slane %v2906_v4, 9  ;;  %v3622_v27 = vadd.f32 %v6329_v37, %v2905_v10  ;;  %v3623_v26 = vadd.f32 %v6330_v41, %v2904_v23 }
 0x419   : > { %v3824_v9 = vpack.c.bf16 %v3760_v33, %v3760_v33  ;;  %v2921_v20 = vrot.slane %v2907_v6, %v7754_v7  ;;  %v2922_v5 = vcombine.high %v2914_v56, %v2914_v56  ;;  %v6332_v55 = vrot.slane %v2914_v56, 9 }
 0x41a   : > { %v2924_v0 = vcombine.high %v2428_v53, %v2428_v53  ;;  %v9276_v2 = vadd.f32 %v6331_v28, %v2906_v4  ;;  %v2931_v21 = vrot.slane %v2428_v53, %v7754_v7  ;;  %v9279_v60 = vunpack.c.l.b16 %v3815_v52 }
 0x41b   : > { %v9281_v24 = vunpack.c.l.b16 %v3816_v29  ;;  %v2923_v59 = vcombine.high %v2921_v20, %v2921_v20  ;;  %v6333_v18 = vrot.slane %v2922_v5, 9  ;;  %v6334_v62 = vrot.slane %v2921_v20, 9 }
 0x41c   : > { %v3625_v45 = vadd.f32 %v6332_v55, %v2914_v56  ;;  %v2938_v23 = vrot.slane %v2924_v0, %v7754_v7  ;;  %v2939_v10 = vcombine.high %v2931_v21, %v2931_v21  ;;  %v6336_v11 = vrot.slane %v2931_v21, 9 }
 0x41d   : > { %v9284_v49 = vunpack.c.l.b16 %v3823_v13  ;;  %v6335_v42 = vrot.slane %v2923_v59, 9  ;;  %v3626_v19 = vadd.f32 %v6333_v18, %v2922_v5  ;;  %v3627_v33 = vadd.f32 %v6334_v62, %v2921_v20 }
 0x41e   : > { %v3697_v4 = vadd.f32 %v3625_v45, %v3617_v46  ;;  %v2940_v37 = vcombine.high %v2938_v23, %v2938_v23  ;;  %v6337_v41 = vrot.slane %v2939_v10, 9  ;;  %v6338_v52 = vrot.slane %v2938_v23, 9 }
 0x41f   : > { %v3629_v6 = vadd.f32 %v6336_v11, %v2931_v21  ;;  %v3628_v53 = vadd.f32 %v6335_v42, %v2923_v59  ;;  %v3698_v29 = vadd.f32 %v3626_v19, %v3618_v39  ;;  %v3699_v28 = vadd.f32 %v3627_v33, %v3619_v31 }
 0x420   : > { %v3761_v50 = vmul.f32 0.25, %v3697_v4  ;;  %v6339_v54 = vrot.slane %v2940_v37, 9  ;;  %v3630_v56 = vadd.f32 %v6337_v41, %v2939_v10  ;;  %v3631_v55 = vadd.f32 %v6338_v52, %v2938_v23 }
 0x421   : > { %v3701_v0 = vadd.f32 %v3629_v6, %v3621_v34  ;;  %v3700_v3 = vadd.f32 %v3628_v53, %v9246_v51  ;;  %v3762_v13 = vmul.f32 0.25, %v3698_v29  ;;  %v3763_v16 = vmul.f32 0.25, %v3699_v28 }
 0x422   : > { %v3825_v61 = vpack.c.bf16 %v3761_v50, %v3761_v50  ;;  %v3632_v5 = vadd.f32 %v6339_v54, %v2940_v37  ;;  %v3702_v20 = vadd.f32 %v3630_v56, %v3622_v27  ;;  %v3703_v46 = vadd.f32 %v3631_v55, %v3623_v26 }
 0x423   : > { %v3765_v18 = vmul.f32 0.25, %v3701_v0  ;;  %v3764_v62 = vmul.f32 0.25, %v3700_v3  ;;  %v3826_v45 = vpack.c.bf16 %v3762_v13, %v3762_v13  ;;  %v3827_v21 = vpack.c.bf16 %v3763_v16, %v3763_v16 }
 0x424   : > { %v3964_v59 = vunpack.c.l.b16 %v3825_v61  ;;  %v3766_v39 = vmul.f32 0.25, %v3702_v20  ;;  %v3767_v31 = vmul.f32 0.25, %v3703_v46  ;;  %v3963_v42 = vunpack.c.l.b16 %v3824_v9 }
 0x425   : > { %v3829_v11 = vpack.c.bf16 %v3765_v18, %v3765_v18  ;;  %v3828_v10 = vpack.c.bf16 %v3764_v62, %v3764_v62  ;;  %v3965_v23 = vunpack.c.l.b16 %v3826_v45  ;;  %v3966_v34 = vunpack.c.l.b16 %v3827_v21 }
 0x426   : > { %v4046_v50 = vsel %vm3984_vm2, %v4045_v8, %v9176_v47  ;;  %v3830_v54 = vpack.c.bf16 %v3766_v39, %v3766_v39  ;;  %v9802_v3 = vrot.slane %v9163_v12, 5  ;;  %v4051_v61 = vrot.slane %v9159_v63, 3 }
 0x427   : > { %v9291_v51 = vunpack.c.l.b16 %v3829_v11  ;;  %v3967_v27 = vunpack.c.l.b16 %v3828_v10  ;;  %v4071_v26 = vrot.slane %v3965_v23, 7  ;;  %v4073_v9 = vrot.slane %v3966_v34, 6 }
 0x428   : > { %v4048_v16 = vsel %vm3987_vm3, %v9802_v3, %v4046_v50  ;;  %v9803_v19 = vrot.slane %v9153_v30, 4  ;;  %v9300_v4 = vunpack.c.l.b16 %v3830_v54  ;;  %v4053_v47 = vrot.slane %v9279_v60, 2 }
 0x429   : > { %v4077_v44 = vrot.slane %v9291_v51, 4  ;;  %v4072_v12 = vsel %vm3981_vm1, %v4071_v26, %v3964_v59  ;;  %v4075_v37 = vrot.slane %v3967_v27, 5  ;;  %v4055_v63 = vrot.slane %v9281_v24, 1 }
 0x42a   : > { %v4050_v33 = vsel %vm3990_vm4, %v9803_v19, %v4048_v16  ;;  %v9804_v41 = vrot.slane %v9226_v35, 6  ;;  %v9805_v6 = vrot.slane %v9233_v25, 5  ;;  %v4065_v29 = vrot.slane %v9236_v43, 3 }
 0x42b   : > { %v4052_v8 = vsel %vm3993_vm11, %v4051_v61, %v4050_v33  ;;  %v4067_v60 = vrot.slane %v9284_v49, 2  ;;  %v9806_v56 = vrot.slane %v9231_v58, 4  ;;  %v4069_v55 = vrot.slane %v3963_v42, 1 }
 0x42c   : > { %v4060_v30 = vsel %vm3984_vm2, %v9804_v41, %v9240_v32  ;;  %v4054_v52 = vsel %vm3996_vm12, %v4053_v47, %v4052_v8  ;;  %v6638_v35 = vadd.f32 %v9214_v22, %v9212_v1  ;;  %v2234_v25 = vadd.f32 %v9097_v38, %v9262_v14 }
 0x42d   : > { %v4062_v53 = vsel %vm3987_vm3, %v9805_v6, %v4060_v30  ;;  %v4056_v28 = vsel %vm3999_vm13, %v4055_v63, %v4054_v52  ;;  %v2226_v43 = vadd.f32 %v9097_v38, %v9252_v40  ;;  %v2229_v49 = vadd.f32 %v9097_v38, %v9256_v48 }
 0x42e   : > { %v4064_v24 = vsel %vm3990_vm4, %v9806_v56, %v4062_v53  ;;  %v2237_v58 = vadd.f32 %v9097_v38, %v6638_v35  ;;  %v3704_v13 = vadd.f32 %v3632_v5, %v9276_v2  ;;  %v3831_v20 = vpack.c.bf16 %v3767_v31, %v3767_v31 }
 0x42f   : > { %v4066_v32 = vsel %vm3993_vm11, %v4065_v29, %v4064_v24  ;;  %v2395_v22 = vadd.f32 %v9217_v57, %v2234_v25  ;;  %v2387_v46 = vadd.f32 %v9219_v17, %v2226_v43  ;;  %v2390_v14 = vadd.f32 %v9229_v15, %v2229_v49 }
 0x430   : > { %v4068_v0 = vsel %vm3996_vm12, %v4067_v60, %v4066_v32  ;;  %v2398_v40 = vadd.f32 %v9224_v36, %v2237_v58  ;;  %v9338_v62 = vmul.f32 0.25, %v3704_v13  ;;  %v9340_v48 = vunpack.c.l.b16 %v3831_v20 }
 0x431   : > { %v4070_v1 = vsel %vm3999_vm13, %v4069_v55, %v4068_v0  ;;  %v2431_v45 = vmax.f32 %v2395_v22, 0.0  ;;  %v2429_v38 = vmax.f32 %v2387_v46, 0.0  ;;  %v2430_v21 = vmax.f32 %v2390_v14, 0.0 }
 0x432   : > { %v4101_v18 = vpack.c.b16 %v4070_v1, %v4056_v28  ;;  %v4074_v2 = vsel %vm3984_vm2, %v4073_v9, %v4072_v12  ;;  %v2432_v5 = vmax.f32 %v2398_v40, 0.0  ;;  %v3832_v57 = vpack.c.bf16 %v9338_v62, %v9338_v62 }
 0x433   : > { %v9347_v17 = vsel %vm3987_vm3, %v4075_v37, %v4074_v2  ;;  %v4079_v36 = vrot.slane %v9300_v4, 3  ;;  %v2975_v15 = vcombine.high %v2431_v45, %v2431_v45  ;;  %v2982_v59 = vrot.slane %v2431_v45, %v7754_v7 }
 0x434   : > { %6755 = vmatprep.mubr.msk.bf16.mxu0 %vm789_vm5, %v4101_v18  ;;  %v2941_v39 = vcombine.high %v2429_v38, %v2429_v38  ;;  %v2948_v31 = vrot.slane %v2429_v38, %v7754_v7  ;;  %v2992_v11 = vcombine.high %v2432_v5, %v2432_v5  ;;  %v2999_v42 = vrot.slane %v2432_v5, %v7754_v7 }
 0x435   : > { %v2958_v10 = vcombine.high %v2430_v21, %v2430_v21  ;;  %v2965_v23 = vrot.slane %v2430_v21, %v7754_v7  ;;  %v2989_v34 = vrot.slane %v2975_v15, %v7754_v7  ;;  %v2990_v50 = vcombine.high %v2982_v59, %v2982_v59 }
 0x436   : > { %v6348_v54 = vrot.slane %v2982_v59, 9  ;;  %v2955_v3 = vrot.slane %v2941_v39, %v7754_v7  ;;  %v2956_v16 = vcombine.high %v2948_v31, %v2948_v31  ;;  %v6340_v61 = vrot.slane %v2948_v31, 9 }
 0x437   : > { %v3006_v27 = vrot.slane %v2992_v11, %v7754_v7  ;;  %v3007_v26 = vcombine.high %v2999_v42, %v2999_v42  ;;  %v2991_v9 = vcombine.high %v2989_v34, %v2989_v34  ;;  %v6349_v19 = vrot.slane %v2990_v50, 9 }
 0x438   : > { %v6350_v33 = vrot.slane %v2989_v34, 9  ;;  %v3641_v8 = vadd.f32 %v6348_v54, %v2982_v59  ;;  %v2957_v47 = vcombine.high %v2955_v3, %v2955_v3  ;;  %v6341_v12 = vrot.slane %v2956_v16, 9 }
 0x439   : > { %v6342_v37 = vrot.slane %v2955_v3, 9  ;;  %v3633_v63 = vadd.f32 %v6340_v61, %v2948_v31  ;;  %v6351_v41 = vrot.slane %v2991_v9, 9  ;;  %v3642_v30 = vadd.f32 %v6349_v19, %v2990_v50 }
 0x43a   : > { %v3643_v52 = vadd.f32 %v6350_v33, %v2989_v34  ;;  %v3008_v6 = vcombine.high %v3006_v27, %v3006_v27  ;;  %v6343_v53 = vrot.slane %v2957_v47, 9  ;;  %v3634_v29 = vadd.f32 %v6341_v12, %v2956_v16 }
 0x43b   : > { %v3635_v60 = vadd.f32 %v6342_v37, %v2955_v3  ;;  %v3705_v28 = vadd.f32 %v3641_v8, %v3633_v63  ;;  %v3644_v56 = vadd.f32 %v6351_v41, %v2991_v9  ;;  %v6352_v24 = vrot.slane %v2999_v42, 9 }
 0x43c   : > { %v6353_v55 = vrot.slane %v3007_v26, 9  ;;  %v6354_v35 = vrot.slane %v3006_v27, 9  ;;  %v3636_v32 = vadd.f32 %v6343_v53, %v2957_v47  ;;  %v3706_v25 = vadd.f32 %v3642_v30, %v3634_v29 }
 0x43d   : > { %v3707_v43 = vadd.f32 %v3643_v52, %v3635_v60  ;;  %v3769_v49 = vmul.f32 0.25, %v3705_v28  ;;  %v6355_v0 = vrot.slane %v3008_v6, 9  ;;  %v3645_v58 = vadd.f32 %v6352_v24, %v2999_v42  ;;  %v9807_v60 = vld [vmem:[#allocation57_spill] sm:$0xff]  ;;  %v9809_v24 = vld [vmem:[#allocation68_spill] sm:$0xff] }
 0x43e   : > { %v3646_v13 = vadd.f32 %v6353_v55, %v3007_v26  ;;  %v3647_v20 = vadd.f32 %v6354_v35, %v3006_v27  ;;  %v3708_v1 = vadd.f32 %v3644_v56, %v3636_v32  ;;  %v3770_v22 = vmul.f32 0.25, %v3706_v25 }
 0x43f   : > { %v3771_v46 = vmul.f32 0.25, %v3707_v43  ;;  %v3833_v14 = vpack.c.bf16 %v3769_v49, %v3769_v49  ;;  %v3648_v18 = vadd.f32 %v6355_v0, %v3008_v6  ;;  %v2972_v40 = vrot.slane %v2958_v10, %v7754_v7 }
 0x440   : > { %v2973_v45 = vcombine.high %v2965_v23, %v2965_v23  ;;  %v6344_v38 = vrot.slane %v2965_v23, 9  ;;  %v3772_v21 = vmul.f32 0.25, %v3708_v1  ;;  %v3834_v2 = vpack.c.bf16 %v3770_v22, %v3770_v22 }
 0x441   : > { %v3835_v5 = vpack.c.bf16 %v3771_v46, %v3771_v46  ;;  %v3972_v15 = vunpack.c.l.b16 %v3833_v14  ;;  %v2974_v59 = vcombine.high %v2972_v40, %v2972_v40  ;;  %v6346_v31 = vrot.slane %v2972_v40, 9 }
 0x442   : > { %v6345_v39 = vrot.slane %v2973_v45, 9  ;;  %v3637_v11 = vadd.f32 %v6344_v38, %v2965_v23  ;;  %v3836_v42 = vpack.c.bf16 %v3772_v21, %v3772_v21  ;;  %v3973_v34 = vunpack.c.l.b16 %v3834_v2  ;;  %v9814_v21 = vld [vmem:[#allocation56_spill] sm:$0xff] }
 0x443   : > { %v3974_v50 = vunpack.c.l.b16 %v3835_v5  ;;  %v3971_v54 = vunpack.c.l.b16 %v3832_v57  ;;  %v6347_v3 = vrot.slane %v2974_v59, 9  ;;  %v3639_v7 = vadd.f32 %v6346_v31, %v2972_v40  ;;  %v9813_v40 = vld [vmem:[#allocation59_spill] sm:$0xff]  ;;  %v9815_v5 = vld [vmem:[#allocation66_spill] sm:$0xff]  ;;  %v9818_v31 = vld [vmem:[#allocation73_spill] sm:$0xff] }
 0x444   : > { %v3638_v16 = vadd.f32 %v6345_v39, %v2973_v45  ;;  %v3709_v10 = vadd.f32 %v3645_v58, %v3637_v11  ;;  %v3975_v61 = vunpack.c.l.b16 %v3836_v42  ;;  %v4085_v27 = vrot.slane %v3973_v34, 7  ;;  %v9817_v39 = vld [vmem:[#allocation67_spill] sm:$0xff] }
 0x445   : > { %v4087_v26 = vrot.slane %v3974_v50, 6  ;;  %v4078_v9 = vsel %vm3990_vm4, %v4077_v44, %v9347_v17  ;;  %v3640_v23 = vadd.f32 %v6347_v3, %v2974_v59  ;;  %v3711_v33 = vadd.f32 %v3647_v20, %v3639_v7  ;;  %v9811_v20 = vld [vmem:[#allocation58_spill] sm:$0xff] }
 0x446   : > { %v3710_v19 = vadd.f32 %v3646_v13, %v3638_v16  ;;  %v3773_v8 = vmul.f32 0.25, %v3709_v10  ;;  %v4086_v47 = vsel %vm3981_vm1, %v4085_v27, %v3972_v15  ;;  %v4089_v62 = vrot.slane %v3975_v61, 5  ;;  %v9810_v13 = vld [vmem:[#allocation54_spill] sm:$0xff]  ;;  %v9816_v15 = vld [vmem:[#allocation71_spill] sm:$0xff] }
 0x447   : > { %v4080_v57 = vsel %vm3993_vm11, %v4079_v36, %v4078_v9  ;;  %v4081_v12 = vrot.slane %v9340_v48, 2  ;;  %v4088_v37 = vsel %vm3984_vm2, %v4087_v26, %v4086_v47  ;;  %v3712_v63 = vadd.f32 %v3648_v18, %v3640_v23  ;;  %v9808_v48 = vld [vmem:[#allocation65_spill] sm:$0xff]  ;;  %v9812_v18 = vld [vmem:[#allocation55_spill] sm:$0xff]  ;;  %v9819_v9 = vld [vmem:[#allocation60_spill] sm:$0xff] }
 0x448   : > { %v3774_v41 = vmul.f32 0.25, %v3710_v19  ;;  %v3775_v51 = vmul.f32 0.25, %v3711_v33  ;;  %v3837_v30 = vpack.c.bf16 %v3773_v8, %v3773_v8  ;;  %v4083_v17 = vrot.slane %v3971_v54, 1 }
 0x449   : > { %v4082_v44 = vsel %vm3996_vm12, %v4081_v12, %v4080_v57  ;;  %v4090_v52 = vsel %vm3987_vm3, %v4089_v62, %v4088_v37  ;;  %v3776_v6 = vmul.f32 0.25, %v3712_v63  ;;  %v6378_v4 = vrot.slane %v9807_v60, 9  ;;  %v9820_v62 = vld [vmem:[#allocation74_spill] sm:$0xff] }
 0x44a   : > { %v3838_v53 = vpack.c.bf16 %v3774_v41, %v3774_v41  ;;  %v3839_v29 = vpack.c.bf16 %v3775_v51, %v3775_v51  ;;  %v3976_v28 = vunpack.c.l.b16 %v3837_v30  ;;  %v4084_v36 = vsel %vm3999_vm13, %v4083_v17, %v4082_v44 }
 0x44b   : > { %v6386_v56 = vrot.slane %v9808_v48, 9  ;;  %v6394_v55 = vrot.slane %v9809_v24, 9  ;;  %v3840_v25 = vpack.c.bf16 %v3776_v6, %v3776_v6  ;;  %v5295_v43 = vadd.f32 %v6378_v4, %v9807_v60  ;;  %v9822_v60 = vld [vmem:[#allocation62_spill] sm:$0xff] }
 0x44c   : > { %v3977_v35 = vunpack.c.l.b16 %v3838_v53  ;;  %v3978_v32 = vunpack.c.l.b16 %v3839_v29  ;;  %v4091_v49 = vrot.slane %v3976_v28, 4  ;;  %v5413_v1 = vadd.f32 %v9811_v20, %v9810_v13  ;;  %v9821_v29 = vld [vmem:[#allocation61_spill] sm:$0xff] }
 0x44d   : > { %v5303_v0 = vadd.f32 %v6386_v56, %v9808_v48  ;;  %v5311_v58 = vadd.f32 %v6394_v55, %v9809_v24  ;;  %v3979_v14 = vunpack.c.l.b16 %v3840_v25  ;;  %v5414_v45 = vadd.f32 %v9813_v40, %v9812_v18  ;;  %v9824_v48 = vld [vmem:[#allocation64_spill] sm:$0xff]  ;;  %v9825_v55 = vld [vmem:[#allocation63_spill] sm:$0xff]  ;;  %v9832_v18 = vld [vmem:[#allocation77_spill] sm:$0xff] }
 0x44e   : > { %v4093_v22 = vrot.slane %v3977_v35, 3  ;;  %v4095_v46 = vrot.slane %v3978_v32, 2  ;;  %v4092_v38 = vsel %vm3990_vm4, %v4091_v49, %v4090_v52  ;;  %v5415_v2 = vadd.f32 %v5295_v43, %v9814_v21  ;;  %v9827_v49 = vld [vmem:[#allocation76_spill] sm:$0xff] }
 0x44f   : > { %v5421_v59 = vadd.f32 %v9816_v15, %v9815_v5  ;;  %v5422_v11 = vadd.f32 %v9818_v31, %v9817_v39  ;;  %v4097_v34 = vrot.slane %v3979_v14, 1  ;;  %v5423_v50 = vadd.f32 %v5311_v58, %v5303_v0  ;;  %v9828_v0 = vld [vmem:[#allocation69_spill] sm:$0xff] }
 0x450   : > { %v4094_v42 = vsel %vm3993_vm11, %v4093_v22, %v4092_v38  ;;  %v5477_v54 = vmul.f32 0.25, %v5413_v1  ;;  %v5478_v16 = vmul.f32 0.25, %v5414_v45  ;;  %v5479_v7 = vmul.f32 0.25, %v5415_v2  ;;  %v9830_v1 = vld [vmem:[#allocation70_spill] sm:$0xff] }
 0x451   : > { %v4096_v3 = vsel %vm3996_vm12, %v4095_v46, %v4094_v42  ;;  %v5485_v10 = vmul.f32 0.25, %v5421_v59  ;;  %v5486_v27 = vmul.f32 0.25, %v5422_v11  ;;  %v5487_v26 = vmul.f32 0.25, %v5423_v50  ;;  %v9833_v59 = vld [vmem:[#allocation72_spill] sm:$0xff]  ;;  %v9835_v11 = vld [vmem:[#allocation79_spill] sm:$0xff] }
 0x452   : > { %v4098_v61 = vsel %vm3999_vm13, %v4097_v34, %v4096_v3  ;;  %v5539_v23 = vpack.c.bf16 %v9819_v9, %v9819_v9  ;;  %v5541_v33 = vpack.c.bf16 %v5477_v54, %v5477_v54  ;;  %v5542_v8 = vpack.c.bf16 %v5478_v16, %v5478_v16  ;;  %v9837_v3 = vld [vmem:[#allocation26_spill] sm:$0xff]  ;;  %v9838_v16 = vld [vmem:[#allocation75_spill] sm:$0xff] }
 0x453   : > { %v4102_v19 = vpack.c.b16 %v4098_v61, %v4084_v36  ;;  %v5543_v47 = vpack.c.bf16 %v5479_v7, %v5479_v7  ;;  %v5547_v57 = vpack.c.bf16 %v9820_v62, %v9820_v62  ;;  %v5549_v12 = vpack.c.bf16 %v5485_v10, %v5485_v10  ;;  %v9840_v61 = vld [vmem:[#allocation27_spill] sm:$0xff] }
 0x454   : > { %v5550_v37 = vpack.c.bf16 %v5486_v27, %v5486_v27  ;;  %v5551_v63 = vpack.c.bf16 %v5487_v26, %v5487_v26  ;;  %v5682_v41 = vunpack.c.l.b16 %v5539_v23  ;;  %v5684_v51 = vunpack.c.l.b16 %v5541_v33  ;;  %v9841_v27 = vld [vmem:[#allocation80_spill] sm:$0xff]  ;;  %v9843_v33 = vld [vmem:[#allocation78_spill] sm:$0xff] }
 0x455   : > { %6756 = vmatmul.mubr.msk.bf16.gmra.mrb[64].mxu0 %vm789_vm5, %v4102_v19  ;;  %v5685_v30 = vunpack.c.l.b16 %v5542_v8  ;;  %v5686_v44 = vunpack.c.l.b16 %v5543_v47  ;;  %v5690_v17 = vunpack.c.l.b16 %v5547_v57  ;;  %v5692_v52 = vunpack.c.l.b16 %v5549_v12  ;;  %v9845_v12 = vld [vmem:[#allocation81_spill] sm:$0xff] }
 0x456   : > { %v5693_v6 = vunpack.c.l.b16 %v5550_v37  ;;  %v5694_v53 = vunpack.c.l.b16 %v5551_v63  ;;  %v9823_v4 = vrot.slane %v9822_v60, 7  ;;  %v5747_v36 = vrot.slane %v5682_v41, 5 }
 0x457   : > { %v5749_v56 = vrot.slane %v9824_v48, 4  ;;  %v5751_v24 = vrot.slane %v5684_v51, 3  ;;  %v9826_v35 = vrot.slane %v9825_v55, 6  ;;  %v5753_v25 = vrot.slane %v5685_v30, 2  ;;  %v9847_v51 = vld [vmem:[#allocation82_spill] sm:$0xff] }
 0x458   : > { %v5744_v28 = vsel %vm3981_vm1, %v9823_v4, %v9821_v29  ;;  %v5755_v43 = vrot.slane %v5686_v44, 1  ;;  %v9829_v58 = vrot.slane %v9828_v0, 7  ;;  %v9831_v22 = vrot.slane %v9830_v1, 6  ;;  %v9854_v0 = vld [vmem:[#allocation87_spill] sm:$0xff] }
 0x459   : > { %v5746_v32 = vsel %vm3984_vm2, %v9826_v35, %v5744_v28  ;;  %v5761_v14 = vrot.slane %v5690_v17, 5  ;;  %v5763_v40 = vrot.slane %v9832_v18, 4  ;;  %v5765_v38 = vrot.slane %v5692_v52, 3  ;;  %v9848_v52 = vld [vmem:[#allocation85_spill] sm:$0xff]  ;;  %v9850_v28 = vld [vmem:[#allocation96_spill] sm:$0xff] }
 0x45a   : > { %v5758_v13 = vsel %vm3981_vm1, %v9829_v58, %v9827_v49  ;;  %v5748_v20 = vsel %vm3987_vm3, %v5747_v36, %v5746_v32  ;;  %v5767_v21 = vrot.slane %v5693_v6, 2  ;;  %v5769_v2 = vrot.slane %v5694_v53, 1  ;;  %v9849_v53 = vld [vmem:[#allocation93_spill] sm:$0xff]  ;;  %v9851_v35 = vld [vmem:[#allocation84_spill] sm:$0xff]  ;;  %v9852_v32 = vld [vmem:[#allocation86_spill] sm:$0xff] }
 0x45b   : > { %v5760_v46 = vsel %vm3984_vm2, %v9831_v22, %v5758_v13  ;;  %v5750_v45 = vsel %vm3990_vm4, %v5749_v56, %v5748_v20  ;;  %v9834_v39 = vpack.c.bf16 %v9833_v59, %v9833_v59  ;;  %v9836_v42 = vpack.c.bf16 %v9835_v11, %v9835_v11  ;;  %v9853_v49 = vld [vmem:[#allocation83_spill] sm:$0xff]  ;;  %v9855_v13 = vld [vmem:[#allocation94_spill] sm:$0xff]  ;;  %v9856_v20 = vld [vmem:[#allocation97_spill] sm:$0xff] }
 0x45c   : > { %v5752_v5 = vsel %vm3993_vm11, %v5751_v24, %v5750_v45  ;;  %v5762_v15 = vsel %vm3987_vm3, %v5761_v14, %v5760_v46  ;;  %v9839_v7 = vrot.slane %v9838_v16, 3  ;;  %v9842_v26 = vrot.slane %v9841_v27, 3  ;;  %v9857_v22 = vld [vmem:[#allocation95_spill] sm:$0xff]  ;;  %v9858_v46 = vld [vmem:[#allocation29_spill] sm:$0xff]  ;;  %v9859_v45 = vld [vmem:[#allocation90_spill] sm:$0xff] }
 0x45d   : > { %v5702_v31 = vunpack.c.l.b16 %v9834_v39  ;;  %v5710_v34 = vunpack.c.l.b16 %v9836_v42  ;;  %v5754_v50 = vsel %vm3996_vm12, %v5753_v25, %v5752_v5  ;;  %v5764_v54 = vsel %vm3990_vm4, %v5763_v40, %v5762_v15  ;;  %v9862_v27 = vld [vmem:[#allocation88_spill] sm:$0xff] }
 0x45e   : > { %v5780_v10 = vsel %vm3993_vm11, %v9839_v7, %v9837_v3  ;;  %v5794_v9 = vsel %vm3993_vm11, %v9842_v26, %v9840_v61  ;;  %v5756_v23 = vsel %vm3999_vm13, %v5755_v43, %v5754_v50  ;;  %v5766_v19 = vsel %vm3993_vm11, %v5765_v38, %v5764_v54  ;;  %v9861_v61 = vld [vmem:[#allocation91_spill] sm:$0xff] }
 0x45f   : > { %v9844_v8 = vrot.slane %v9843_v33, 2  ;;  %v5783_v62 = vrot.slane %v5702_v31, 1  ;;  %v5768_v57 = vsel %vm3996_vm12, %v5767_v21, %v5766_v19  ;;  %v9846_v37 = vrot.slane %v9845_v12, 2  ;;  %v9860_v21 = vld [vmem:[#allocation28_spill] sm:$0xff] }
 0x460   : > { %v5797_v41 = vrot.slane %v5710_v34, 1  ;;  %v6434_v30 = vrot.slane %v9847_v51, 9  ;;  %v5770_v44 = vsel %vm3999_vm13, %v5769_v2, %v5768_v57  ;;  %v6442_v6 = vrot.slane %v9848_v52, 9  ;;  %v9864_v57 = vld [vmem:[#allocation89_spill] sm:$0xff] }
 0x461   : > { %v5782_v47 = vsel %vm3996_vm12, %v9844_v8, %v5780_v10  ;;  %v5796_v63 = vsel %vm3996_vm12, %v9846_v37, %v5794_v9  ;;  %v6450_v29 = vrot.slane %v9849_v53, 9  ;;  %v5855_v60 = vpack.c.b16 %v5770_v44, %v5756_v23 }
 0x462   : > { %v5784_v17 = vsel %vm3999_vm13, %v5783_v62, %v5782_v47  ;;  %v5798_v4 = vsel %vm3999_vm13, %v5797_v41, %v5796_v63  ;;  %v6458_v36 = vrot.slane %v9850_v28, 9  ;;  %v5351_v48 = vadd.f32 %v6434_v30, %v9847_v51  ;;  %v9866_v63 = vld [vmem:[#allocation92_spill] sm:$0xff] }
 0x463   : > { %v5856_v56 = vpack.c.b16 %v5798_v4, %v5784_v17  ;;  %v5359_v24 = vadd.f32 %v6442_v6, %v9848_v52  ;;  %v5367_v55 = vadd.f32 %v6450_v29, %v9849_v53  ;;  %v5445_v25 = vadd.f32 %v9852_v32, %v9851_v35  ;;  %6767 = vmatprep.mubr.msk.bf16.mxu0 %vm547_vm0, %v5855_v60  ;;  %v9867_v52 = vld [vmem:[#allocation100_spill] sm:$0xff]  ;;  %v9868_v6 = vld [vmem:[#allocation98_spill] sm:$0xff] }
 0x464   : > { %v5375_v43 = vadd.f32 %v6458_v36, %v9850_v28  ;;  %v5446_v58 = vadd.f32 %v9854_v0, %v9853_v49  ;;  %v5453_v1 = vadd.f32 %v9856_v20, %v9855_v13  ;;  %v5454_v14 = vadd.f32 %v9858_v46, %v9857_v22  ;;  %v9870_v28 = vld [vmem:[#allocation101_spill] sm:$0xff]  ;;  %v9874_v22 = vld [vmem:[#allocation32_spill] sm:$0xff] }
 0x465   : > { %6768 = vmatmul.mubr.msk.bf16.vlgmr.msra.gmra.mrb[60].mxu0 %vm547_vm0, %v5856_v56  ;;  %v5447_v18 = vadd.f32 %v5359_v24, %v5351_v48  ;;  %v5509_v40 = vmul.f32 0.25, %v5445_v25  ;;  %v5571_v38 = vpack.c.bf16 %v9859_v45, %v9859_v45  ;;  %v5579_v2 = vpack.c.bf16 %v9860_v21, %v9860_v21  ;;  %v9876_v45 = vld [vmem:[#allocation39_spill] sm:$0xff] }
 0x466   : > { %v5455_v5 = vadd.f32 %v5375_v43, %v5367_v55  ;;  %v5510_v15 = vmul.f32 0.25, %v5446_v58  ;;  %v5517_v59 = vmul.f32 0.25, %v5453_v1  ;;  %v5518_v39 = vmul.f32 0.25, %v5454_v14  ;;  %v9872_v55 = vld [vmem:[#allocation102_spill] sm:$0xff]  ;;  %v9873_v58 = vld [vmem:[#allocation99_spill] sm:$0xff] }
 0x467   : > { %v5511_v31 = vmul.f32 0.25, %v5447_v18  ;;  %v5573_v11 = vpack.c.bf16 %v5509_v40, %v5509_v40  ;;  %v5714_v42 = vunpack.c.l.b16 %v5571_v38  ;;  %v5722_v34 = vunpack.c.l.b16 %v5579_v2  ;;  %v9875_v14 = vld [vmem:[#allocation106_spill] sm:$0xff] }
 0x468   : > { %v5519_v50 = vmul.f32 0.25, %v5455_v5  ;;  %v5574_v54 = vpack.c.bf16 %v5510_v15, %v5510_v15  ;;  %v5581_v3 = vpack.c.bf16 %v5517_v59, %v5517_v59  ;;  %v5582_v16 = vpack.c.bf16 %v5518_v39, %v5518_v39  ;;  %v9877_v2 = vld [vmem:[#allocation34_spill] sm:$0xff]  ;;  %v9878_v5 = vld [vmem:[#allocation36_spill] sm:$0xff] }
 0x469   : > { %v5575_v7 = vpack.c.bf16 %v5511_v31, %v5511_v31  ;;  %v5716_v10 = vunpack.c.l.b16 %v5573_v11  ;;  %v9863_v26 = vrot.slane %v9862_v27, 7  ;;  %v5803_v23 = vrot.slane %v5714_v42, 5  ;;  %v9879_v11 = vld [vmem:[#allocation31_spill] sm:$0xff]  ;;  %v9880_v42 = vld [vmem:[#allocation37_spill] sm:$0xff] }
 0x46a   : > { %v5583_v19 = vpack.c.bf16 %v5519_v50, %v5519_v50  ;;  %v5717_v33 = vunpack.c.l.b16 %v5574_v54  ;;  %v5724_v8 = vunpack.c.l.b16 %v5581_v3  ;;  %v5725_v47 = vunpack.c.l.b16 %v5582_v16  ;;  %v9881_v3 = vld [vmem:[#allocation38_spill] sm:$0xff]  ;;  %v9882_v16 = vld [vmem:[#allocation107_spill] sm:$0xff] }
 0x46b   : > { %v5800_v9 = vsel %vm3981_vm1, %v9863_v26, %v9861_v61  ;;  %v5718_v62 = vunpack.c.l.b16 %v5575_v7  ;;  %v9865_v12 = vrot.slane %v9864_v57, 6  ;;  %v5805_v41 = vrot.slane %v9866_v63, 4  ;;  %v9884_v61 = vld [vmem:[#allocation108_spill] sm:$0xff] }
 0x46c   : > { %v5807_v51 = vrot.slane %v5716_v10, 3  ;;  %v5726_v30 = vunpack.c.l.b16 %v5583_v19  ;;  %v5809_v17 = vrot.slane %v5717_v33, 2  ;;  %v9869_v53 = vrot.slane %v9868_v6, 7  ;;  %v9883_v10 = vld [vmem:[#allocation41_spill] sm:$0xff] }
 0x46d   : > { %v5802_v37 = vsel %vm3984_vm2, %v9865_v12, %v5800_v9  ;;  %v5811_v4 = vrot.slane %v5718_v62, 1  ;;  %v9871_v36 = vrot.slane %v9870_v28, 6  ;;  %v5817_v56 = vrot.slane %v5722_v34, 5  ;;  %v9885_v62 = vld [vmem:[#allocation35_spill] sm:$0xff] }
 0x46e   : > { %v5804_v44 = vsel %vm3987_vm3, %v5803_v23, %v5802_v37  ;;  %v5814_v29 = vsel %vm3981_vm1, %v9869_v53, %v9867_v52  ;;  %v5819_v35 = vrot.slane %v9872_v55, 4  ;;  %v5821_v32 = vrot.slane %v5724_v8, 3 }
 0x46f   : > { %v5806_v60 = vsel %vm3990_vm4, %v5805_v41, %v5804_v44  ;;  %v5816_v48 = vsel %vm3984_vm2, %v9871_v36, %v5814_v29  ;;  %v5823_v25 = vrot.slane %v5725_v47, 2  ;;  %v5825_v0 = vrot.slane %v5726_v30, 1  ;;  %v9886_v41 = vld [vmem:[#allocation42_spill] sm:$0xff] }
 0x470   : > { %v5808_v24 = vsel %vm3993_vm11, %v5807_v51, %v5806_v60  ;;  %v5818_v49 = vsel %vm3987_vm3, %v5817_v56, %v5816_v48  ;;  %v6466_v13 = vrot.slane %v9873_v58, 9  ;;  %v6474_v46 = vrot.slane %v9874_v22, 9  ;;  %v9887_v48 = vld [vmem:[#allocation105_spill] sm:$0xff]  ;;  %v9888_v56 = vld [vmem:[#allocation103_spill] sm:$0xff] }
 0x471   : > { %v5810_v43 = vsel %vm3996_vm12, %v5809_v17, %v5808_v24  ;;  %v5820_v1 = vsel %vm3990_vm4, %v5819_v35, %v5818_v49  ;;  %v6482_v18 = vrot.slane %v9875_v14, 9  ;;  %v6490_v38 = vrot.slane %v9876_v45, 9 }
 0x472   : > { %v5812_v20 = vsel %vm3999_vm13, %v5811_v4, %v5810_v43  ;;  %v5822_v40 = vsel %vm3993_vm11, %v5821_v32, %v5820_v1  ;;  %v5383_v21 = vadd.f32 %v6466_v13, %v9873_v58  ;;  %v5461_v15 = vadd.f32 %v9878_v5, %v9877_v2  ;;  %v9890_v32 = vld [vmem:[#allocation104_spill] sm:$0xff] }
 0x473   : > { %v5824_v59 = vsel %vm3996_vm12, %v5823_v25, %v5822_v40  ;;  %v5391_v39 = vadd.f32 %v6474_v46, %v9874_v22  ;;  %v5399_v31 = vadd.f32 %v6482_v18, %v9875_v14  ;;  %v5462_v34 = vadd.f32 %v9880_v42, %v9879_v11  ;;  %v9893_v22 = vld [vmem:[#allocation110_spill] sm:$0xff]  ;;  %v9894_v46 = vld [vmem:[#allocation109_spill] sm:$0xff] }
 0x474   : > { %v5826_v50 = vsel %vm3999_vm13, %v5825_v0, %v5824_v59  ;;  %v5407_v54 = vadd.f32 %v6490_v38, %v9876_v45  ;;  %v5469_v7 = vadd.f32 %v9882_v16, %v9881_v3  ;;  %v5470_v27 = vadd.f32 %v9884_v61, %v9883_v10  ;;  %v9892_v0 = vld [vmem:[#allocation40_spill] sm:$0xff]  ;;  %v9896_v38 = vld [vmem:[#allocation111_spill] sm:$0xff] }
 0x475   : > { %v5857_v26 = vpack.c.b16 %v5826_v50, %v5812_v20  ;;  %v5463_v9 = vadd.f32 %v5391_v39, %v5383_v21  ;;  %v5525_v23 = vmul.f32 0.25, %v5461_v15  ;;  %v5526_v19 = vmul.f32 0.25, %v5462_v34  ;;  %v9898_v59 = vld [vmem:[#allocation112_spill] sm:$0xff] }
 0x476   : > { %v5471_v33 = vadd.f32 %v5407_v54, %v5399_v31  ;;  %v5533_v8 = vmul.f32 0.25, %v5469_v7  ;;  %v5534_v47 = vmul.f32 0.25, %v5470_v27  ;;  %v5587_v57 = vpack.c.bf16 %v9885_v62, %v9885_v62 }
 0x477   : > { %6771 = vmatprep.mubr.msk.bf16.mxu0 %vm547_vm0, %v5857_v26  ;;  %v5527_v12 = vmul.f32 0.25, %v5463_v9  ;;  %v5589_v37 = vpack.c.bf16 %v5525_v23, %v5525_v23  ;;  %v5590_v63 = vpack.c.bf16 %v5526_v19, %v5526_v19  ;;  %v5595_v51 = vpack.c.bf16 %v9886_v41, %v9886_v41  ;;  %v6356_v26 = vld [vmem:[#allocation15] ss:$0 sm:$0xff]  ;;  %v6491_v9 = vld [vmem:[#allocation18] ss:$0 sm:$0xff] }
 0x478   : > { %v5535_v30 = vmul.f32 0.25, %v5471_v33  ;;  %v5597_v44 = vpack.c.bf16 %v5533_v8, %v5533_v8  ;;  %v5598_v17 = vpack.c.bf16 %v5534_v47, %v5534_v47  ;;  %v5730_v52 = vunpack.c.l.b16 %v5587_v57 }
 0x479   : > { %v5591_v6 = vpack.c.bf16 %v5527_v12, %v5527_v12  ;;  %v5732_v53 = vunpack.c.l.b16 %v5589_v37  ;;  %v5733_v29 = vunpack.c.l.b16 %v5590_v63  ;;  %v5738_v60 = vunpack.c.l.b16 %v5595_v51 }
 0x47a   : > { %v5599_v4 = vpack.c.bf16 %v5535_v30, %v5535_v30  ;;  %v5740_v28 = vunpack.c.l.b16 %v5597_v44  ;;  %v5741_v36 = vunpack.c.l.b16 %v5598_v17  ;;  %v9889_v24 = vrot.slane %v9888_v56, 7 }
 0x47b   : > { %v5734_v35 = vunpack.c.l.b16 %v5591_v6  ;;  %v9891_v25 = vrot.slane %v9890_v32, 6  ;;  %v5831_v49 = vrot.slane %v5730_v52, 5  ;;  %v5833_v58 = vrot.slane %v9892_v0, 4 }
 0x47c   : > { %v5828_v55 = vsel %vm3981_vm1, %v9889_v24, %v9887_v48  ;;  %v5742_v13 = vunpack.c.l.b16 %v5599_v4  ;;  %v5835_v20 = vrot.slane %v5732_v53, 3  ;;  %v5837_v1 = vrot.slane %v5733_v29, 2 }
 0x47d   : > { %v5830_v43 = vsel %vm3984_vm2, %v9891_v25, %v5828_v55  ;;  %v9895_v14 = vrot.slane %v9894_v46, 7  ;;  %v5839_v45 = vrot.slane %v5734_v35, 1  ;;  %v9897_v21 = vrot.slane %v9896_v38, 6 }
 0x47e   : > { %v5832_v40 = vsel %vm3987_vm3, %v5831_v49, %v5830_v43  ;;  %v5845_v5 = vrot.slane %v5738_v60, 5  ;;  %v5847_v39 = vrot.slane %v9898_v59, 4  ;;  %v5849_v31 = vrot.slane %v5740_v28, 3 }
 0x47f   : > { %v5842_v18 = vsel %vm3981_vm1, %v9895_v14, %v9893_v22  ;;  %v5834_v15 = vsel %vm3990_vm4, %v5833_v58, %v5832_v40  ;;  %v5851_v11 = vrot.slane %v5741_v36, 2  ;;  %v5853_v50 = vrot.slane %v5742_v13, 1 }
 0x480   : > { %v5844_v2 = vsel %vm3984_vm2, %v9897_v21, %v5842_v18  ;;  %v5836_v42 = vsel %vm3993_vm11, %v5835_v20, %v5834_v15  ;;  %v6785_v23 = vadd.f32 %v6491_v9, %v6356_v26 }
 0x481   : > { %v5846_v34 = vsel %vm3987_vm3, %v5845_v5, %v5844_v2  ;;  %v5838_v54 = vsel %vm3996_vm12, %v5837_v1, %v5836_v42 }
 0x482   : > { %v5848_v3 = vsel %vm3990_vm4, %v5847_v39, %v5846_v34  ;;  %v5840_v16 = vsel %vm3999_vm13, %v5839_v45, %v5838_v54 }
 0x483   : > { %v5850_v7 = vsel %vm3993_vm11, %v5849_v31, %v5848_v3 }
 0x484   : > { %v5852_v10 = vsel %vm3996_vm12, %v5851_v11, %v5850_v7 }
 0x485   : > { %v5854_v61 = vsel %vm3999_vm13, %v5853_v50, %v5852_v10 }
 0x486   : > { %v5858_v27 = vpack.c.b16 %v5854_v61, %v5840_v16 }
 0x488   : > { %6772 = vmatmul.mubr.msk.bf16.gmra.mrb[64].mxu0 %vm547_vm0, %v5858_v27 }
 0x538   : > { %v6769_v19 = vpop.f32.mrb[60].mxu0 }
 0x539   : > { %v6779_v33 = vadd.f32 %v6769_v19, %v6356_v26  ;;  %v5929_v8 = vpop.f32.mrb[61].mxu0 }
 0x53a   : > { %v6781_v47 = vadd.f32 %v6356_v26, %v5929_v8  ;;  %v6770_v62 = vpop.f32.mrb[62].mxu0 }
 0x53b   : > { %v6780_v57 = vadd.f32 %v6779_v33, %v6491_v9  ;;  %v6784_v12 = vadd.f32 %v6785_v23, %v6770_v62  ;;  %v5932_v37 = vpop.f32.mrb[63].mxu0 }
 0x53c   : > { %v6782_v63 = vadd.f32 %v6781_v47, %v6491_v9  ;;  %v6786_v41 = vadd.f32 %v6785_v23, %v5932_v37 }
 0x53d   : > { %v5970_v51 = vmax.f32 %v6780_v57, 0.0  ;;  %v5971_v30 = vmax.f32 %v6784_v12, 0.0 }
 0x53e   : > { %v5968_v44 = vmax.f32 %v6782_v63, 0.0  ;;  %v5969_v17 = vmax.f32 %v6786_v41, 0.0 }
 0x53f   : > { %5978 = vst [vmem:[%s458_s27 + $0x10] sm:$0xff] %v5970_v51  ;;  %5979 = vst [vmem:[%s458_s27 + $0x18] sm:$0xff] %v5971_v30 }
 0x540   : > { %5976 = vst [vmem:[%s458_s27] sm:$0xff] %v5968_v44  ;;  %5977 = vst [vmem:[%s458_s27 + $0x8] sm:$0xff] %v5969_v17 }
 0x55b   : > { %v6773_v52 = vpop.f32.mrb[64].mxu0 }
 0x55c   : > { %v6788_v6 = vadd.f32 %v6785_v23, %v6773_v52  ;;  %v5945_v53 = vpop.f32.mrb[65].mxu0 }
 0x55d   : > { %v6790_v29 = vadd.f32 %v6785_v23, %v5945_v53  ;;  %v6774_v60 = vpop.f32.mrb[66].mxu0 }
 0x55e   : > { %v5974_v4 = vmax.f32 %v6788_v6, 0.0  ;;  %v6792_v28 = vadd.f32 %v6785_v23, %v6774_v60  ;;  %v5948_v36 = vpop.f32.mrb[67].mxu0 }
 0x55f   : > { %v5972_v48 = vmax.f32 %v6790_v29, 0.0  ;;  %v6794_v56 = vadd.f32 %v6785_v23, %v5948_v36 }
 0x560   : > { %5982 = vst [vmem:[%s458_s27 + $0x30] sm:$0xff] %v5974_v4  ;;  %v5975_v24 = vmax.f32 %v6792_v28, 0.0 }
 0x561   : > { %5980 = vst [vmem:[%s458_s27 + $0x20] sm:$0xff] %v5972_v48  ;;  %v5973_v55 = vmax.f32 %v6794_v56, 0.0 }
 0x562   : > { %5983 = vst [vmem:[%s458_s27 + $0x38] sm:$0xff] %v5975_v24 }
 0x563   : > { %5981 = vst [vmem:[%s458_s27 + $0x28] sm:$0xff] %v5973_v55 }
 0x564   : > { %7283 = shalt.err (!%p7280_p10)
}
 0x565   : > { %s7284_s13 = scalar_lea.hbm %s9549_s22, 1024  ;;  %s7288_s26 = scalar_lea.hbm %s9899_s23, 2048 }
 0x566   : > { %p7285_p11 = scmp.ne.s32.totalorder %s9549_s22, %s7284_s13  ;;  %p7289_p7 = scmp.lt.u32.totalorder %s9549_s22, %s9899_s23 }
 0x567   : > { %p7290_p6 = scmp.lt.u32.totalorder %s7288_s26, %s7284_s13  ;;  %p7292_p12 = scmp.lt.u32.totalorder %s7284_s13, %s9549_s22 }
 0x568   : > { %p7286_p3 = pnand %p7285_p11, %p9900_p1 }
 0x569   : > { %p7291_p9 = por %p7290_p6, %p7289_p7 }
 0x56a   : > { %p7287_p5 = pneg %p7286_p3 }
 0x56b   : > { %p7293_p13 = por %p7292_p12, %p7291_p9 }
 0x56d   : > { %p7294_p0 = pnand %p7293_p13, %p7287_p5 }
 0x56f   : > { %7297 = shalt.err (!%p7294_p0)
}
 0x570   : > { %s7373_s21 = smov 128   ;;  %s7374_s18 = smov 8  }
 0x571   : > { %6837 = dma.vmem_to_hbm [thread:$0]  (%p9900_p1), %s9544_s14, 1024, %s9549_s22, %s5985_s15, %s7373_s21, %s7373_s21, %s7374_s18  }
 0x572 PF: > { %s6013_s16 = sand.u32 1, %s7340_s30   ;;  %p9901_p2 = scmp.ne.s32.totalorder %s9652_s24, 0 }
 0x573   : > { %p9902_p8 = scmp.ge.s32.totalorder %s7352_s12, 2  ;;  %s6014_s20 = scalar_lea.sflag [#allocation6], %s6013_s16 }
 0x575   : > { %p6869_p4 = pnand %p9902_p8, %p9901_p2 }
 0x577   : > { %7335 = dma.done.wait (!%p6869_p4), %s6014_s20, 1024  }
 0x578   : > { %7337 = vsyncadd (!%p6869_p4), %s6014_s20, 4294966272  ;;  %p26_p10 = scmp.ge.s32.totalorder %s7649_s19, 4   ;;  %s9903_s30 = smov %s7344_s10 }
 0x579   : > { %s9904_s10 = smov %s7348_s11  ;;  %s9905_s11 = smov %s7660_s17 }
 0x57a   : > { %s9906_s12 = smov %s7649_s19  ;;  %28 = sbr.rel (!%p26_p10) target bundleno = 12 (0xc), region = 136 }
 0x581   :  { %6019 = vsyncpa [#allocation5], 1 }
 0x582   :  { %6021 = vsyncpa [#allocation5 + $0x1], 1 }
 0x583   :  { %6022 = vsyncpa [#allocation8], 1 }
 0x584   :  { %6023 = vsyncpa [#allocation11], 1 }
 0x585   :  { %6024 = vsyncpa [#allocation14], 1 }
 0x586   :  { %6025 = vsyncpa [#allocation17], 1 }
 0x587   :  { %6026 = vsyncpa [#allocation6], 1 }
 0x588   :  { %6028 = vsyncpa [#allocation6 + $0x1], 1 }

</bundles_post_ra>
